<compile_context>
chip_gen: v7x
topology: tpu7x:2x2x1
jax: 0.10.0
libtpu: 0.0.40
codegen_flags: <defaults>
</compile_context>

<pallas_src>
import math
import jax
import jax.numpy as jnp
from jax.experimental import pallas as pl
from jax.experimental.pallas import tpu as pltpu

KSIZE = 5
PAD = 2
NPAD = 128     # padded output-class dim (lane-dense final store); assumes n_classes <= 128
N1 = 512       # conv1 out lanes: 2(parity of out-w) * 16(out-w half, 14 valid) * 16(Cout)
N2 = 512       # conv2 out lanes: 2(parity of out-w) * 8(out-w half, 7 valid)  * 32(Cout)
K2 = 256       # conv2 contraction: 16 pooled-W positions (14 valid) * 16(Cin)


# --------------------------------------------------------------------------
# Fused kernel: conv1 -> relu -> pool -> conv2 -> relu -> pool -> linear
# --------------------------------------------------------------------------
def fused_cnn_kernel(x_ref, w1b_ref, b1_ref, w2b_ref, b2_ref, wo_ref, bo_ref,
                     o_ref, xp2_ref):
    # x_ref:   (TB, 4, 10, 32)   f32  padded input frame, rows split by (row mod 4)
    # w1b_ref: (5, 32, 512)      bf16 conv1 banded weights (even/odd out-w halves)
    # b1_ref:  (1, 512)          f32
    # w2b_ref: (5, 256, 512)     bf16 conv2 banded weights (W pad + junk lanes baked in)
    # b2_ref:  (1, 512)          f32
    # wo_ref:  (2048, 128)       bf16 linear weights, rows = (h, w, c), zero pad rows
    # bo_ref:  (1, 128)          f32
    # o_ref:   (1, TB, 128)      f32
    # xp2_ref: (TB, 2, 10, 256)  f32 scratch: conv2 input with H zero-pad, row-parity planes
    TB = x_ref.shape[0]

    # ---- conv1 (5x5, pad 2, Cin=1 -> Cout=16) -----------------------------
    # 4 row-residue accumulators (output rows 4m+r); every strip is a contiguous
    # static slice of the residue-split input planes.
    acc1 = [jnp.zeros((TB * 8, N1), jnp.float32) for _ in range(4)]
    for kh in range(KSIZE):
        w1k = w1b_ref[kh]                                   # (32, 512) bf16
        for r in range(4):
            s0, q = divmod(r + kh, 4)                       # plane q, start row s0
            strip = x_ref[:, q, s0:s0 + 8, :].astype(jnp.bfloat16)
            strip = strip.reshape(TB * 8, 32)
            acc1[r] = acc1[r] + jnp.dot(strip, w1k,
                                        preferred_element_type=jnp.float32)
    b1 = b1_ref[...]
    y1 = [jnp.maximum(a + b1, 0.0) for a in acc1]           # bias + ReLU (f32, VPU)

    # 2x2 max-pool: H via elementwise max of residue accumulators, W via lane halves.
    pool_e = jnp.maximum(y1[0], y1[1])                      # pooled rows j = 0,2,4,...
    pool_o = jnp.maximum(y1[2], y1[3])                      # pooled rows j = 1,3,5,...
    p_e = jnp.maximum(pool_e[:, :256], pool_e[:, 256:]).reshape(TB, 8, 256)
    p_o = jnp.maximum(pool_o[:, :256], pool_o[:, 256:]).reshape(TB, 8, 256)

    # ---- stage conv2 input in VMEM scratch (H zero-pad via the zero frame) ----
    z1 = jnp.zeros((TB, 1, 256), jnp.float32)
    z2 = jnp.zeros((TB, 2, 256), jnp.float32)
    xp2_ref[:, 0, 0:1, :] = z1                              # top pad (row -2)
    xp2_ref[:, 0, 1:8, :] = p_e[:, 0:7, :]                  # pooled rows 0,2,...,12
    xp2_ref[:, 0, 8:10, :] = z2                             # bottom pad
    xp2_ref[:, 1, 0:1, :] = z1                              # top pad (row -1)
    xp2_ref[:, 1, 1:8, :] = p_o[:, 0:7, :]                  # pooled rows 1,3,...,13
    xp2_ref[:, 1, 8:10, :] = z2                             # bottom pad

    # ---- conv2 (5x5, pad 2, Cin=16 -> Cout=32): even/odd output-row accumulators ----
    acc2_e = jnp.zeros((TB * 8, N2), jnp.float32)
    acc2_o = jnp.zeros((TB * 8, N2), jnp.float32)
    for kh in range(KSIZE):
        w2k = w2b_ref[kh]                                   # (256, 512) bf16
        se = xp2_ref[:, kh % 2, (kh // 2):(kh // 2) + 8, :]
        so = xp2_ref[:, (kh + 1) % 2, ((kh + 1) // 2):((kh + 1) // 2) + 8, :]
        se = se.astype(jnp.bfloat16).reshape(TB * 8, K2)
        so = so.astype(jnp.bfloat16).reshape(TB * 8, K2)
        acc2_e = acc2_e + jnp.dot(se, w2k, preferred_element_type=jnp.float32)
        acc2_o = acc2_o + jnp.dot(so, w2k, preferred_element_type=jnp.float32)
    b2 = b2_ref[...]
    y2_e = jnp.maximum(acc2_e + b2, 0.0)
    y2_o = jnp.maximum(acc2_o + b2, 0.0)
    h2 = jnp.maximum(y2_e, y2_o)                            # H pool (VPU)
    p2 = jnp.maximum(h2[:, :256], h2[:, 256:])              # W pool (lane halves), (TB*8, 256)

    # ---- fused linear (rows of wo pre-permuted to (h, w, c); pad rows are zero) ----
    flat = p2.reshape(TB, 8 * 256).astype(jnp.bfloat16)     # 8 rows / image -> 2048 lanes
    out = jnp.dot(flat, wo_ref[...],
                  preferred_element_type=jnp.float32) + bo_ref[...]
    o_ref[0] = out                                          # (TB, 128) lane-dense store


# --------------------------------------------------------------------------
# Host-side weight preparation (done once, outside the hot path)
# --------------------------------------------------------------------------
def _banded_weights(w_hwio, w_in_valid, w_in_total, w_out, pad_left):
    """band[kh, f*Cin+ci, w*Cout+co] = w[kh, f-(w-pad_left), ci, co] if valid else 0."""
    kh_, kw_, cin, cout = w_hwio.shape
    f = jnp.arange(w_in_total)
    w = jnp.arange(w_out)
    kw = f[:, None] - (w[None, :] - pad_left)               # (w_in_total, w_out)
    valid = ((kw >= 0) & (kw < kw_) & (f[:, None] < w_in_valid)).astype(w_hwio.dtype)
    kw_safe = jnp.clip(kw, 0, kw_ - 1)
    band = w_hwio[:, kw_safe, :, :]                         # (KH, w_in_total, w_out, Cin, Cout)
    band = band * valid[None, :, :, None, None]
    band = jnp.transpose(band, (0, 1, 3, 2, 4))             # (KH, w_in_total, Cin, w_out, Cout)
    return band.reshape(kh_, w_in_total * cin, w_out * cout)


def _evenodd_cols(band, w_out, cout, half_pad):
    """Reorder output columns into [even out-w | odd out-w] halves, each padded to half_pad."""
    kh_, k_, _ = band.shape
    b = band.reshape(kh_, k_, w_out, cout)
    e = b[:, :, 0::2, :]
    o = b[:, :, 1::2, :]
    e = jnp.pad(e, ((0, 0), (0, 0), (0, half_pad - e.shape[2]), (0, 0)))
    o = jnp.pad(o, ((0, 0), (0, 0), (0, half_pad - o.shape[2]), (0, 0)))
    return jnp.concatenate([e, o], axis=2).reshape(kh_, k_, 2 * half_pad * cout)


def prepare_params(params, n_classes):
    assert n_classes <= NPAD
    # conv1: input = zero-padded frame (pad in the data), output W 28 -> even/odd halves of 16.
    w1b = _banded_weights(params["w1"], 32, 32, 28, 0)              # (5, 32, 448)
    w1b = _evenodd_cols(w1b, 28, 16, 16).astype(jnp.bfloat16)       # (5, 32, 512)
    # conv2: W zero-pad baked into the band; junk pooled-W lanes (14,15) zeroed out.
    w2b = _banded_weights(params["w2"], 14, 16, 14, PAD)            # (5, 256, 448)
    w2b = _evenodd_cols(w2b, 14, 32, 8).astype(jnp.bfloat16)        # (5, 256, 512)
    b1t = jnp.tile(params["b1"], 32)[None, :]                       # (1, 512) f32
    b2t = jnp.tile(params["b2"], 16)[None, :]                       # (1, 512) f32
    # Linear weights: CHW flatten order (PyTorch x.view) -> kernel's (h, w, c) order,
    # pad h/w to 8 with zero rows (junk pooled positions) and N to 128 (lane-dense store).
    wo = params["w_out"].reshape(32, 7, 7, n_classes)               # (c, h, w, n)
    wo = jnp.transpose(wo, (1, 2, 0, 3))                            # (h, w, c, n)
    wo = jnp.pad(wo, ((0, 1), (0, 1), (0, 0), (0, NPAD - n_classes)))
    wo = wo.reshape(8 * 8 * 32, NPAD).astype(jnp.bfloat16)          # (2048, 128)
    bo = jnp.pad(params["b_out"], (0, NPAD - n_classes))[None, :]   # (1, 128) f32
    return dict(w1b=w1b, b1t=b1t, w2b=w2b, b2t=b2t, wo=wo, bo=bo)


# --------------------------------------------------------------------------
# Wrapper
# --------------------------------------------------------------------------
def _pick_tb(B):
    # Batch-aware tile: big batches get TB=64 (v7x-safe with the vmem limit below),
    # always >= 2 grid steps when B >= 2 so the parallel axis can use both TCs.
    if B >= 128:
        return 64
    if B >= 64:
        return 32
    if B >= 2:
        return (B + 1) // 2
    return 1


def cnn_forward(prep, x_nchw, n_classes):
    B = x_nchw.shape[0]
    TB = _pick_tb(B)
    G = -(-B // TB)
    Bp = G * TB

    # Build the zero-padded conv frame (40 rows: 2 top pad, 28 image, 10 bottom pad)
    # and split rows by residue mod 4 so every in-kernel strip is a contiguous slice.
    x = x_nchw[:, 0, :, :]                                      # (B, 28, 28), Cin = 1
    x = jnp.pad(x, ((0, Bp - B), (PAD, PAD + 8), (PAD, PAD)))   # (Bp, 40, 32)
    x = x.reshape(Bp, 10, 4, 32).transpose(0, 2, 1, 3)          # (Bp, 4, 10, 32)

    wspec = dict(pipeline_mode=pl.Buffered(1))                  # constant-index -> single buffer
    out = pl.pallas_call(
        fused_cnn_kernel,
        out_shape=jax.ShapeDtypeStruct((G, TB, NPAD), jnp.float32),
        grid=(G,),
        in_specs=[
            pl.BlockSpec((TB, 4, 10, 32), lambda g: (g, 0, 0, 0)),
            pl.BlockSpec((KSIZE, 32, N1), lambda g: (0, 0, 0), **wspec),
            pl.BlockSpec((1, N1), lambda g: (0, 0), **wspec),
            pl.BlockSpec((KSIZE, K2, N2), lambda g: (0, 0, 0), **wspec),
            pl.BlockSpec((1, N2), lambda g: (0, 0), **wspec),
            pl.BlockSpec((8 * 8 * 32, NPAD), lambda g: (0, 0), **wspec),
            pl.BlockSpec((1, NPAD), lambda g: (0, 0), **wspec),
        ],
        out_specs=pl.BlockSpec((1, TB, NPAD), lambda g: (g, 0, 0)),
        scratch_shapes=[pltpu.VMEM((TB, 2, 10, 256), jnp.float32)],
        compiler_params=pltpu.CompilerParams(
            dimension_semantics=("parallel",),
            vmem_limit_bytes=48 * 1024 * 1024),
    )(x, prep["w1b"], prep["b1t"], prep["w2b"], prep["b2t"], prep["wo"], prep["bo"])

    return out.reshape(Bp, NPAD)[:B, :n_classes]


# --------------------------------------------------------------------------
# Pure-JAX reference (correctness check only) and init
# --------------------------------------------------------------------------
def ref_forward(params, x_nchw):
    def conv_block(x, w_hwio, b):
        w_oihw = jnp.transpose(w_hwio, (3, 2, 0, 1))
        y = jax.lax.conv_general_dilated(
            x, w_oihw, window_strides=(1, 1),
            padding=((PAD, PAD), (PAD, PAD)),
            dimension_numbers=("NCHW", "OIHW", "NCHW"))
        y = y + b[None, :, None, None]
        y = jnp.maximum(y, 0.0)
        B, C, H, W = y.shape
        return y.reshape(B, C, H // 2, 2, W // 2, 2).max(axis=(3, 5))

    y = conv_block(x_nchw, params["w1"], params["b1"])
    y = conv_block(y, params["w2"], params["b2"])
    y = y.reshape(y.shape[0], -1)                              # CHW flatten (PyTorch order)
    return y @ params["w_out"] + params["b_out"]


def init_params(key, n_classes):
    ks = jax.random.split(key, 6)

    def u(k, shape, fan_in):
        bound = 1.0 / math.sqrt(fan_in)
        return jax.random.uniform(k, shape, jnp.float32, -bound, bound)

    return dict(
        w1=u(ks[0], (KSIZE, KSIZE, 1, 16), KSIZE * KSIZE * 1),
        b1=u(ks[1], (16,), KSIZE * KSIZE * 1),
        w2=u(ks[2], (KSIZE, KSIZE, 16, 32), KSIZE * KSIZE * 16),
        b2=u(ks[3], (32,), KSIZE * KSIZE * 16),
        w_out=u(ks[4], (32 * 7 * 7, n_classes), 32 * 7 * 7),
        b_out=u(ks[5], (n_classes,), 32 * 7 * 7),
    )


if __name__ == "__main__":
    key = jax.random.PRNGKey(0)
    pkey, xkey = jax.random.split(key)
    n_classes = 10  # MNIST
    params = init_params(pkey, n_classes)
    x = jax.random.normal(xkey, (8, 1, 28, 28), jnp.float32)

    prep = prepare_params(params, n_classes)                   # one-time weight prep
    fwd = jax.jit(lambda p, xx: cnn_forward(p, xx, n_classes))

    out = jax.block_until_ready(fwd(prep, x))
    ref = jax.block_until_ready(ref_forward(params, x))

    assert out.shape == (8, n_classes), out.shape
    err = float(jnp.max(jnp.abs(out - ref)))
    # bf16 MXU path (f32 accumulation): tolerance loosened vs. the pure-f32 variant.
    assert err < 5e-2, err
    print("KERNEL_OK")
</pallas_src>

<mosaic_0001>
module attributes {stable_mosaic.version = 11 : i64} {
  func.func @fused_cnn_kernel(%arg0: i32, %arg1: memref<4x4x10x32xf32, #tpu.memory_space<vmem>>, %arg2: memref<5x32x512xbf16, #tpu.memory_space<vmem>>, %arg3: memref<1x512xf32, #tpu.memory_space<vmem>>, %arg4: memref<5x256x512xbf16, #tpu.memory_space<vmem>>, %arg5: memref<1x512xf32, #tpu.memory_space<vmem>>, %arg6: memref<2048x128xbf16, #tpu.memory_space<vmem>>, %arg7: memref<1x128xf32, #tpu.memory_space<vmem>>, %arg8: memref<1x4x128xf32, #tpu.memory_space<vmem>>, %arg9: memref<4x2x10x256xf32, #tpu.memory_space<vmem>>) attributes {dimension_semantics = [#tpu.dimension_semantics<parallel>], iteration_bounds = array<i64: 2>, scalar_prefetch = 0 : i64, scratch_operands = 1 : i64, tpu.core_type = #tpu.core_type<tc>, window_params = [{transform_indices = @transform_0, window_bounds = array<i64: 4, 4, 10, 32>}, {pipeline_mode = #tpu.pipeline_mode<synchronous>, transform_indices = @transform_1, window_bounds = array<i64: 5, 32, 512>}, {pipeline_mode = #tpu.pipeline_mode<synchronous>, transform_indices = @transform_2, window_bounds = array<i64: 1, 512>}, {pipeline_mode = #tpu.pipeline_mode<synchronous>, transform_indices = @transform_3, window_bounds = array<i64: 5, 256, 512>}, {pipeline_mode = #tpu.pipeline_mode<synchronous>, transform_indices = @transform_4, window_bounds = array<i64: 1, 512>}, {pipeline_mode = #tpu.pipeline_mode<synchronous>, transform_indices = @transform_5, window_bounds = array<i64: 2048, 128>}, {pipeline_mode = #tpu.pipeline_mode<synchronous>, transform_indices = @transform_6, window_bounds = array<i64: 1, 128>}, {transform_indices = @transform_7, window_bounds = array<i64: 1, 4, 128>}]} {
    %cst = arith.constant 0.000000e+00 : f32
    %0 = vector.broadcast %cst : f32 to vector<32x512xf32>
    %cst_0 = arith.constant 0.000000e+00 : f32
    %1 = vector.broadcast %cst_0 : f32 to vector<32x512xf32>
    %cst_1 = arith.constant 0.000000e+00 : f32
    %2 = vector.broadcast %cst_1 : f32 to vector<32x512xf32>
    %cst_2 = arith.constant 0.000000e+00 : f32
    %3 = vector.broadcast %cst_2 : f32 to vector<32x512xf32>
    %c0 = arith.constant 0 : index
    %c0_3 = arith.constant 0 : index
    %c0_4 = arith.constant 0 : index
    %4 = vector.load %arg2[%c0, %c0_3, %c0_4] : memref<5x32x512xbf16, #tpu.memory_space<vmem>>, vector<1x32x512xbf16>
    %5 = vector.shape_cast %4 : vector<1x32x512xbf16> to vector<32x512xbf16>
    %c0_5 = arith.constant 0 : index
    %c0_6 = arith.constant 0 : index
    %c0_7 = arith.constant 0 : index
    %c0_8 = arith.constant 0 : index
    %6 = vector.load %arg1[%c0_5, %c0_6, %c0_7, %c0_8] : memref<4x4x10x32xf32, #tpu.memory_space<vmem>>, vector<4x1x8x32xf32>
    %7 = vector.shape_cast %6 : vector<4x1x8x32xf32> to vector<4x8x32xf32>
    %8 = arith.truncf %7 : vector<4x8x32xf32> to vector<4x8x32xbf16>
    %9 = vector.shape_cast %8 : vector<4x8x32xbf16> to vector<32x32xbf16>
    %cst_9 = arith.constant dense<0.000000e+00> : vector<32x512xf32>
    %10 = tpu.matmul %9, %5, %cst_9 {dimension_numbers = #tpu.dot_dimension_numbers<[1], [0], [0], [1], [0, 0, 1, 1], [], []>} : vector<32x32xbf16>, vector<32x512xbf16>, vector<32x512xf32> -> vector<32x512xf32>
    %11 = arith.addf %0, %10 : vector<32x512xf32>
    %c0_10 = arith.constant 0 : index
    %c1 = arith.constant 1 : index
    %c0_11 = arith.constant 0 : index
    %c0_12 = arith.constant 0 : index
    %12 = vector.load %arg1[%c0_10, %c1, %c0_11, %c0_12] : memref<4x4x10x32xf32, #tpu.memory_space<vmem>>, vector<4x1x8x32xf32>
    %13 = vector.shape_cast %12 : vector<4x1x8x32xf32> to vector<4x8x32xf32>
    %14 = arith.truncf %13 : vector<4x8x32xf32> to vector<4x8x32xbf16>
    %15 = vector.shape_cast %14 : vector<4x8x32xbf16> to vector<32x32xbf16>
    %cst_13 = arith.constant dense<0.000000e+00> : vector<32x512xf32>
    %16 = tpu.matmul %15, %5, %cst_13 {dimension_numbers = #tpu.dot_dimension_numbers<[1], [0], [0], [1], [0, 0, 1, 1], [], []>} : vector<32x32xbf16>, vector<32x512xbf16>, vector<32x512xf32> -> vector<32x512xf32>
    %17 = arith.addf %1, %16 : vector<32x512xf32>
    %c0_14 = arith.constant 0 : index
    %c2 = arith.constant 2 : index
    %c0_15 = arith.constant 0 : index
    %c0_16 = arith.constant 0 : index
    %18 = vector.load %arg1[%c0_14, %c2, %c0_15, %c0_16] : memref<4x4x10x32xf32, #tpu.memory_space<vmem>>, vector<4x1x8x32xf32>
    %19 = vector.shape_cast %18 : vector<4x1x8x32xf32> to vector<4x8x32xf32>
    %20 = arith.truncf %19 : vector<4x8x32xf32> to vector<4x8x32xbf16>
    %21 = vector.shape_cast %20 : vector<4x8x32xbf16> to vector<32x32xbf16>
    %cst_17 = arith.constant dense<0.000000e+00> : vector<32x512xf32>
    %22 = tpu.matmul %21, %5, %cst_17 {dimension_numbers = #tpu.dot_dimension_numbers<[1], [0], [0], [1], [0, 0, 1, 1], [], []>} : vector<32x32xbf16>, vector<32x512xbf16>, vector<32x512xf32> -> vector<32x512xf32>
    %23 = arith.addf %2, %22 : vector<32x512xf32>
    %c0_18 = arith.constant 0 : index
    %c3 = arith.constant 3 : index
    %c0_19 = arith.constant 0 : index
    %c0_20 = arith.constant 0 : index
    %24 = vector.load %arg1[%c0_18, %c3, %c0_19, %c0_20] : memref<4x4x10x32xf32, #tpu.memory_space<vmem>>, vector<4x1x8x32xf32>
    %25 = vector.shape_cast %24 : vector<4x1x8x32xf32> to vector<4x8x32xf32>
    %26 = arith.truncf %25 : vector<4x8x32xf32> to vector<4x8x32xbf16>
    %27 = vector.shape_cast %26 : vector<4x8x32xbf16> to vector<32x32xbf16>
    %cst_21 = arith.constant dense<0.000000e+00> : vector<32x512xf32>
    %28 = tpu.matmul %27, %5, %cst_21 {dimension_numbers = #tpu.dot_dimension_numbers<[1], [0], [0], [1], [0, 0, 1, 1], [], []>} : vector<32x32xbf16>, vector<32x512xbf16>, vector<32x512xf32> -> vector<32x512xf32>
    %29 = arith.addf %3, %28 : vector<32x512xf32>
    %c1_22 = arith.constant 1 : index
    %c0_23 = arith.constant 0 : index
    %c0_24 = arith.constant 0 : index
    %30 = vector.load %arg2[%c1_22, %c0_23, %c0_24] : memref<5x32x512xbf16, #tpu.memory_space<vmem>>, vector<1x32x512xbf16>
    %31 = vector.shape_cast %30 : vector<1x32x512xbf16> to vector<32x512xbf16>
    %c0_25 = arith.constant 0 : index
    %c1_26 = arith.constant 1 : index
    %c0_27 = arith.constant 0 : index
    %c0_28 = arith.constant 0 : index
    %32 = vector.load %arg1[%c0_25, %c1_26, %c0_27, %c0_28] : memref<4x4x10x32xf32, #tpu.memory_space<vmem>>, vector<4x1x8x32xf32>
    %33 = vector.shape_cast %32 : vector<4x1x8x32xf32> to vector<4x8x32xf32>
    %34 = arith.truncf %33 : vector<4x8x32xf32> to vector<4x8x32xbf16>
    %35 = vector.shape_cast %34 : vector<4x8x32xbf16> to vector<32x32xbf16>
    %cst_29 = arith.constant dense<0.000000e+00> : vector<32x512xf32>
    %36 = tpu.matmul %35, %31, %cst_29 {dimension_numbers = #tpu.dot_dimension_numbers<[1], [0], [0], [1], [0, 0, 1, 1], [], []>} : vector<32x32xbf16>, vector<32x512xbf16>, vector<32x512xf32> -> vector<32x512xf32>
    %37 = arith.addf %11, %36 : vector<32x512xf32>
    %c0_30 = arith.constant 0 : index
    %c2_31 = arith.constant 2 : index
    %c0_32 = arith.constant 0 : index
    %c0_33 = arith.constant 0 : index
    %38 = vector.load %arg1[%c0_30, %c2_31, %c0_32, %c0_33] : memref<4x4x10x32xf32, #tpu.memory_space<vmem>>, vector<4x1x8x32xf32>
    %39 = vector.shape_cast %38 : vector<4x1x8x32xf32> to vector<4x8x32xf32>
    %40 = arith.truncf %39 : vector<4x8x32xf32> to vector<4x8x32xbf16>
    %41 = vector.shape_cast %40 : vector<4x8x32xbf16> to vector<32x32xbf16>
    %cst_34 = arith.constant dense<0.000000e+00> : vector<32x512xf32>
    %42 = tpu.matmul %41, %31, %cst_34 {dimension_numbers = #tpu.dot_dimension_numbers<[1], [0], [0], [1], [0, 0, 1, 1], [], []>} : vector<32x32xbf16>, vector<32x512xbf16>, vector<32x512xf32> -> vector<32x512xf32>
    %43 = arith.addf %17, %42 : vector<32x512xf32>
    %c0_35 = arith.constant 0 : index
    %c3_36 = arith.constant 3 : index
    %c0_37 = arith.constant 0 : index
    %c0_38 = arith.constant 0 : index
    %44 = vector.load %arg1[%c0_35, %c3_36, %c0_37, %c0_38] : memref<4x4x10x32xf32, #tpu.memory_space<vmem>>, vector<4x1x8x32xf32>
    %45 = vector.shape_cast %44 : vector<4x1x8x32xf32> to vector<4x8x32xf32>
    %46 = arith.truncf %45 : vector<4x8x32xf32> to vector<4x8x32xbf16>
    %47 = vector.shape_cast %46 : vector<4x8x32xbf16> to vector<32x32xbf16>
    %cst_39 = arith.constant dense<0.000000e+00> : vector<32x512xf32>
    %48 = tpu.matmul %47, %31, %cst_39 {dimension_numbers = #tpu.dot_dimension_numbers<[1], [0], [0], [1], [0, 0, 1, 1], [], []>} : vector<32x32xbf16>, vector<32x512xbf16>, vector<32x512xf32> -> vector<32x512xf32>
    %49 = arith.addf %23, %48 : vector<32x512xf32>
    %c0_40 = arith.constant 0 : index
    %c0_41 = arith.constant 0 : index
    %c1_42 = arith.constant 1 : index
    %c0_43 = arith.constant 0 : index
    %50 = vector.load %arg1[%c0_40, %c0_41, %c1_42, %c0_43] : memref<4x4x10x32xf32, #tpu.memory_space<vmem>>, vector<4x1x8x32xf32>
    %51 = vector.shape_cast %50 : vector<4x1x8x32xf32> to vector<4x8x32xf32>
    %52 = arith.truncf %51 : vector<4x8x32xf32> to vector<4x8x32xbf16>
    %53 = vector.shape_cast %52 : vector<4x8x32xbf16> to vector<32x32xbf16>
    %cst_44 = arith.constant dense<0.000000e+00> : vector<32x512xf32>
    %54 = tpu.matmul %53, %31, %cst_44 {dimension_numbers = #tpu.dot_dimension_numbers<[1], [0], [0], [1], [0, 0, 1, 1], [], []>} : vector<32x32xbf16>, vector<32x512xbf16>, vector<32x512xf32> -> vector<32x512xf32>
    %55 = arith.addf %29, %54 : vector<32x512xf32>
    %c2_45 = arith.constant 2 : index
    %c0_46 = arith.constant 0 : index
    %c0_47 = arith.constant 0 : index
    %56 = vector.load %arg2[%c2_45, %c0_46, %c0_47] : memref<5x32x512xbf16, #tpu.memory_space<vmem>>, vector<1x32x512xbf16>
    %57 = vector.shape_cast %56 : vector<1x32x512xbf16> to vector<32x512xbf16>
    %c0_48 = arith.constant 0 : index
    %c2_49 = arith.constant 2 : index
    %c0_50 = arith.constant 0 : index
    %c0_51 = arith.constant 0 : index
    %58 = vector.load %arg1[%c0_48, %c2_49, %c0_50, %c0_51] : memref<4x4x10x32xf32, #tpu.memory_space<vmem>>, vector<4x1x8x32xf32>
    %59 = vector.shape_cast %58 : vector<4x1x8x32xf32> to vector<4x8x32xf32>
    %60 = arith.truncf %59 : vector<4x8x32xf32> to vector<4x8x32xbf16>
    %61 = vector.shape_cast %60 : vector<4x8x32xbf16> to vector<32x32xbf16>
    %cst_52 = arith.constant dense<0.000000e+00> : vector<32x512xf32>
    %62 = tpu.matmul %61, %57, %cst_52 {dimension_numbers = #tpu.dot_dimension_numbers<[1], [0], [0], [1], [0, 0, 1, 1], [], []>} : vector<32x32xbf16>, vector<32x512xbf16>, vector<32x512xf32> -> vector<32x512xf32>
    %63 = arith.addf %37, %62 : vector<32x512xf32>
    %c0_53 = arith.constant 0 : index
    %c3_54 = arith.constant 3 : index
    %c0_55 = arith.constant 0 : index
    %c0_56 = arith.constant 0 : index
    %64 = vector.load %arg1[%c0_53, %c3_54, %c0_55, %c0_56] : memref<4x4x10x32xf32, #tpu.memory_space<vmem>>, vector<4x1x8x32xf32>
    %65 = vector.shape_cast %64 : vector<4x1x8x32xf32> to vector<4x8x32xf32>
    %66 = arith.truncf %65 : vector<4x8x32xf32> to vector<4x8x32xbf16>
    %67 = vector.shape_cast %66 : vector<4x8x32xbf16> to vector<32x32xbf16>
    %cst_57 = arith.constant dense<0.000000e+00> : vector<32x512xf32>
    %68 = tpu.matmul %67, %57, %cst_57 {dimension_numbers = #tpu.dot_dimension_numbers<[1], [0], [0], [1], [0, 0, 1, 1], [], []>} : vector<32x32xbf16>, vector<32x512xbf16>, vector<32x512xf32> -> vector<32x512xf32>
    %69 = arith.addf %43, %68 : vector<32x512xf32>
    %c0_58 = arith.constant 0 : index
    %c0_59 = arith.constant 0 : index
    %c1_60 = arith.constant 1 : index
    %c0_61 = arith.constant 0 : index
    %70 = vector.load %arg1[%c0_58, %c0_59, %c1_60, %c0_61] : memref<4x4x10x32xf32, #tpu.memory_space<vmem>>, vector<4x1x8x32xf32>
    %71 = vector.shape_cast %70 : vector<4x1x8x32xf32> to vector<4x8x32xf32>
    %72 = arith.truncf %71 : vector<4x8x32xf32> to vector<4x8x32xbf16>
    %73 = vector.shape_cast %72 : vector<4x8x32xbf16> to vector<32x32xbf16>
    %cst_62 = arith.constant dense<0.000000e+00> : vector<32x512xf32>
    %74 = tpu.matmul %73, %57, %cst_62 {dimension_numbers = #tpu.dot_dimension_numbers<[1], [0], [0], [1], [0, 0, 1, 1], [], []>} : vector<32x32xbf16>, vector<32x512xbf16>, vector<32x512xf32> -> vector<32x512xf32>
    %75 = arith.addf %49, %74 : vector<32x512xf32>
    %c0_63 = arith.constant 0 : index
    %c1_64 = arith.constant 1 : index
    %c1_65 = arith.constant 1 : index
    %c0_66 = arith.constant 0 : index
    %76 = vector.load %arg1[%c0_63, %c1_64, %c1_65, %c0_66] : memref<4x4x10x32xf32, #tpu.memory_space<vmem>>, vector<4x1x8x32xf32>
    %77 = vector.shape_cast %76 : vector<4x1x8x32xf32> to vector<4x8x32xf32>
    %78 = arith.truncf %77 : vector<4x8x32xf32> to vector<4x8x32xbf16>
    %79 = vector.shape_cast %78 : vector<4x8x32xbf16> to vector<32x32xbf16>
    %cst_67 = arith.constant dense<0.000000e+00> : vector<32x512xf32>
    %80 = tpu.matmul %79, %57, %cst_67 {dimension_numbers = #tpu.dot_dimension_numbers<[1], [0], [0], [1], [0, 0, 1, 1], [], []>} : vector<32x32xbf16>, vector<32x512xbf16>, vector<32x512xf32> -> vector<32x512xf32>
    %81 = arith.addf %55, %80 : vector<32x512xf32>
    %c3_68 = arith.constant 3 : index
    %c0_69 = arith.constant 0 : index
    %c0_70 = arith.constant 0 : index
    %82 = vector.load %arg2[%c3_68, %c0_69, %c0_70] : memref<5x32x512xbf16, #tpu.memory_space<vmem>>, vector<1x32x512xbf16>
    %83 = vector.shape_cast %82 : vector<1x32x512xbf16> to vector<32x512xbf16>
    %c0_71 = arith.constant 0 : index
    %c3_72 = arith.constant 3 : index
    %c0_73 = arith.constant 0 : index
    %c0_74 = arith.constant 0 : index
    %84 = vector.load %arg1[%c0_71, %c3_72, %c0_73, %c0_74] : memref<4x4x10x32xf32, #tpu.memory_space<vmem>>, vector<4x1x8x32xf32>
    %85 = vector.shape_cast %84 : vector<4x1x8x32xf32> to vector<4x8x32xf32>
    %86 = arith.truncf %85 : vector<4x8x32xf32> to vector<4x8x32xbf16>
    %87 = vector.shape_cast %86 : vector<4x8x32xbf16> to vector<32x32xbf16>
    %cst_75 = arith.constant dense<0.000000e+00> : vector<32x512xf32>
    %88 = tpu.matmul %87, %83, %cst_75 {dimension_numbers = #tpu.dot_dimension_numbers<[1], [0], [0], [1], [0, 0, 1, 1], [], []>} : vector<32x32xbf16>, vector<32x512xbf16>, vector<32x512xf32> -> vector<32x512xf32>
    %89 = arith.addf %63, %88 : vector<32x512xf32>
    %c0_76 = arith.constant 0 : index
    %c0_77 = arith.constant 0 : index
    %c1_78 = arith.constant 1 : index
    %c0_79 = arith.constant 0 : index
    %90 = vector.load %arg1[%c0_76, %c0_77, %c1_78, %c0_79] : memref<4x4x10x32xf32, #tpu.memory_space<vmem>>, vector<4x1x8x32xf32>
    %91 = vector.shape_cast %90 : vector<4x1x8x32xf32> to vector<4x8x32xf32>
    %92 = arith.truncf %91 : vector<4x8x32xf32> to vector<4x8x32xbf16>
    %93 = vector.shape_cast %92 : vector<4x8x32xbf16> to vector<32x32xbf16>
    %cst_80 = arith.constant dense<0.000000e+00> : vector<32x512xf32>
    %94 = tpu.matmul %93, %83, %cst_80 {dimension_numbers = #tpu.dot_dimension_numbers<[1], [0], [0], [1], [0, 0, 1, 1], [], []>} : vector<32x32xbf16>, vector<32x512xbf16>, vector<32x512xf32> -> vector<32x512xf32>
    %95 = arith.addf %69, %94 : vector<32x512xf32>
    %c0_81 = arith.constant 0 : index
    %c1_82 = arith.constant 1 : index
    %c1_83 = arith.constant 1 : index
    %c0_84 = arith.constant 0 : index
    %96 = vector.load %arg1[%c0_81, %c1_82, %c1_83, %c0_84] : memref<4x4x10x32xf32, #tpu.memory_space<vmem>>, vector<4x1x8x32xf32>
    %97 = vector.shape_cast %96 : vector<4x1x8x32xf32> to vector<4x8x32xf32>
    %98 = arith.truncf %97 : vector<4x8x32xf32> to vector<4x8x32xbf16>
    %99 = vector.shape_cast %98 : vector<4x8x32xbf16> to vector<32x32xbf16>
    %cst_85 = arith.constant dense<0.000000e+00> : vector<32x512xf32>
    %100 = tpu.matmul %99, %83, %cst_85 {dimension_numbers = #tpu.dot_dimension_numbers<[1], [0], [0], [1], [0, 0, 1, 1], [], []>} : vector<32x32xbf16>, vector<32x512xbf16>, vector<32x512xf32> -> vector<32x512xf32>
    %101 = arith.addf %75, %100 : vector<32x512xf32>
    %c0_86 = arith.constant 0 : index
    %c2_87 = arith.constant 2 : index
    %c1_88 = arith.constant 1 : index
    %c0_89 = arith.constant 0 : index
    %102 = vector.load %arg1[%c0_86, %c2_87, %c1_88, %c0_89] : memref<4x4x10x32xf32, #tpu.memory_space<vmem>>, vector<4x1x8x32xf32>
    %103 = vector.shape_cast %102 : vector<4x1x8x32xf32> to vector<4x8x32xf32>
    %104 = arith.truncf %103 : vector<4x8x32xf32> to vector<4x8x32xbf16>
    %105 = vector.shape_cast %104 : vector<4x8x32xbf16> to vector<32x32xbf16>
    %cst_90 = arith.constant dense<0.000000e+00> : vector<32x512xf32>
    %106 = tpu.matmul %105, %83, %cst_90 {dimension_numbers = #tpu.dot_dimension_numbers<[1], [0], [0], [1], [0, 0, 1, 1], [], []>} : vector<32x32xbf16>, vector<32x512xbf16>, vector<32x512xf32> -> vector<32x512xf32>
    %107 = arith.addf %81, %106 : vector<32x512xf32>
    %c4 = arith.constant 4 : index
    %c0_91 = arith.constant 0 : index
    %c0_92 = arith.constant 0 : index
    %108 = vector.load %arg2[%c4, %c0_91, %c0_92] : memref<5x32x512xbf16, #tpu.memory_space<vmem>>, vector<1x32x512xbf16>
    %109 = vector.shape_cast %108 : vector<1x32x512xbf16> to vector<32x512xbf16>
    %c0_93 = arith.constant 0 : index
    %c0_94 = arith.constant 0 : index
    %c1_95 = arith.constant 1 : index
    %c0_96 = arith.constant 0 : index
    %110 = vector.load %arg1[%c0_93, %c0_94, %c1_95, %c0_96] : memref<4x4x10x32xf32, #tpu.memory_space<vmem>>, vector<4x1x8x32xf32>
    %111 = vector.shape_cast %110 : vector<4x1x8x32xf32> to vector<4x8x32xf32>
    %112 = arith.truncf %111 : vector<4x8x32xf32> to vector<4x8x32xbf16>
    %113 = vector.shape_cast %112 : vector<4x8x32xbf16> to vector<32x32xbf16>
    %cst_97 = arith.constant dense<0.000000e+00> : vector<32x512xf32>
    %114 = tpu.matmul %113, %109, %cst_97 {dimension_numbers = #tpu.dot_dimension_numbers<[1], [0], [0], [1], [0, 0, 1, 1], [], []>} : vector<32x32xbf16>, vector<32x512xbf16>, vector<32x512xf32> -> vector<32x512xf32>
    %115 = arith.addf %89, %114 : vector<32x512xf32>
    %c0_98 = arith.constant 0 : index
    %c1_99 = arith.constant 1 : index
    %c1_100 = arith.constant 1 : index
    %c0_101 = arith.constant 0 : index
    %116 = vector.load %arg1[%c0_98, %c1_99, %c1_100, %c0_101] : memref<4x4x10x32xf32, #tpu.memory_space<vmem>>, vector<4x1x8x32xf32>
    %117 = vector.shape_cast %116 : vector<4x1x8x32xf32> to vector<4x8x32xf32>
    %118 = arith.truncf %117 : vector<4x8x32xf32> to vector<4x8x32xbf16>
    %119 = vector.shape_cast %118 : vector<4x8x32xbf16> to vector<32x32xbf16>
    %cst_102 = arith.constant dense<0.000000e+00> : vector<32x512xf32>
    %120 = tpu.matmul %119, %109, %cst_102 {dimension_numbers = #tpu.dot_dimension_numbers<[1], [0], [0], [1], [0, 0, 1, 1], [], []>} : vector<32x32xbf16>, vector<32x512xbf16>, vector<32x512xf32> -> vector<32x512xf32>
    %121 = arith.addf %95, %120 : vector<32x512xf32>
    %c0_103 = arith.constant 0 : index
    %c2_104 = arith.constant 2 : index
    %c1_105 = arith.constant 1 : index
    %c0_106 = arith.constant 0 : index
    %122 = vector.load %arg1[%c0_103, %c2_104, %c1_105, %c0_106] : memref<4x4x10x32xf32, #tpu.memory_space<vmem>>, vector<4x1x8x32xf32>
    %123 = vector.shape_cast %122 : vector<4x1x8x32xf32> to vector<4x8x32xf32>
    %124 = arith.truncf %123 : vector<4x8x32xf32> to vector<4x8x32xbf16>
    %125 = vector.shape_cast %124 : vector<4x8x32xbf16> to vector<32x32xbf16>
    %cst_107 = arith.constant dense<0.000000e+00> : vector<32x512xf32>
    %126 = tpu.matmul %125, %109, %cst_107 {dimension_numbers = #tpu.dot_dimension_numbers<[1], [0], [0], [1], [0, 0, 1, 1], [], []>} : vector<32x32xbf16>, vector<32x512xbf16>, vector<32x512xf32> -> vector<32x512xf32>
    %127 = arith.addf %101, %126 : vector<32x512xf32>
    %c0_108 = arith.constant 0 : index
    %c3_109 = arith.constant 3 : index
    %c1_110 = arith.constant 1 : index
    %c0_111 = arith.constant 0 : index
    %128 = vector.load %arg1[%c0_108, %c3_109, %c1_110, %c0_111] : memref<4x4x10x32xf32, #tpu.memory_space<vmem>>, vector<4x1x8x32xf32>
    %129 = vector.shape_cast %128 : vector<4x1x8x32xf32> to vector<4x8x32xf32>
    %130 = arith.truncf %129 : vector<4x8x32xf32> to vector<4x8x32xbf16>
    %131 = vector.shape_cast %130 : vector<4x8x32xbf16> to vector<32x32xbf16>
    %cst_112 = arith.constant dense<0.000000e+00> : vector<32x512xf32>
    %132 = tpu.matmul %131, %109, %cst_112 {dimension_numbers = #tpu.dot_dimension_numbers<[1], [0], [0], [1], [0, 0, 1, 1], [], []>} : vector<32x32xbf16>, vector<32x512xbf16>, vector<32x512xf32> -> vector<32x512xf32>
    %133 = arith.addf %107, %132 : vector<32x512xf32>
    %c0_113 = arith.constant 0 : index
    %c0_114 = arith.constant 0 : index
    %134 = vector.load %arg3[%c0_113, %c0_114] : memref<1x512xf32, #tpu.memory_space<vmem>>, vector<1x512xf32>
    %135 = vector.broadcast %134 : vector<1x512xf32> to vector<32x512xf32>
    %136 = arith.addf %115, %135 : vector<32x512xf32>
    %cst_115 = arith.constant 0.000000e+00 : f32
    %137 = vector.broadcast %cst_115 : f32 to vector<32x512xf32>
    %138 = arith.maximumf %136, %137 : vector<32x512xf32>
    %139 = vector.broadcast %134 : vector<1x512xf32> to vector<32x512xf32>
    %140 = arith.addf %121, %139 : vector<32x512xf32>
    %cst_116 = arith.constant 0.000000e+00 : f32
    %141 = vector.broadcast %cst_116 : f32 to vector<32x512xf32>
    %142 = arith.maximumf %140, %141 : vector<32x512xf32>
    %143 = vector.broadcast %134 : vector<1x512xf32> to vector<32x512xf32>
    %144 = arith.addf %127, %143 : vector<32x512xf32>
    %cst_117 = arith.constant 0.000000e+00 : f32
    %145 = vector.broadcast %cst_117 : f32 to vector<32x512xf32>
    %146 = arith.maximumf %144, %145 : vector<32x512xf32>
    %147 = vector.broadcast %134 : vector<1x512xf32> to vector<32x512xf32>
    %148 = arith.addf %133, %147 : vector<32x512xf32>
    %cst_118 = arith.constant 0.000000e+00 : f32
    %149 = vector.broadcast %cst_118 : f32 to vector<32x512xf32>
    %150 = arith.maximumf %148, %149 : vector<32x512xf32>
    %151 = arith.maximumf %138, %142 : vector<32x512xf32>
    %152 = arith.maximumf %146, %150 : vector<32x512xf32>
    %153 = vector.extract_strided_slice %151 {offsets = [0, 0], sizes = [32, 256], strides = [1, 1]} : vector<32x512xf32> to vector<32x256xf32>
    %154 = vector.extract_strided_slice %151 {offsets = [0, 256], sizes = [32, 256], strides = [1, 1]} : vector<32x512xf32> to vector<32x256xf32>
    %155 = arith.maximumf %153, %154 : vector<32x256xf32>
    %156 = vector.shape_cast %155 : vector<32x256xf32> to vector<4x8x256xf32>
    %157 = vector.extract_strided_slice %152 {offsets = [0, 0], sizes = [32, 256], strides = [1, 1]} : vector<32x512xf32> to vector<32x256xf32>
    %158 = vector.extract_strided_slice %152 {offsets = [0, 256], sizes = [32, 256], strides = [1, 1]} : vector<32x512xf32> to vector<32x256xf32>
    %159 = arith.maximumf %157, %158 : vector<32x256xf32>
    %160 = vector.shape_cast %159 : vector<32x256xf32> to vector<4x8x256xf32>
    %cst_119 = arith.constant 0.000000e+00 : f32
    %161 = vector.broadcast %cst_119 : f32 to vector<4x1x256xf32>
    %cst_120 = arith.constant 0.000000e+00 : f32
    %162 = vector.broadcast %cst_120 : f32 to vector<4x2x256xf32>
    %c0_121 = arith.constant 0 : index
    %c0_122 = arith.constant 0 : index
    %c0_123 = arith.constant 0 : index
    %c0_124 = arith.constant 0 : index
    %163 = vector.load %arg9[%c0_121, %c0_122, %c0_123, %c0_124] : memref<4x2x10x256xf32, #tpu.memory_space<vmem>>, vector<4x1x1x256xf32>
    %164 = vector.shape_cast %163 : vector<4x1x1x256xf32> to vector<4x1x256xf32>
    %165 = vector.shape_cast %161 : vector<4x1x256xf32> to vector<4x1x1x256xf32>
    tpu.vector_store %arg9[%c0_121, %c0_122, %c0_123, %c0_124], %165 {strides = array<i32>} : memref<4x2x10x256xf32, #tpu.memory_space<vmem>>, vector<4x1x1x256xf32>,
    %166 = vector.extract_strided_slice %156 {offsets = [0, 0, 0], sizes = [4, 7, 256], strides = [1, 1, 1]} : vector<4x8x256xf32> to vector<4x7x256xf32>
    %c0_125 = arith.constant 0 : index
    %c0_126 = arith.constant 0 : index
    %c1_127 = arith.constant 1 : index
    %c0_128 = arith.constant 0 : index
    %167 = vector.load %arg9[%c0_125, %c0_126, %c1_127, %c0_128] : memref<4x2x10x256xf32, #tpu.memory_space<vmem>>, vector<4x1x7x256xf32>
    %168 = vector.shape_cast %167 : vector<4x1x7x256xf32> to vector<4x7x256xf32>
    %169 = vector.shape_cast %166 : vector<4x7x256xf32> to vector<4x1x7x256xf32>
    tpu.vector_store %arg9[%c0_125, %c0_126, %c1_127, %c0_128], %169 {strides = array<i32>} : memref<4x2x10x256xf32, #tpu.memory_space<vmem>>, vector<4x1x7x256xf32>,
    %c0_129 = arith.constant 0 : index
    %c0_130 = arith.constant 0 : index
    %c8 = arith.constant 8 : index
    %c0_131 = arith.constant 0 : index
    %170 = vector.load %arg9[%c0_129, %c0_130, %c8, %c0_131] : memref<4x2x10x256xf32, #tpu.memory_space<vmem>>, vector<4x1x2x256xf32>
    %171 = vector.shape_cast %170 : vector<4x1x2x256xf32> to vector<4x2x256xf32>
    %172 = vector.shape_cast %162 : vector<4x2x256xf32> to vector<4x1x2x256xf32>
    tpu.vector_store %arg9[%c0_129, %c0_130, %c8, %c0_131], %172 {strides = array<i32>} : memref<4x2x10x256xf32, #tpu.memory_space<vmem>>, vector<4x1x2x256xf32>,
    %c0_132 = arith.constant 0 : index
    %c1_133 = arith.constant 1 : index
    %c0_134 = arith.constant 0 : index
    %c0_135 = arith.constant 0 : index
    %173 = vector.load %arg9[%c0_132, %c1_133, %c0_134, %c0_135] : memref<4x2x10x256xf32, #tpu.memory_space<vmem>>, vector<4x1x1x256xf32>
    %174 = vector.shape_cast %173 : vector<4x1x1x256xf32> to vector<4x1x256xf32>
    %175 = vector.shape_cast %161 : vector<4x1x256xf32> to vector<4x1x1x256xf32>
    tpu.vector_store %arg9[%c0_132, %c1_133, %c0_134, %c0_135], %175 {strides = array<i32>} : memref<4x2x10x256xf32, #tpu.memory_space<vmem>>, vector<4x1x1x256xf32>,
    %176 = vector.extract_strided_slice %160 {offsets = [0, 0, 0], sizes = [4, 7, 256], strides = [1, 1, 1]} : vector<4x8x256xf32> to vector<4x7x256xf32>
    %c0_136 = arith.constant 0 : index
    %c1_137 = arith.constant 1 : index
    %c1_138 = arith.constant 1 : index
    %c0_139 = arith.constant 0 : index
    %177 = vector.load %arg9[%c0_136, %c1_137, %c1_138, %c0_139] : memref<4x2x10x256xf32, #tpu.memory_space<vmem>>, vector<4x1x7x256xf32>
    %178 = vector.shape_cast %177 : vector<4x1x7x256xf32> to vector<4x7x256xf32>
    %179 = vector.shape_cast %176 : vector<4x7x256xf32> to vector<4x1x7x256xf32>
    tpu.vector_store %arg9[%c0_136, %c1_137, %c1_138, %c0_139], %179 {strides = array<i32>} : memref<4x2x10x256xf32, #tpu.memory_space<vmem>>, vector<4x1x7x256xf32>,
    %c0_140 = arith.constant 0 : index
    %c1_141 = arith.constant 1 : index
    %c8_142 = arith.constant 8 : index
    %c0_143 = arith.constant 0 : index
    %180 = vector.load %arg9[%c0_140, %c1_141, %c8_142, %c0_143] : memref<4x2x10x256xf32, #tpu.memory_space<vmem>>, vector<4x1x2x256xf32>
    %181 = vector.shape_cast %180 : vector<4x1x2x256xf32> to vector<4x2x256xf32>
    %182 = vector.shape_cast %162 : vector<4x2x256xf32> to vector<4x1x2x256xf32>
    tpu.vector_store %arg9[%c0_140, %c1_141, %c8_142, %c0_143], %182 {strides = array<i32>} : memref<4x2x10x256xf32, #tpu.memory_space<vmem>>, vector<4x1x2x256xf32>,
    %cst_144 = arith.constant 0.000000e+00 : f32
    %183 = vector.broadcast %cst_144 : f32 to vector<32x512xf32>
    %cst_145 = arith.constant 0.000000e+00 : f32
    %184 = vector.broadcast %cst_145 : f32 to vector<32x512xf32>
    %c0_146 = arith.constant 0 : index
    %c0_147 = arith.constant 0 : index
    %c0_148 = arith.constant 0 : index
    %185 = vector.load %arg4[%c0_146, %c0_147, %c0_148] : memref<5x256x512xbf16, #tpu.memory_space<vmem>>, vector<1x256x512xbf16>
    %186 = vector.shape_cast %185 : vector<1x256x512xbf16> to vector<256x512xbf16>
    %c0_149 = arith.constant 0 : index
    %c0_150 = arith.constant 0 : index
    %c0_151 = arith.constant 0 : index
    %c0_152 = arith.constant 0 : index
    %187 = vector.load %arg9[%c0_149, %c0_150, %c0_151, %c0_152] : memref<4x2x10x256xf32, #tpu.memory_space<vmem>>, vector<4x1x8x256xf32>
    %188 = vector.shape_cast %187 : vector<4x1x8x256xf32> to vector<4x8x256xf32>
    %c0_153 = arith.constant 0 : index
    %c1_154 = arith.constant 1 : index
    %c0_155 = arith.constant 0 : index
    %c0_156 = arith.constant 0 : index
    %189 = vector.load %arg9[%c0_153, %c1_154, %c0_155, %c0_156] : memref<4x2x10x256xf32, #tpu.memory_space<vmem>>, vector<4x1x8x256xf32>
    %190 = vector.shape_cast %189 : vector<4x1x8x256xf32> to vector<4x8x256xf32>
    %191 = arith.truncf %188 : vector<4x8x256xf32> to vector<4x8x256xbf16>
    %192 = vector.shape_cast %191 : vector<4x8x256xbf16> to vector<32x256xbf16>
    %193 = arith.truncf %190 : vector<4x8x256xf32> to vector<4x8x256xbf16>
    %194 = vector.shape_cast %193 : vector<4x8x256xbf16> to vector<32x256xbf16>
    %cst_157 = arith.constant dense<0.000000e+00> : vector<32x512xf32>
    %195 = tpu.matmul %192, %186, %cst_157 {dimension_numbers = #tpu.dot_dimension_numbers<[1], [0], [0], [1], [0, 0, 1, 1], [], []>} : vector<32x256xbf16>, vector<256x512xbf16>, vector<32x512xf32> -> vector<32x512xf32>
    %196 = arith.addf %183, %195 : vector<32x512xf32>
    %cst_158 = arith.constant dense<0.000000e+00> : vector<32x512xf32>
    %197 = tpu.matmul %194, %186, %cst_158 {dimension_numbers = #tpu.dot_dimension_numbers<[1], [0], [0], [1], [0, 0, 1, 1], [], []>} : vector<32x256xbf16>, vector<256x512xbf16>, vector<32x512xf32> -> vector<32x512xf32>
    %198 = arith.addf %184, %197 : vector<32x512xf32>
    %c1_159 = arith.constant 1 : index
    %c0_160 = arith.constant 0 : index
    %c0_161 = arith.constant 0 : index
    %199 = vector.load %arg4[%c1_159, %c0_160, %c0_161] : memref<5x256x512xbf16, #tpu.memory_space<vmem>>, vector<1x256x512xbf16>
    %200 = vector.shape_cast %199 : vector<1x256x512xbf16> to vector<256x512xbf16>
    %c0_162 = arith.constant 0 : index
    %c1_163 = arith.constant 1 : index
    %c0_164 = arith.constant 0 : index
    %c0_165 = arith.constant 0 : index
    %201 = vector.load %arg9[%c0_162, %c1_163, %c0_164, %c0_165] : memref<4x2x10x256xf32, #tpu.memory_space<vmem>>, vector<4x1x8x256xf32>
    %202 = vector.shape_cast %201 : vector<4x1x8x256xf32> to vector<4x8x256xf32>
    %c0_166 = arith.constant 0 : index
    %c0_167 = arith.constant 0 : index
    %c1_168 = arith.constant 1 : index
    %c0_169 = arith.constant 0 : index
    %203 = vector.load %arg9[%c0_166, %c0_167, %c1_168, %c0_169] : memref<4x2x10x256xf32, #tpu.memory_space<vmem>>, vector<4x1x8x256xf32>
    %204 = vector.shape_cast %203 : vector<4x1x8x256xf32> to vector<4x8x256xf32>
    %205 = arith.truncf %202 : vector<4x8x256xf32> to vector<4x8x256xbf16>
    %206 = vector.shape_cast %205 : vector<4x8x256xbf16> to vector<32x256xbf16>
    %207 = arith.truncf %204 : vector<4x8x256xf32> to vector<4x8x256xbf16>
    %208 = vector.shape_cast %207 : vector<4x8x256xbf16> to vector<32x256xbf16>
    %cst_170 = arith.constant dense<0.000000e+00> : vector<32x512xf32>
    %209 = tpu.matmul %206, %200, %cst_170 {dimension_numbers = #tpu.dot_dimension_numbers<[1], [0], [0], [1], [0, 0, 1, 1], [], []>} : vector<32x256xbf16>, vector<256x512xbf16>, vector<32x512xf32> -> vector<32x512xf32>
    %210 = arith.addf %196, %209 : vector<32x512xf32>
    %cst_171 = arith.constant dense<0.000000e+00> : vector<32x512xf32>
    %211 = tpu.matmul %208, %200, %cst_171 {dimension_numbers = #tpu.dot_dimension_numbers<[1], [0], [0], [1], [0, 0, 1, 1], [], []>} : vector<32x256xbf16>, vector<256x512xbf16>, vector<32x512xf32> -> vector<32x512xf32>
    %212 = arith.addf %198, %211 : vector<32x512xf32>
    %c2_172 = arith.constant 2 : index
    %c0_173 = arith.constant 0 : index
    %c0_174 = arith.constant 0 : index
    %213 = vector.load %arg4[%c2_172, %c0_173, %c0_174] : memref<5x256x512xbf16, #tpu.memory_space<vmem>>, vector<1x256x512xbf16>
    %214 = vector.shape_cast %213 : vector<1x256x512xbf16> to vector<256x512xbf16>
    %c0_175 = arith.constant 0 : index
    %c0_176 = arith.constant 0 : index
    %c1_177 = arith.constant 1 : index
    %c0_178 = arith.constant 0 : index
    %215 = vector.load %arg9[%c0_175, %c0_176, %c1_177, %c0_178] : memref<4x2x10x256xf32, #tpu.memory_space<vmem>>, vector<4x1x8x256xf32>
    %216 = vector.shape_cast %215 : vector<4x1x8x256xf32> to vector<4x8x256xf32>
    %c0_179 = arith.constant 0 : index
    %c1_180 = arith.constant 1 : index
    %c1_181 = arith.constant 1 : index
    %c0_182 = arith.constant 0 : index
    %217 = vector.load %arg9[%c0_179, %c1_180, %c1_181, %c0_182] : memref<4x2x10x256xf32, #tpu.memory_space<vmem>>, vector<4x1x8x256xf32>
    %218 = vector.shape_cast %217 : vector<4x1x8x256xf32> to vector<4x8x256xf32>
    %219 = arith.truncf %216 : vector<4x8x256xf32> to vector<4x8x256xbf16>
    %220 = vector.shape_cast %219 : vector<4x8x256xbf16> to vector<32x256xbf16>
    %221 = arith.truncf %218 : vector<4x8x256xf32> to vector<4x8x256xbf16>
    %222 = vector.shape_cast %221 : vector<4x8x256xbf16> to vector<32x256xbf16>
    %cst_183 = arith.constant dense<0.000000e+00> : vector<32x512xf32>
    %223 = tpu.matmul %220, %214, %cst_183 {dimension_numbers = #tpu.dot_dimension_numbers<[1], [0], [0], [1], [0, 0, 1, 1], [], []>} : vector<32x256xbf16>, vector<256x512xbf16>, vector<32x512xf32> -> vector<32x512xf32>
    %224 = arith.addf %210, %223 : vector<32x512xf32>
    %cst_184 = arith.constant dense<0.000000e+00> : vector<32x512xf32>
    %225 = tpu.matmul %222, %214, %cst_184 {dimension_numbers = #tpu.dot_dimension_numbers<[1], [0], [0], [1], [0, 0, 1, 1], [], []>} : vector<32x256xbf16>, vector<256x512xbf16>, vector<32x512xf32> -> vector<32x512xf32>
    %226 = arith.addf %212, %225 : vector<32x512xf32>
    %c3_185 = arith.constant 3 : index
    %c0_186 = arith.constant 0 : index
    %c0_187 = arith.constant 0 : index
    %227 = vector.load %arg4[%c3_185, %c0_186, %c0_187] : memref<5x256x512xbf16, #tpu.memory_space<vmem>>, vector<1x256x512xbf16>
    %228 = vector.shape_cast %227 : vector<1x256x512xbf16> to vector<256x512xbf16>
    %c0_188 = arith.constant 0 : index
    %c1_189 = arith.constant 1 : index
    %c1_190 = arith.constant 1 : index
    %c0_191 = arith.constant 0 : index
    %229 = vector.load %arg9[%c0_188, %c1_189, %c1_190, %c0_191] : memref<4x2x10x256xf32, #tpu.memory_space<vmem>>, vector<4x1x8x256xf32>
    %230 = vector.shape_cast %229 : vector<4x1x8x256xf32> to vector<4x8x256xf32>
    %c0_192 = arith.constant 0 : index
    %c0_193 = arith.constant 0 : index
    %c2_194 = arith.constant 2 : index
    %c0_195 = arith.constant 0 : index
    %231 = vector.load %arg9[%c0_192, %c0_193, %c2_194, %c0_195] : memref<4x2x10x256xf32, #tpu.memory_space<vmem>>, vector<4x1x8x256xf32>
    %232 = vector.shape_cast %231 : vector<4x1x8x256xf32> to vector<4x8x256xf32>
    %233 = arith.truncf %230 : vector<4x8x256xf32> to vector<4x8x256xbf16>
    %234 = vector.shape_cast %233 : vector<4x8x256xbf16> to vector<32x256xbf16>
    %235 = arith.truncf %232 : vector<4x8x256xf32> to vector<4x8x256xbf16>
    %236 = vector.shape_cast %235 : vector<4x8x256xbf16> to vector<32x256xbf16>
    %cst_196 = arith.constant dense<0.000000e+00> : vector<32x512xf32>
    %237 = tpu.matmul %234, %228, %cst_196 {dimension_numbers = #tpu.dot_dimension_numbers<[1], [0], [0], [1], [0, 0, 1, 1], [], []>} : vector<32x256xbf16>, vector<256x512xbf16>, vector<32x512xf32> -> vector<32x512xf32>
    %238 = arith.addf %224, %237 : vector<32x512xf32>
    %cst_197 = arith.constant dense<0.000000e+00> : vector<32x512xf32>
    %239 = tpu.matmul %236, %228, %cst_197 {dimension_numbers = #tpu.dot_dimension_numbers<[1], [0], [0], [1], [0, 0, 1, 1], [], []>} : vector<32x256xbf16>, vector<256x512xbf16>, vector<32x512xf32> -> vector<32x512xf32>
    %240 = arith.addf %226, %239 : vector<32x512xf32>
    %c4_198 = arith.constant 4 : index
    %c0_199 = arith.constant 0 : index
    %c0_200 = arith.constant 0 : index
    %241 = vector.load %arg4[%c4_198, %c0_199, %c0_200] : memref<5x256x512xbf16, #tpu.memory_space<vmem>>, vector<1x256x512xbf16>
    %242 = vector.shape_cast %241 : vector<1x256x512xbf16> to vector<256x512xbf16>
    %c0_201 = arith.constant 0 : index
    %c0_202 = arith.constant 0 : index
    %c2_203 = arith.constant 2 : index
    %c0_204 = arith.constant 0 : index
    %243 = vector.load %arg9[%c0_201, %c0_202, %c2_203, %c0_204] : memref<4x2x10x256xf32, #tpu.memory_space<vmem>>, vector<4x1x8x256xf32>
    %244 = vector.shape_cast %243 : vector<4x1x8x256xf32> to vector<4x8x256xf32>
    %c0_205 = arith.constant 0 : index
    %c1_206 = arith.constant 1 : index
    %c2_207 = arith.constant 2 : index
    %c0_208 = arith.constant 0 : index
    %245 = vector.load %arg9[%c0_205, %c1_206, %c2_207, %c0_208] : memref<4x2x10x256xf32, #tpu.memory_space<vmem>>, vector<4x1x8x256xf32>
    %246 = vector.shape_cast %245 : vector<4x1x8x256xf32> to vector<4x8x256xf32>
    %247 = arith.truncf %244 : vector<4x8x256xf32> to vector<4x8x256xbf16>
    %248 = vector.shape_cast %247 : vector<4x8x256xbf16> to vector<32x256xbf16>
    %249 = arith.truncf %246 : vector<4x8x256xf32> to vector<4x8x256xbf16>
    %250 = vector.shape_cast %249 : vector<4x8x256xbf16> to vector<32x256xbf16>
    %cst_209 = arith.constant dense<0.000000e+00> : vector<32x512xf32>
    %251 = tpu.matmul %248, %242, %cst_209 {dimension_numbers = #tpu.dot_dimension_numbers<[1], [0], [0], [1], [0, 0, 1, 1], [], []>} : vector<32x256xbf16>, vector<256x512xbf16>, vector<32x512xf32> -> vector<32x512xf32>
    %252 = arith.addf %238, %251 : vector<32x512xf32>
    %cst_210 = arith.constant dense<0.000000e+00> : vector<32x512xf32>
    %253 = tpu.matmul %250, %242, %cst_210 {dimension_numbers = #tpu.dot_dimension_numbers<[1], [0], [0], [1], [0, 0, 1, 1], [], []>} : vector<32x256xbf16>, vector<256x512xbf16>, vector<32x512xf32> -> vector<32x512xf32>
    %254 = arith.addf %240, %253 : vector<32x512xf32>
    %c0_211 = arith.constant 0 : index
    %c0_212 = arith.constant 0 : index
    %255 = vector.load %arg5[%c0_211, %c0_212] : memref<1x512xf32, #tpu.memory_space<vmem>>, vector<1x512xf32>
    %256 = vector.broadcast %255 : vector<1x512xf32> to vector<32x512xf32>
    %257 = arith.addf %252, %256 : vector<32x512xf32>
    %cst_213 = arith.constant 0.000000e+00 : f32
    %258 = vector.broadcast %cst_213 : f32 to vector<32x512xf32>
    %259 = arith.maximumf %257, %258 : vector<32x512xf32>
    %260 = vector.broadcast %255 : vector<1x512xf32> to vector<32x512xf32>
    %261 = arith.addf %254, %260 : vector<32x512xf32>
    %cst_214 = arith.constant 0.000000e+00 : f32
    %262 = vector.broadcast %cst_214 : f32 to vector<32x512xf32>
    %263 = arith.maximumf %261, %262 : vector<32x512xf32>
    %264 = arith.maximumf %259, %263 : vector<32x512xf32>
    %265 = vector.extract_strided_slice %264 {offsets = [0, 0], sizes = [32, 256], strides = [1, 1]} : vector<32x512xf32> to vector<32x256xf32>
    %266 = vector.extract_strided_slice %264 {offsets = [0, 256], sizes = [32, 256], strides = [1, 1]} : vector<32x512xf32> to vector<32x256xf32>
    %267 = arith.maximumf %265, %266 : vector<32x256xf32>
    %268 = vector.shape_cast %267 : vector<32x256xf32> to vector<4x2048xf32>
    %269 = arith.truncf %268 : vector<4x2048xf32> to vector<4x2048xbf16>
    %c0_215 = arith.constant 0 : index
    %c0_216 = arith.constant 0 : index
    %270 = vector.load %arg6[%c0_215, %c0_216] : memref<2048x128xbf16, #tpu.memory_space<vmem>>, vector<2048x128xbf16>
    %cst_217 = arith.constant dense<0.000000e+00> : vector<4x128xf32>
    %271 = tpu.matmul %269, %270, %cst_217 {dimension_numbers = #tpu.dot_dimension_numbers<[1], [0], [0], [1], [0, 0, 1, 1], [], []>} : vector<4x2048xbf16>, vector<2048x128xbf16>, vector<4x128xf32> -> vector<4x128xf32>
    %c0_218 = arith.constant 0 : index
    %c0_219 = arith.constant 0 : index
    %272 = vector.load %arg7[%c0_218, %c0_219] : memref<1x128xf32, #tpu.memory_space<vmem>>, vector<1x128xf32>
    %273 = vector.broadcast %272 : vector<1x128xf32> to vector<4x128xf32>
    %274 = arith.addf %271, %273 : vector<4x128xf32>
    %c0_220 = arith.constant 0 : index
    %c0_221 = arith.constant 0 : index
    %c0_222 = arith.constant 0 : index
    %275 = vector.load %arg8[%c0_220, %c0_221, %c0_222] : memref<1x4x128xf32, #tpu.memory_space<vmem>>, vector<1x4x128xf32>
    %276 = vector.shape_cast %275 : vector<1x4x128xf32> to vector<4x128xf32>
    %277 = vector.shape_cast %274 : vector<4x128xf32> to vector<1x4x128xf32>
    tpu.vector_store %arg8[%c0_220, %c0_221, %c0_222], %277 {strides = array<i32>} : memref<1x4x128xf32, #tpu.memory_space<vmem>>, vector<1x4x128xf32>,
    return
  }
  func.func @transform_0(%arg0: i32) -> (i32, i32, i32, i32) {
    %c0_i32 = arith.constant 0 : i32
    %c0_i32_0 = arith.constant 0 : i32
    %c0_i32_1 = arith.constant 0 : i32
    %c0_i32_2 = arith.constant 0 : i32
    return %arg0, %c0_i32, %c0_i32_0, %c0_i32_1 : i32, i32, i32, i32
  }
  func.func @transform_1(%arg0: i32) -> (i32, i32, i32) {
    %c0_i32 = arith.constant 0 : i32
    %c0_i32_0 = arith.constant 0 : i32
    %c0_i32_1 = arith.constant 0 : i32
    %c0_i32_2 = arith.constant 0 : i32
    return %c0_i32, %c0_i32_0, %c0_i32_1 : i32, i32, i32
  }
  func.func @transform_2(%arg0: i32) -> (i32, i32) {
    %c0_i32 = arith.constant 0 : i32
    %c0_i32_0 = arith.constant 0 : i32
    %c0_i32_1 = arith.constant 0 : i32
    return %c0_i32, %c0_i32_0 : i32, i32
  }
  func.func @transform_3(%arg0: i32) -> (i32, i32, i32) {
    %c0_i32 = arith.constant 0 : i32
    %c0_i32_0 = arith.constant 0 : i32
    %c0_i32_1 = arith.constant 0 : i32
    %c0_i32_2 = arith.constant 0 : i32
    return %c0_i32, %c0_i32_0, %c0_i32_1 : i32, i32, i32
  }
  func.func @transform_4(%arg0: i32) -> (i32, i32) {
    %c0_i32 = arith.constant 0 : i32
    %c0_i32_0 = arith.constant 0 : i32
    %c0_i32_1 = arith.constant 0 : i32
    return %c0_i32, %c0_i32_0 : i32, i32
  }
  func.func @transform_5(%arg0: i32) -> (i32, i32) {
    %c0_i32 = arith.constant 0 : i32
    %c0_i32_0 = arith.constant 0 : i32
    %c0_i32_1 = arith.constant 0 : i32
    return %c0_i32, %c0_i32_0 : i32, i32
  }
  func.func @transform_6(%arg0: i32) -> (i32, i32) {
    %c0_i32 = arith.constant 0 : i32
    %c0_i32_0 = arith.constant 0 : i32
    %c0_i32_1 = arith.constant 0 : i32
    return %c0_i32, %c0_i32_0 : i32, i32
  }
  func.func @transform_7(%arg0: i32) -> (i32, i32, i32) {
    %c0_i32 = arith.constant 0 : i32
    %c0_i32_0 = arith.constant 0 : i32
    %c0_i32_1 = arith.constant 0 : i32
    return %arg0, %c0_i32, %c0_i32_0 : i32, i32, i32
  }
}

</mosaic_0001>

<bundles_post_ra>
// kernel: _lambda_.1
= control target key start
LH: loop header
LB: loop body
LE: loop exit
PB: predicated region body
PF: predicated region fallthrough
CT: control target
= control target key end

     0   :  { %s13509_s0 = inlined_call_operand.vmem [shape: f32[8,4,10,32], index: 0, kind: input, shape index: {}]   ;;  %s13510_s1 = inlined_call_operand.hbm [shape: bf16[5,32,512], index: 1, kind: input, shape index: {}]   ;;  %s13511_s2 = inlined_call_operand.hbm [shape: f32[1,512], index: 2, kind: input, shape index: {}]   ;;  %s13512_s3 = inlined_call_operand.hbm [shape: bf16[5,256,512], index: 3, kind: input, shape index: {}]   ;;  %s13513_s4 = inlined_call_operand.hbm [shape: f32[1,512], index: 4, kind: input, shape index: {}]   ;;  %s13514_s5 = inlined_call_operand.hbm [shape: bf16[2048,128], index: 5, kind: input, shape index: {}]   ;;  %s13515_s6 = inlined_call_operand.hbm [shape: f32[1,128], index: 6, kind: input, shape index: {}]   ;;  %s13516_s7 = inlined_call_operand.hbm [shape: f32[2,4,128], index: 7, kind: output, shape index: {}]  }
   0x1   :  { %13616 = sst [smem:[#allocation52_spill]] %s13511_s2 }
   0x2   :  { %13617 = sst [smem:[#allocation53_spill]] %s13513_s4 }
   0x3   :  { %12 = vsyncpa [#allocation4], 0 }
   0x4   :  { %13 = vsyncpa [#allocation7], 0 }
   0x5   :  { %14 = vsyncpa [#allocation10], 0 }
   0x6   :  { %15 = vsyncpa [#allocation13], 0 }
   0x7   :  { %16 = vsyncpa [#allocation5], 0 }
   0x8   :  { %18 = vsyncpa [#allocation5 + $0x1], 0  ;;  %s11333_s24 = smov 0   ;;  %s11335_s25 = smov 0  }
   0x9   :  { %s11337_s26 = smov 0   ;;  %s11339_s27 = smov 0  }
   0xa LB: > { %13618 = sst [smem:[#allocation20_spill]] %s11272_s26  ;;  %s11354_s28 = sadd.s32 4294967295, %s11276_s27   ;;  %s11276_s27 = sphi %s11339_s27, %s13817_s27   ;;  %s11272_s26 = sphi %s11337_s26, %s13819_s26   ;;  %s11268_s25 = sphi %s11335_s25, %s13821_s25   ;;  %s11264_s24 = sphi %s11333_s24, %s13820_s24  }
   0xb   : > { %s8874_s29 = sadd.s32 4294967294, %s11276_s27   ;;  %s11358_s30 = sadd.s32 1, %s11276_s27  }
   0xc   : > { %13619 = sst [smem:[#allocation21_spill]] %s11358_s30  ;;  %s183_s8 = sadd.s32 1, %s11272_s26 }
   0xd   : > { %s180_s9 = ssub.s32 %s11276_s27, %s11358_s30  ;;  %p193_p0 = scmp.ne.s32.totalorder %s11272_s26, %s11268_s25 }
   0xe   : > { %p181_p1 = scmp.eq.s32.totalorder %s180_s9, 0  ;;  %p194_p2 = scmp.eq.s32.totalorder %s11354_s28, 1 }
   0xf   : > { %p199_p3 = scmp.ne.s32.totalorder %s11268_s25, %s11264_s24  ;;  %p200_p4 = scmp.eq.s32.totalorder %s8874_s29, 1 }
  0x10   : > { %s11369_s10 = scalar_select %p181_p1, %s11272_s26, %s183_s8  }
  0x11   : > { %p11371_p5 = por %p194_p2, %p193_p0  ;;  %p11375_p6 = por %p200_p4, %p199_p3 }
  0x12   : > { %13620 = sst [smem:[#allocation22_spill]] %s11369_s10  ;;  %p8875_p7 = scmp.ge.s32.totalorder %s11276_s27, 1 }
  0x13   : > { %s13621_s11 = scalar_select %p11371_p5, 1, 0 }
  0x14   : > { %s13622_s12 = scalar_select %p11375_p6, 1, 0 }
  0x15   : > { %p207_p8 = scmp.lt.s32.totalorder %s11276_s27, 3  ;;  %p13517_p9 = scmp.eq.s32.totalorder %s11354_s28, 0 }
  0x16   : > { %s11278_s14 = smov [#allocation6]   ;;  %s11279_s16 = smov [#allocation9]  }
  0x17   : > { %p11382_p10 = pnand %p8875_p7, %p207_p8  ;;  %s233_s15 = sshll.u32 %s11278_s14, 4  ;;  %s234_s15 = int_to_ptr.vmem [resolvable:$true] %s233_s15 }
  0x18   : > { %s257_s17 = sshll.u32 %s11279_s16, 4  ;;  %s11280_s19 = smov [#allocation3]   ;;  %s11394_s17 = int_to_ptr.vmem [resolvable:$true] %s257_s17 }
  0x19   : > { %s13623_s13 = scalar_select %p11382_p10, 1, 0 }
  0x1a   : > { %p10214_p11 = pneg %p11382_p10  ;;  %s219_s20 = sshll.u32 %s11280_s19, 4  ;;  %s11396_s20 = int_to_ptr.vmem [resolvable:$true] %s219_s20 }
  0x1b   : > { %s13625_s2 = sld [smem:[#allocation52_spill]] }
  0x1c   : > { %p11390_p12 = pnand %p13517_p9, %p10214_p11 }
  0x1e   : > { %p11406_p0 = pneg %p11390_p12 }
  0x21   : > { %s11030_s23 = scalar_lea.hbm %s13625_s2, 64 }
  0x22   : > { %p11031_p13 = scmp.ne.s32.totalorder %s13625_s2, %s11030_s23  ;;  %p11037_p3 = scmp.lt.u32.totalorder %s11030_s23, %s13625_s2 }
  0x24   : > { %p11033_p1 = pnand %p11406_p0, %p11031_p13 }
  0x26   : > { %p11034_p2 = pneg %p11033_p1 }
  0x28   : > { %p11039_p4 = pnand %p11037_p3, %p11034_p2 }
  0x2a   : > { %11042 = shalt.err (!%p11039_p4)
}
  0x2b   : > { %s11043_s19 = scalar_lea.vmem %s234_s15, 64  ;;  %p11051_p9 = scmp.lt.s32.totalorder %s234_s15, %s234_s15 }
  0x2c   : > { %p11044_p7 = scmp.ne.s32.totalorder %s234_s15, %s11043_s19  ;;  %p11052_p6 = scmp.lt.s32.totalorder %s11043_s19, %s11043_s19 }
  0x2e   : > { %p11046_p8 = pnand %p11044_p7, %p11406_p0  ;;  %p11053_p5 = por %p11052_p6, %p11051_p9 }
  0x30   : > { %p11047_p11 = pneg %p11046_p8 }
  0x32   : > { %p11054_p10 = pnand %p11053_p5, %p11047_p11 }
  0x34   : > { %11057 = shalt.err (!%p11054_p10)
}
  0x35   : > { %10220 = dma.hbm_to_vmem [thread:$0]  (!%p11390_p12), %s13625_s2, 64, %s234_s15, [#allocation7]  }
  0x36   : > { %s13627_s4 = sld [smem:[#allocation53_spill]] }
  0x3c   : > { %s11058_s8 = scalar_lea.hbm %s13627_s4, 64 }
  0x3d   : > { %p11059_p13 = scmp.ne.s32.totalorder %s13627_s4, %s11058_s8  ;;  %p11065_p5 = scmp.lt.u32.totalorder %s11058_s8, %s13627_s4 }
  0x3f   : > { %p11061_p1 = pnand %p11059_p13, %p11406_p0 }
  0x41   : > { %p11062_p6 = pneg %p11061_p1 }
  0x43   : > { %p11067_p9 = pnand %p11065_p5, %p11062_p6 }
  0x45   : > { %11070 = shalt.err (!%p11067_p9)
}
  0x46   : > { %s11071_s15 = scalar_lea.vmem %s11394_s17, 64  ;;  %p11079_p4 = scmp.lt.s32.totalorder %s11394_s17, %s11394_s17 }
  0x47   : > { %p11072_p10 = scmp.ne.s32.totalorder %s11394_s17, %s11071_s15  ;;  %p11080_p7 = scmp.lt.s32.totalorder %s11071_s15, %s11071_s15 }
  0x49   : > { %p11074_p2 = pnand %p11072_p10, %p11406_p0  ;;  %p11081_p8 = por %p11080_p7, %p11079_p4 }
  0x4b   : > { %p11075_p3 = pneg %p11074_p2 }
  0x4d   : > { %p11082_p11 = pnand %p11081_p8, %p11075_p3 }
  0x4f   : > { %11085 = shalt.err (!%p11082_p11)
}
  0x50   : > { %10226 = dma.hbm_to_vmem [thread:$0]  (!%p11390_p12), %s13627_s4, 64, %s11394_s17, [#allocation10]  }
  0x51   : > { %s11086_s29 = scalar_lea.hbm %s13510_s1, 5120 }
  0x52   : > { %p11087_p13 = scmp.ne.s32.totalorder %s13510_s1, %s11086_s29  ;;  %p11093_p5 = scmp.lt.u32.totalorder %s11086_s29, %s13510_s1 }
  0x54   : > { %p11089_p1 = pnand %p11087_p13, %p11406_p0 }
  0x56   : > { %p11090_p6 = pneg %p11089_p1 }
  0x58   : > { %p11095_p9 = pnand %p11093_p5, %p11090_p6 }
  0x5a   : > { %11098 = shalt.err (!%p11095_p9)
}
  0x5b   : > { %s11099_s17 = scalar_lea.vmem %s11396_s20, 5120  ;;  %p11107_p4 = scmp.lt.s32.totalorder %s11396_s20, %s11396_s20 }
  0x5c   : > { %p11100_p10 = scmp.ne.s32.totalorder %s11396_s20, %s11099_s17  ;;  %p11108_p7 = scmp.lt.s32.totalorder %s11099_s17, %s11099_s17 }
  0x5e   : > { %p11102_p2 = pnand %p11100_p10, %p11406_p0  ;;  %p11109_p8 = por %p11108_p7, %p11107_p4 }
  0x60   : > { %p11103_p3 = pneg %p11102_p2 }
  0x62   : > { %p11110_p11 = pnand %p11109_p8, %p11103_p3 }
  0x64   : > { %11113 = shalt.err (!%p11110_p11)
}
  0x65   : > { %s11281_s15 = smov 256   ;;  %s11282_s10 = smov 16  }
  0x66   : > { %10217 = dma.hbm_to_vmem [thread:$0]  (!%p11390_p12), %s13510_s1, 5120, %s11396_s20, [#allocation4], %s11281_s15, %s11281_s15, %s11282_s10  }
  0x67   : > { %s11283_s23 = smov [#allocation8]   ;;  %s11284_s8 = smov [#allocation11]  }
  0x68   : > { %s243_s29 = sshll.u32 %s11283_s23, 4  ;;  %s267_s14 = sshll.u32 %s11284_s8, 4  ;;  %s244_s29 = int_to_ptr.vmem [resolvable:$true] %s243_s29  ;;  %s268_s14 = int_to_ptr.vmem [resolvable:$true] %s267_s14 }
  0x69   : > { %s11114_s17 = scalar_lea.hbm %s13512_s3, 40960 }
  0x6a   : > { %p11115_p13 = scmp.ne.s32.totalorder %s13512_s3, %s11114_s17  ;;  %p11121_p5 = scmp.lt.u32.totalorder %s11114_s17, %s13512_s3 }
  0x6c   : > { %p11117_p1 = pnand %p11115_p13, %p11406_p0 }
  0x6e   : > { %p11118_p6 = pneg %p11117_p1 }
  0x70   : > { %p11123_p9 = pnand %p11121_p5, %p11118_p6 }
  0x72   : > { %11126 = shalt.err (!%p11123_p9)
}
  0x73   : > { %s11127_s20 = scalar_lea.vmem %s244_s29, 40960  ;;  %p11135_p4 = scmp.lt.s32.totalorder %s244_s29, %s244_s29 }
  0x74   : > { %p11128_p10 = scmp.ne.s32.totalorder %s244_s29, %s11127_s20  ;;  %p11136_p7 = scmp.lt.s32.totalorder %s11127_s20, %s11127_s20 }
  0x76   : > { %p11130_p2 = pnand %p11128_p10, %p11406_p0  ;;  %p11137_p8 = por %p11136_p7, %p11135_p4 }
  0x78   : > { %p11131_p3 = pneg %p11130_p2 }
  0x7a   : > { %p11138_p11 = pnand %p11137_p8, %p11131_p3 }
  0x7c   : > { %11141 = shalt.err (!%p11138_p11)
}
  0x7d   : > { %10223 = dma.hbm_to_vmem [thread:$0]  (!%p11390_p12), %s13512_s3, 40960, %s244_s29, [#allocation7], %s11281_s15, %s11281_s15, %s11282_s10  }
  0x7e   : > { %s11142_s21 = scalar_lea.hbm %s13514_s5, 16384 }
  0x7f   : > { %p11143_p13 = scmp.ne.s32.totalorder %s13514_s5, %s11142_s21  ;;  %p11149_p5 = scmp.lt.u32.totalorder %s11142_s21, %s13514_s5 }
  0x81   : > { %p11145_p1 = pnand %p11143_p13, %p11406_p0 }
  0x83   : > { %p11146_p6 = pneg %p11145_p1 }
  0x85   : > { %p11151_p9 = pnand %p11149_p5, %p11146_p6 }
  0x87   : > { %11154 = shalt.err (!%p11151_p9)
}
  0x88   : > { %s11155_s19 = scalar_lea.vmem %s268_s14, 16384  ;;  %p11163_p4 = scmp.lt.s32.totalorder %s268_s14, %s268_s14 }
  0x89   : > { %p11156_p10 = scmp.ne.s32.totalorder %s268_s14, %s11155_s19  ;;  %p11164_p7 = scmp.lt.s32.totalorder %s11155_s19, %s11155_s19 }
  0x8b   : > { %p11158_p2 = pnand %p11156_p10, %p11406_p0  ;;  %p11165_p8 = por %p11164_p7, %p11163_p4 }
  0x8d   : > { %p11159_p3 = pneg %p11158_p2 }
  0x8f   : > { %p11166_p11 = pnand %p11165_p8, %p11159_p3 }
  0x91   : > { %11169 = shalt.err (!%p11166_p11)
}
  0x92   : > { %s11285_s15 = smov 64   ;;  %s11286_s10 = smov 4  }
  0x93   : > { %10229 = dma.hbm_to_vmem [thread:$0]  (!%p11390_p12), %s13514_s5, 16384, %s268_s14, [#allocation10], %s11285_s15, %s11285_s15, %s11286_s10  }
  0x94   : > { %s11287_s20 = smov [#allocation12]   ;;  %s11170_s30 = scalar_lea.hbm %s13515_s6, 16 }
  0x95   : > { %s281_s2 = sshll.u32 %s11287_s20, 4  ;;  %p11171_p13 = scmp.ne.s32.totalorder %s13515_s6, %s11170_s30  ;;  %s282_s2 = int_to_ptr.vmem [resolvable:$true] %s281_s2 }
  0x96   : > { %p11177_p5 = scmp.lt.u32.totalorder %s11170_s30, %s13515_s6 }
  0x97   : > { %p11173_p1 = pnand %p11171_p13, %p11406_p0 }
  0x99   : > { %p11174_p6 = pneg %p11173_p1 }
  0x9b   : > { %p11179_p9 = pnand %p11177_p5, %p11174_p6 }
  0x9d   : > { %11182 = shalt.err (!%p11179_p9)
}
  0x9e   : > { %s11183_s14 = scalar_lea.vmem %s282_s2, 16  ;;  %s11190_s16 = scalar_lea.vmem %s282_s2, 32 }
  0x9f   : > { %p11184_p10 = scmp.ne.s32.totalorder %s282_s2, %s11183_s14  ;;  %p11191_p4 = scmp.lt.s32.totalorder %s282_s2, %s282_s2 }
  0xa0   : > { %p11192_p7 = scmp.lt.s32.totalorder %s11190_s16, %s11183_s14 }
  0xa1   : > { %p11186_p2 = pnand %p11184_p10, %p11406_p0 }
  0xa2   : > { %p11193_p8 = por %p11192_p7, %p11191_p4 }
  0xa3   : > { %p11187_p3 = pneg %p11186_p2 }
  0xa5   : > { %p11194_p11 = pnand %p11193_p8, %p11187_p3 }
  0xa7   : > { %11197 = shalt.err (!%p11194_p11)
}
  0xa8   : > { %10232 = dma.hbm_to_vmem [thread:$0]  (!%p11390_p12), %s13515_s6, 16, %s282_s2, [#allocation13]  }
  0xa9   : > { %p13628_p13 = scmp.ne.s32.totalorder %s13623_s13, 0 }
  0xab   : > { %304 = sbr.rel (%p13628_p13) target bundleno = 1908 (0x774), region = 48 }
  0xb2   : > { %p13629_p1 = scmp.eq.s32.totalorder %s11354_s28, 0 }
  0xb4   : > { %11243 = dma.done.wait (%p13629_p1), [#allocation4], 5120   ;;  %p13630_p0 = pmov %p13629_p1 }
  0xb6   : > { %11245 = vsyncadd (%p13630_p0), [#allocation4], 4294962176  ;;  %p13631_p6 = pmov %p13630_p0 }
  0xb7   : > { %p13632_p5 = pmov %p13630_p0 }
  0xb8   : > { %11247 = dma.done.wait (%p13631_p6), [#allocation7], 41024  }
  0xb9   : > { %11249 = vsyncadd (%p13632_p5), [#allocation7], 4294926272  ;;  %p13633_p9 = pmov %p13630_p0 }
  0xba   : > { %p13634_p12 = pmov %p13630_p0 }
  0xbb   : > { %11251 = dma.done.wait (%p13633_p9), [#allocation10], 16448  }
  0xbc   : > { %11253 = vsyncadd (%p13634_p12), [#allocation10], 4294950848  ;;  %p13635_p10 = pmov %p13630_p0 }
  0xbd   : > { %p13636_p2 = pmov %p13630_p0 }
  0xbe   : > { %11255 = dma.done.wait (%p13635_p10), [#allocation13], 16  }
  0xbf   : > { %11257 = vsyncadd (%p13636_p2), [#allocation13], 4294967280  ;;  %s8891_s13 = sshll.u32 %s11354_s28, 2  ;;  %v11288_v0 = vmov 0   ;;  %v11543_v1 = vld [vmem:[#allocation3 + $0x44] ss:$16 sps:$4 sm:$0xff]  }
  0xc0   : > { %506 = vmatprep.mubr.bf16.mxu0 %v11288_v0  ;;  %559 = vmatprep.mubr.bf16.mxu1 %v11288_v0  ;;  %p358_p3 = scmp.lt.s32.totalorder %s8891_s13, 7  ;;  %v11545_v2 = vld [vmem:[#allocation3 + $0x4c] ss:$16 sps:$4 sm:$0xff]   ;;  %v11548_v3 = vld [vmem:[#allocation3 + $0x40] ss:$16 sps:$4 sm:$0xff]   ;;  %vm467_vm0 = vcmask 261120  }
  0xc1   : > { %474 = vmatprep.subr.bf16.mxu0 %v11543_v1  ;;  %v11550_v4 = vld [vmem:[#allocation3 + $0x48] ss:$16 sps:$4 sm:$0xff]   ;;  %527 = vmatprep.subr.bf16.mxu1 %v11545_v2  ;;  %v11558_v5 = vld [vmem:[#allocation3 + $0x64] ss:$16 sps:$4 sm:$0xff]   ;;  %v11562_v6 = vld [vmem:[#allocation3 + $0x6c] ss:$16 sps:$4 sm:$0xff]  }
  0xc2   : > { %s13823_s13 = smov (!%p358_p3, %s8891_s13), 7  ;;  %475 = vmatpush1.bf16.msra.mxu0 %v11548_v3  ;;  %528 = vmatpush1.bf16.msra.mxu1 %v11550_v4  ;;  %v11564_v7 = vld [vmem:[#allocation3 + $0x60] ss:$16 sps:$4 sm:$0xff]   ;;  %v11567_v8 = vld [vmem:[#allocation3 + $0x68] ss:$16 sps:$4 sm:$0xff]   ;;  %vm5704_vm5 = vcmask 1042432  }
  0xc3   : > { %s9571_s18 = sshll.u32 %s13823_s13, 6  ;;  %476 = vmatprep.subr.bf16.mxu0 %v11558_v5  ;;  %529 = vmatprep.subr.bf16.mxu1 %v11562_v6  ;;  %v11572_v11 = vld [vmem:[#allocation3 + $0x4] ss:$16 sps:$4 sm:$0xff]   ;;  %v11576_v13 = vld [vmem:[#allocation3 + $0xc] ss:$16 sps:$4 sm:$0xff]   ;;  %vm5705_vm6 = vcmask 1046532  }
  0xc4   : > { %s11555_s29 = scalar_lea.vmem %s13509_s0, %s9571_s18  ;;  %v11580_v14 = vld [vmem:[#allocation3] ss:$16 sps:$4 sm:$0xff]   ;;  %v11582_v15 = vld [vmem:[#allocation3 + $0x8] ss:$16 sps:$4 sm:$0xff]   ;;  %v11586_v16 = vld [vmem:[#allocation3 + $0x24] ss:$16 sps:$4 sm:$0xff]  }
  0xc5   : > { %v8894_v9 = vld [vmem:[%s11555_s29 + $0x10] sm:$0xff]  ;;  %v11593_v18 = vld [vmem:[#allocation3 + $0x2c] ss:$16 sps:$4 sm:$0xff]   ;;  %v11600_v21 = vld [vmem:[#allocation3 + $0x28] ss:$16 sps:$4 sm:$0xff]   ;;  %s354_s17 = sand.u32 1, %s11268_s25  }
  0xc6   : > { %v8895_v10 = vld [vmem:[%s11555_s29 + $0x50] sm:$0xff]  ;;  %477 = vmatpush1.bf16.msra.mxu0 %v11564_v7  ;;  %530 = vmatpush1.bf16.msra.mxu1 %v11567_v8  ;;  %v373_v23 = vld [vmem:[%s11555_s29] sm:$0xff]  ;;  %v11746_v47 = vld [vmem:[#allocation3 + $0x8c] ss:$16 sps:$4 sm:$0xff]   ;;  %vm3671_vm2 = vsmask.f32 3328 }
  0xc7   : > { %v11574_v12 = vpack.c.bf16 %v8895_v10, %v8894_v9  ;;  %636 = vmatprep.subr.bf16.mxu0 %v11572_v11  ;;  %689 = vmatprep.subr.bf16.mxu1 %v11576_v13  ;;  %v8896_v17 = vld [vmem:[%s11555_s29 + $0x90] sm:$0xff]  ;;  %v374_v24 = vld [vmem:[%s11555_s29 + $0x40] sm:$0xff]  ;;  %v10325_v50 = vld [vmem:[#allocation3 + $0x88] ss:$16 sps:$4 sm:$0xff]   ;;  %vm3672_vm3 = vsmask.f32 7440 }
  0xc8   : > { %v8897_v19 = vld [vmem:[%s11555_s29 + $0xd0] sm:$0xff]  ;;  %v9574_v25 = vpack.c.bf16 %v374_v24, %v373_v23  ;;  %v375_v26 = vld [vmem:[%s11555_s29 + $0x80] sm:$0xff]  ;;  %v10328_v52 = vld [vmem:[#allocation3 + $0xac] ss:$16 sps:$4 sm:$0xff]   ;;  %s8890_s20 = sshll.u32 %s354_s17, 2  ;;  %s9568_s2 = sshll.u32 %s11354_s28, 6 }
  0xc9   : > { %8916 = vmatmul.mubr.msk.bf16.vlgmr.msra.gmra.mrb[0].mxu0 %vm467_vm0, %v11574_v12  ;;  %8918 = vmatmul.mubr.msk.bf16.vlgmr.msra.gmra.mrb[0].mxu1 %vm467_vm0, %v11574_v12  ;;  %v11598_v20 = vld [vmem:[#allocation3 + $0x20] ss:$16 sps:$4 sm:$0xff]   ;;  %v11606_v22 = vpack.c.bf16 %v8897_v19, %v8896_v17  ;;  %v11744_v46 = vld [vmem:[#allocation3 + $0x84] ss:$16 sps:$4 sm:$0xff]   ;;  %v10331_v54 = vld [vmem:[#allocation3 + $0xa8] ss:$16 sps:$4 sm:$0xff]   ;;  %s13467_s22 = scalar_lea.hbm %s13516_s7, %s9568_s2 }
  0xca   : > { %637 = vmatpush1.bf16.msra.mxu0 %v11580_v14  ;;  %690 = vmatpush1.bf16.msra.mxu1 %v11582_v15  ;;  %v376_v27 = vld [vmem:[%s11555_s29 + $0xc0] sm:$0xff]  ;;  %v8902_v35 = vld [vmem:[%s11555_s29 + $0x30] sm:$0xff]  ;;  %v11814_v56 = vld [vmem:[#allocation3 + $0xcc] ss:$16 sps:$4 sm:$0xff]   ;;  %s356_s4 = scalar_lea.vmem [#allocation14], %s8890_s20  ;;  %s8739_s23 = scalar_lea.sflag [#allocation5], %s354_s17 }
  0xcb   : > { %516 = vmatprep.mubr.bf16.mxu0 %v11288_v0  ;;  %569 = vmatprep.mubr.bf16.mxu1 %v11288_v0  ;;  %v9575_v28 = vpack.c.bf16 %v376_v27, %v375_v26  ;;  %v8898_v29 = vld [vmem:[%s11555_s29 + $0x20] sm:$0xff]  ;;  %v8903_v36 = vld [vmem:[%s11555_s29 + $0x70] sm:$0xff]  ;;  %v10337_v60 = vld [vmem:[#allocation3 + $0xc8] ss:$16 sps:$4 sm:$0xff]   ;;  %s8752_s26 = sshll.u32 %s356_s4, 4  ;;  %p13815_p7 = scmp.ne.s32.totalorder %s13621_s11, 0  ;;  %s13469_s26 = int_to_ptr.vmem [resolvable:$true] %s8752_s26 }
  0xcc   : > { %638 = vmatprep.subr.bf16.mxu0 %v11586_v16  ;;  %691 = vmatprep.subr.bf16.mxu1 %v11593_v18  ;;  %v8899_v30 = vld [vmem:[%s11555_s29 + $0x60] sm:$0xff]  ;;  %v11688_v37 = vpack.c.bf16 %v8903_v36, %v8902_v35  ;;  %v8904_v38 = vld [vmem:[%s11555_s29 + $0xb0] sm:$0xff]  ;;  %v10340_v63 = vld [vmem:[#allocation3 + $0xec] ss:$16 sps:$4 sm:$0xff]   ;;  %s11198_s28 = scalar_lea.vmem %s13469_s26, 64  ;;  %s11292_s8 = smov [#allocation14]  }
  0xcd   : > { %v11640_v31 = vpack.c.bf16 %v8899_v30, %v8898_v29  ;;  %v8900_v32 = vld [vmem:[%s11555_s29 + $0xa0] sm:$0xff]  ;;  %v8905_v39 = vld [vmem:[%s11555_s29 + $0xf0] sm:$0xff]  ;;  %v10358_v26 = vld [vmem:[#allocation8 + $0x204] ss:$16 sps:$4 sm:$0xff]   ;;  %p11199_p4 = scmp.ne.s32.totalorder %s13469_s26, %s11198_s28  ;;  %s11202_s14 = sshll.u32 %s11292_s8, 4  ;;  %s11203_s14 = int_to_ptr.vmem [resolvable:$false] %s11202_s14 }
  0xce   : > { %639 = vmatpush1.bf16.msra.mxu0 %v11598_v20  ;;  %692 = vmatpush1.bf16.msra.mxu1 %v11600_v21  ;;  %v8901_v33 = vld [vmem:[%s11555_s29 + $0xe0] sm:$0xff]  ;;  %v11702_v40 = vpack.c.bf16 %v8905_v39, %v8904_v38  ;;  %v8984_v57 = vld [vmem:[%s11555_s29 + $0x11] sm:$0xff]  ;;  %v10359_v29 = vld [vmem:[#allocation8 + $0x208] ss:$16 sps:$4 sm:$0xff]   ;;  %s11204_s16 = scalar_lea.vmem %s11203_s14, 128  ;;  %p11205_p13 = scmp.lt.s32.totalorder %s13469_s26, %s11203_s14 }
  0xcf   : > { %758 = vmatprep.subr.bf16.mxu0 %v11543_v1  ;;  %811 = vmatprep.subr.bf16.mxu1 %v11545_v2  ;;  %v11654_v34 = vpack.c.bf16 %v8901_v33, %v8900_v32  ;;  %v1198_v41 = vld [vmem:[%s11555_s29 + $0x1] sm:$0xff]  ;;  %v8985_v58 = vld [vmem:[%s11555_s29 + $0x51] sm:$0xff]  ;;  %v10365_v33 = vld [vmem:[#allocation8 + $0x228] ss:$16 sps:$4 sm:$0xff]   ;;  %p11200_p8 = pnand %p11199_p4, %p13815_p7  ;;  %p11206_p1 = scmp.lt.s32.totalorder %s11204_s16, %s11198_s28 }
  0xd0   : > { %v1199_v42 = vld [vmem:[%s11555_s29 + $0x41] sm:$0xff]  ;;  %v11828_v61 = vpack.c.bf16 %v8985_v58, %v8984_v57  ;;  %v9046_v23 = vld [vmem:[%s11555_s29 + $0xb1] sm:$0xff]  ;;  %v10371_v36 = vld [vmem:[#allocation8 + $0x248] ss:$16 sps:$4 sm:$0xff]  }
  0xd1   : > { %8917 = vmatmul.mubr.msk.bf16.gmra.mrb[4].mxu0 %vm467_vm0, %v11606_v22  ;;  %8919 = vmatmul.mubr.msk.bf16.gmra.mrb[4].mxu1 %vm467_vm0, %v11606_v22  ;;  %v11736_v43 = vpack.c.bf16 %v1199_v42, %v1198_v41  ;;  %v1200_v44 = vld [vmem:[%s11555_s29 + $0x81] sm:$0xff]  ;;  %v9047_v24 = vld [vmem:[%s11555_s29 + $0xf1] sm:$0xff]  ;;  %vm12330_vm4 = vmor %vm3671_vm2, %vm3672_vm3  ;;  %p11201_p11 = pneg %p11200_p8  ;;  %p11207_p0 = por %p11206_p1, %p11205_p13 }
  0xd2   : > { %668 = vmatprep.mubr.bf16.mxu0 %v11288_v0  ;;  %721 = vmatprep.mubr.bf16.mxu1 %v11288_v0  ;;  %v1201_v45 = vld [vmem:[%s11555_s29 + $0xc1] sm:$0xff]  ;;  %vm12936_vm7 = vmor %vm5704_vm5, %vm5705_vm6 }
  0xd3   : > { %v11754_v48 = vpack.c.bf16 %v1201_v45, %v1200_v44  ;;  %v10324_v49 = vld [vmem:[#allocation3 + $0x80] ss:$16 sps:$4 sm:$0xff]   ;;  %v10326_v51 = vld [vmem:[#allocation3 + $0xa4] ss:$16 sps:$4 sm:$0xff]   ;;  %v10364_v30 = vld [vmem:[#allocation8 + $0x224] ss:$16 sps:$4 sm:$0xff]   ;;  %v3119_v45 = vlaneseq  ;;  %p11208_p6 = pnand %p11207_p0, %p11201_p11 }
  0xd4   : > { %v10330_v53 = vld [vmem:[#allocation3 + $0xa0] ss:$16 sps:$4 sm:$0xff]   ;;  %v11812_v55 = vld [vmem:[#allocation3 + $0xc4] ss:$16 sps:$4 sm:$0xff]   ;;  %v10382_v41 = vld [vmem:[#allocation8 + $0x284] ss:$16 sps:$4 sm:$0xff]  }
  0xd5   : > { %v10336_v59 = vld [vmem:[#allocation3 + $0xc0] ss:$16 sps:$4 sm:$0xff]   ;;  %v10338_v62 = vld [vmem:[#allocation3 + $0xe4] ss:$16 sps:$4 sm:$0xff]   ;;  %v10383_v44 = vld [vmem:[#allocation8 + $0x288] ss:$16 sps:$4 sm:$0xff]  }
  0xd6   : > { %v9015_v9 = vld [vmem:[%s11555_s29 + $0x61] sm:$0xff]  ;;  %vm11955_vm1 = vcmp.lt.s32.totalorder %v3119_v45, 256 }
  0xd7   : > { %v10354_v17 = vld [vmem:[#allocation3 + $0x120] ss:$16 sps:$4 sm:$0xff]   ;;  %v10362_v32 = vld [vmem:[#allocation8 + $0x220] ss:$16 sps:$4 sm:$0xff]  }
  0xd8   : > { %v10361_v27 = vld [vmem:[#allocation8 + $0x20c] ss:$16 sps:$4 sm:$0xff]   ;;  %v10368_v35 = vld [vmem:[#allocation8 + $0x240] ss:$16 sps:$4 sm:$0xff]  }
  0xd9   : > { %8930 = vmatmul.mubr.msk.bf16.vlgmr.msra.gmra.mrb[0].mxu0 %vm467_vm0, %v9574_v25  ;;  %8932 = vmatmul.mubr.msk.bf16.vlgmr.msra.gmra.mrb[0].mxu1 %vm467_vm0, %v9574_v25  ;;  %v9587_v25 = vpack.c.bf16 %v9047_v24, %v9046_v23  ;;  %v10379_v38 = vld [vmem:[#allocation8 + $0x26c] ss:$16 sps:$4 sm:$0xff]   ;;  %v10374_v39 = vld [vmem:[#allocation8 + $0x260] ss:$16 sps:$4 sm:$0xff]   ;;  %v10443_v24 = vld [vmem:[#allocation8 + $0x3c8] ss:$16 sps:$4 sm:$0xff]  }
  0xda   : > { %759 = vmatpush1.bf16.msra.mxu0 %v11548_v3  ;;  %812 = vmatpush1.bf16.msra.mxu1 %v11550_v4  ;;  %v10385_v42 = vld [vmem:[#allocation8 + $0x28c] ss:$16 sps:$4 sm:$0xff]   ;;  %v10398_v58 = vld [vmem:[#allocation8 + $0x2e0] ss:$16 sps:$4 sm:$0xff]  }
  0xdb   : > { %678 = vmatprep.mubr.bf16.mxu0 %v11288_v0  ;;  %731 = vmatprep.mubr.bf16.mxu1 %v11288_v0  ;;  %v10403_v57 = vld [vmem:[#allocation8 + $0x2ec] ss:$16 sps:$4 sm:$0xff]   ;;  %v10440_v23 = vld [vmem:[#allocation8 + $0x3c0] ss:$16 sps:$4 sm:$0xff]  }
  0xdc   : > { %760 = vmatprep.subr.bf16.mxu0 %v11558_v5  ;;  %813 = vmatprep.subr.bf16.mxu1 %v11562_v6 }
  0xde   : > { %761 = vmatpush1.bf16.msra.mxu0 %v11564_v7  ;;  %814 = vmatpush1.bf16.msra.mxu1 %v11567_v8 }
  0xdf   : > { %864 = vmatprep.subr.bf16.mxu0 %v11572_v11  ;;  %917 = vmatprep.subr.bf16.mxu1 %v11576_v13 }
  0xe1   : > { %8931 = vmatmul.mubr.msk.bf16.gmra.mrb[4].mxu0 %vm467_vm0, %v9575_v28  ;;  %8933 = vmatmul.mubr.msk.bf16.gmra.mrb[4].mxu1 %vm467_vm0, %v9575_v28  ;;  %v10356_v28 = vld [vmem:[#allocation8 + $0x200] ss:$16 sps:$4 sm:$0xff]  }
  0xe2   : > { %790 = vmatprep.mubr.bf16.mxu0 %v11288_v0  ;;  %843 = vmatprep.mubr.bf16.mxu1 %v11288_v0 }
  0xe9   : > { %8936 = vmatmul.mubr.msk.bf16.vlgmr.msra.gmra.mrb[8].mxu0 %vm467_vm0, %v11640_v31  ;;  %8938 = vmatmul.mubr.msk.bf16.vlgmr.msra.gmra.mrb[8].mxu1 %vm467_vm0, %v11640_v31 }
  0xea   : > { %865 = vmatpush1.bf16.msra.mxu0 %v11580_v14  ;;  %918 = vmatpush1.bf16.msra.mxu1 %v11582_v15 }
  0xeb   : > { %800 = vmatprep.mubr.bf16.mxu0 %v11288_v0  ;;  %853 = vmatprep.mubr.bf16.mxu1 %v11288_v0 }
  0xec   : > { %866 = vmatprep.subr.bf16.mxu0 %v11586_v16  ;;  %919 = vmatprep.subr.bf16.mxu1 %v11593_v18 }
  0xee   : > { %867 = vmatpush1.bf16.msra.mxu0 %v11598_v20  ;;  %920 = vmatpush1.bf16.msra.mxu1 %v11600_v21 }
  0xef   : > { %986 = vmatprep.subr.bf16.mxu0 %v11543_v1  ;;  %1039 = vmatprep.subr.bf16.mxu1 %v11545_v2 }
  0xf1   : > { %8937 = vmatmul.mubr.msk.bf16.gmra.mrb[12].mxu0 %vm467_vm0, %v11654_v34  ;;  %8939 = vmatmul.mubr.msk.bf16.gmra.mrb[12].mxu1 %vm467_vm0, %v11654_v34 }
  0xf2   : > { %896 = vmatprep.mubr.bf16.mxu0 %v11288_v0  ;;  %949 = vmatprep.mubr.bf16.mxu1 %v11288_v0 }
  0xf9   : > { %8940 = vmatmul.mubr.msk.bf16.vlgmr.msra.gmra.mrb[8].mxu0 %vm467_vm0, %v11574_v12  ;;  %8942 = vmatmul.mubr.msk.bf16.vlgmr.msra.gmra.mrb[8].mxu1 %vm467_vm0, %v11574_v12  ;;  %v10349_v12 = vld [vmem:[#allocation3 + $0x108] ss:$16 sps:$4 sm:$0xff]  }
  0xfa   : > { %987 = vmatpush1.bf16.msra.mxu0 %v11548_v3  ;;  %1040 = vmatpush1.bf16.msra.mxu1 %v11550_v4 }
  0xfb   : > { %906 = vmatprep.mubr.bf16.mxu0 %v11288_v0  ;;  %959 = vmatprep.mubr.bf16.mxu1 %v11288_v0 }
  0xfc   : > { %988 = vmatprep.subr.bf16.mxu0 %v11558_v5  ;;  %1041 = vmatprep.subr.bf16.mxu1 %v11562_v6 }
  0xfe   : > { %989 = vmatpush1.bf16.msra.mxu0 %v11564_v7  ;;  %1042 = vmatpush1.bf16.msra.mxu1 %v11567_v8 }
  0xff   : > { %1092 = vmatprep.subr.bf16.mxu0 %v11572_v11  ;;  %1145 = vmatprep.subr.bf16.mxu1 %v11576_v13 }
 0x101   : > { %8941 = vmatmul.mubr.msk.bf16.gmra.mrb[12].mxu0 %vm467_vm0, %v11606_v22  ;;  %8943 = vmatmul.mubr.msk.bf16.gmra.mrb[12].mxu1 %vm467_vm0, %v11606_v22 }
 0x102   : > { %1018 = vmatprep.mubr.bf16.mxu0 %v11288_v0  ;;  %1071 = vmatprep.mubr.bf16.mxu1 %v11288_v0 }
 0x109   : > { %8946 = vmatmul.mubr.msk.bf16.vlgmr.msra.gmra.mrb[16].mxu0 %vm467_vm0, %v11688_v37  ;;  %8948 = vmatmul.mubr.msk.bf16.vlgmr.msra.gmra.mrb[16].mxu1 %vm467_vm0, %v11688_v37 }
 0x10a   : > { %1093 = vmatpush1.bf16.msra.mxu0 %v11580_v14  ;;  %1146 = vmatpush1.bf16.msra.mxu1 %v11582_v15 }
 0x10b   : > { %1028 = vmatprep.mubr.bf16.mxu0 %v11288_v0  ;;  %1081 = vmatprep.mubr.bf16.mxu1 %v11288_v0 }
 0x10c   : > { %1094 = vmatprep.subr.bf16.mxu0 %v11586_v16  ;;  %1147 = vmatprep.subr.bf16.mxu1 %v11593_v18 }
 0x10e   : > { %1095 = vmatpush1.bf16.msra.mxu0 %v11598_v20  ;;  %1148 = vmatpush1.bf16.msra.mxu1 %v11600_v21 }
 0x10f   : > { %1222 = vmatprep.subr.bf16.mxu0 %v11543_v1  ;;  %1275 = vmatprep.subr.bf16.mxu1 %v11545_v2  ;;  %v8986_v1 = vld [vmem:[%s11555_s29 + $0x91] sm:$0xff] }
 0x110   : > { %v8987_v2 = vld [vmem:[%s11555_s29 + $0xd1] sm:$0xff] }
 0x111   : > { %8947 = vmatmul.mubr.msk.bf16.gmra.mrb[20].mxu0 %vm467_vm0, %v11702_v40  ;;  %8949 = vmatmul.mubr.msk.bf16.gmra.mrb[20].mxu1 %vm467_vm0, %v11702_v40 }
 0x112   : > { %1124 = vmatprep.mubr.bf16.mxu0 %v11288_v0  ;;  %1177 = vmatprep.mubr.bf16.mxu1 %v11288_v0 }
 0x119   : > { %8950 = vmatmul.mubr.msk.bf16.vlgmr.msra.gmra.mrb[16].mxu0 %vm467_vm0, %v11640_v31  ;;  %8952 = vmatmul.mubr.msk.bf16.vlgmr.msra.gmra.mrb[16].mxu1 %vm467_vm0, %v11640_v31 }
 0x11a   : > { %1223 = vmatpush1.bf16.msra.mxu0 %v11548_v3  ;;  %1276 = vmatpush1.bf16.msra.mxu1 %v11550_v4  ;;  %v10342_v3 = vld [vmem:[#allocation3 + $0xe0] ss:$16 sps:$4 sm:$0xff]   ;;  %v10343_v4 = vld [vmem:[#allocation3 + $0xe8] ss:$16 sps:$4 sm:$0xff]  }
 0x11b   : > { %1134 = vmatprep.mubr.bf16.mxu0 %v11288_v0  ;;  %1187 = vmatprep.mubr.bf16.mxu1 %v11288_v0 }
 0x11c   : > { %1224 = vmatprep.subr.bf16.mxu0 %v11558_v5  ;;  %1277 = vmatprep.subr.bf16.mxu1 %v11562_v6  ;;  %v11838_v5 = vpack.c.bf16 %v8987_v2, %v8986_v1  ;;  %v11882_v6 = vld [vmem:[#allocation3 + $0x104] ss:$16 sps:$4 sm:$0xff]   ;;  %v10412_v1 = vld [vmem:[#allocation8 + $0x324] ss:$16 sps:$4 sm:$0xff]   ;;  %v10415_v2 = vld [vmem:[#allocation8 + $0x32c] ss:$16 sps:$4 sm:$0xff]  }
 0x11e   : > { %1225 = vmatpush1.bf16.msra.mxu0 %v11564_v7  ;;  %1278 = vmatpush1.bf16.msra.mxu1 %v11567_v8  ;;  %v11884_v7 = vld [vmem:[#allocation3 + $0x10c] ss:$16 sps:$4 sm:$0xff]   ;;  %v9014_v8 = vld [vmem:[%s11555_s29 + $0x21] sm:$0xff] }
 0x11f   : > { %1328 = vmatprep.subr.bf16.mxu0 %v11572_v11  ;;  %1381 = vmatprep.subr.bf16.mxu1 %v11576_v13  ;;  %v9584_v10 = vpack.c.bf16 %v9015_v9, %v9014_v8  ;;  %v10348_v11 = vld [vmem:[#allocation3 + $0x100] ss:$16 sps:$4 sm:$0xff]   ;;  %v10350_v13 = vld [vmem:[#allocation3 + $0x124] ss:$16 sps:$4 sm:$0xff]   ;;  %v10419_v8 = vld [vmem:[#allocation8 + $0x348] ss:$16 sps:$4 sm:$0xff]  }
 0x120   : > { %v10424_v9 = vld [vmem:[#allocation8 + $0x364] ss:$16 sps:$4 sm:$0xff]  }
 0x121   : > { %8951 = vmatmul.mubr.msk.bf16.gmra.mrb[20].mxu0 %vm467_vm0, %v11654_v34  ;;  %8953 = vmatmul.mubr.msk.bf16.gmra.mrb[20].mxu1 %vm467_vm0, %v11654_v34 }
 0x122   : > { %1254 = vmatprep.mubr.bf16.mxu0 %v11288_v0  ;;  %1307 = vmatprep.mubr.bf16.mxu1 %v11288_v0 }
 0x129   : > { %8956 = vmatmul.mubr.msk.bf16.vlgmr.msra.gmra.mrb[24].mxu0 %vm467_vm0, %v11736_v43  ;;  %8958 = vmatmul.mubr.msk.bf16.vlgmr.msra.gmra.mrb[24].mxu1 %vm467_vm0, %v11736_v43 }
 0x12a   : > { %1329 = vmatpush1.bf16.msra.mxu0 %v11580_v14  ;;  %1382 = vmatpush1.bf16.msra.mxu1 %v11582_v15  ;;  %v10352_v14 = vld [vmem:[#allocation3 + $0x12c] ss:$16 sps:$4 sm:$0xff]   ;;  %v9016_v15 = vld [vmem:[%s11555_s29 + $0xa1] sm:$0xff] }
 0x12b   : > { %1264 = vmatprep.mubr.bf16.mxu0 %v11288_v0  ;;  %1317 = vmatprep.mubr.bf16.mxu1 %v11288_v0 }
 0x12c   : > { %1330 = vmatprep.subr.bf16.mxu0 %v11586_v16  ;;  %1383 = vmatprep.subr.bf16.mxu1 %v11593_v18  ;;  %v9017_v16 = vld [vmem:[%s11555_s29 + $0xe1] sm:$0xff] }
 0x12d   : > { %v10355_v18 = vld [vmem:[#allocation3 + $0x128] ss:$16 sps:$4 sm:$0xff]   ;;  %v9585_v19 = vpack.c.bf16 %v9017_v16, %v9016_v15  ;;  %v10428_v15 = vld [vmem:[#allocation8 + $0x380] ss:$16 sps:$4 sm:$0xff]   ;;  %v10431_v16 = vld [vmem:[#allocation8 + $0x388] ss:$16 sps:$4 sm:$0xff]  }
 0x12e   : > { %1331 = vmatpush1.bf16.msra.mxu0 %v11598_v20  ;;  %1384 = vmatpush1.bf16.msra.mxu1 %v11600_v21  ;;  %v9044_v20 = vld [vmem:[%s11555_s29 + $0x31] sm:$0xff] }
 0x12f   : > { %1483 = vmatprep.subr.bf16.mxu0 %v11744_v46  ;;  %1536 = vmatprep.subr.bf16.mxu1 %v11746_v47  ;;  %v9045_v21 = vld [vmem:[%s11555_s29 + $0x71] sm:$0xff] }
 0x130   : > { %v9586_v22 = vpack.c.bf16 %v9045_v21, %v9044_v20  ;;  %v10437_v20 = vld [vmem:[#allocation8 + $0x3a8] ss:$16 sps:$4 sm:$0xff]   ;;  %v10442_v21 = vld [vmem:[#allocation8 + $0x3c4] ss:$16 sps:$4 sm:$0xff]  }
 0x131   : > { %8957 = vmatmul.mubr.msk.bf16.gmra.mrb[28].mxu0 %vm467_vm0, %v11754_v48  ;;  %8959 = vmatmul.mubr.msk.bf16.gmra.mrb[28].mxu1 %vm467_vm0, %v11754_v48 }
 0x132   : > { %1360 = vmatprep.mubr.bf16.mxu0 %v11288_v0  ;;  %1413 = vmatprep.mubr.bf16.mxu1 %v11288_v0 }
 0x139   : > { %8960 = vmatmul.mubr.msk.bf16.vlgmr.msra.gmra.mrb[24].mxu0 %vm467_vm0, %v11688_v37  ;;  %8962 = vmatmul.mubr.msk.bf16.vlgmr.msra.gmra.mrb[24].mxu1 %vm467_vm0, %v11688_v37 }
 0x13a   : > { %1484 = vmatpush1.bf16.msra.mxu0 %v10324_v49  ;;  %1537 = vmatpush1.bf16.msra.mxu1 %v10325_v50 }
 0x13b   : > { %1370 = vmatprep.mubr.bf16.mxu0 %v11288_v0  ;;  %1423 = vmatprep.mubr.bf16.mxu1 %v11288_v0 }
 0x13c   : > { %1485 = vmatprep.subr.bf16.mxu0 %v10326_v51  ;;  %1538 = vmatprep.subr.bf16.mxu1 %v10328_v52 }
 0x13e   : > { %1486 = vmatpush1.bf16.msra.mxu0 %v10330_v53  ;;  %1539 = vmatpush1.bf16.msra.mxu1 %v10331_v54 }
 0x13f   : > { %1605 = vmatprep.subr.bf16.mxu0 %v11744_v46  ;;  %1658 = vmatprep.subr.bf16.mxu1 %v11746_v47 }
 0x141   : > { %8961 = vmatmul.mubr.msk.bf16.gmra.mrb[28].mxu0 %vm467_vm0, %v11702_v40  ;;  %8963 = vmatmul.mubr.msk.bf16.gmra.mrb[28].mxu1 %vm467_vm0, %v11702_v40 }
 0x142   : > { %1515 = vmatprep.mubr.bf16.mxu0 %v11288_v0  ;;  %1568 = vmatprep.mubr.bf16.mxu1 %v11288_v0 }
 0x149   : > { %8972 = vmatmul.mubr.msk.bf16.vlgmr.msra.gmra.mrb[0].mxu0 %vm467_vm0, %v11640_v31  ;;  %8974 = vmatmul.mubr.msk.bf16.vlgmr.msra.gmra.mrb[0].mxu1 %vm467_vm0, %v11640_v31  ;;  %v10367_v31 = vld [vmem:[#allocation8 + $0x22c] ss:$16 sps:$4 sm:$0xff]  }
 0x14a   : > { %1606 = vmatpush1.bf16.msra.mxu0 %v10324_v49  ;;  %1659 = vmatpush1.bf16.msra.mxu1 %v10325_v50 }
 0x14b   : > { %1525 = vmatprep.mubr.bf16.mxu0 %v11288_v0  ;;  %1578 = vmatprep.mubr.bf16.mxu1 %v11288_v0 }
 0x14c   : > { %1607 = vmatprep.subr.bf16.mxu0 %v10326_v51  ;;  %1660 = vmatprep.subr.bf16.mxu1 %v10328_v52 }
 0x14e   : > { %1608 = vmatpush1.bf16.msra.mxu0 %v10330_v53  ;;  %1661 = vmatpush1.bf16.msra.mxu1 %v10331_v54 }
 0x14f   : > { %1727 = vmatprep.subr.bf16.mxu0 %v11744_v46  ;;  %1780 = vmatprep.subr.bf16.mxu1 %v11746_v47 }
 0x151   : > { %8973 = vmatmul.mubr.msk.bf16.gmra.mrb[4].mxu0 %vm467_vm0, %v11654_v34  ;;  %8975 = vmatmul.mubr.msk.bf16.gmra.mrb[4].mxu1 %vm467_vm0, %v11654_v34  ;;  %v10373_v34 = vld [vmem:[#allocation8 + $0x24c] ss:$16 sps:$4 sm:$0xff]  }
 0x152   : > { %1637 = vmatprep.mubr.bf16.mxu0 %v11288_v0  ;;  %1690 = vmatprep.mubr.bf16.mxu1 %v11288_v0 }
 0x159   : > { %8976 = vmatmul.mubr.msk.bf16.vlgmr.msra.gmra.mrb[8].mxu0 %vm467_vm0, %v11688_v37  ;;  %8978 = vmatmul.mubr.msk.bf16.vlgmr.msra.gmra.mrb[8].mxu1 %vm467_vm0, %v11688_v37 }
 0x15a   : > { %1728 = vmatpush1.bf16.msra.mxu0 %v10324_v49  ;;  %1781 = vmatpush1.bf16.msra.mxu1 %v10325_v50 }
 0x15b   : > { %1647 = vmatprep.mubr.bf16.mxu0 %v11288_v0  ;;  %1700 = vmatprep.mubr.bf16.mxu1 %v11288_v0 }
 0x15c   : > { %1729 = vmatprep.subr.bf16.mxu0 %v10326_v51  ;;  %1782 = vmatprep.subr.bf16.mxu1 %v10328_v52 }
 0x15e   : > { %1730 = vmatpush1.bf16.msra.mxu0 %v10330_v53  ;;  %1783 = vmatpush1.bf16.msra.mxu1 %v10331_v54 }
 0x15f   : > { %1873 = vmatprep.subr.bf16.mxu0 %v11744_v46  ;;  %1926 = vmatprep.subr.bf16.mxu1 %v11746_v47  ;;  %v10388_v46 = vld [vmem:[#allocation8 + $0x2a4] ss:$16 sps:$4 sm:$0xff]   ;;  %v10391_v47 = vld [vmem:[#allocation8 + $0x2ac] ss:$16 sps:$4 sm:$0xff]  }
 0x161   : > { %8977 = vmatmul.mubr.msk.bf16.gmra.mrb[12].mxu0 %vm467_vm0, %v11702_v40  ;;  %8979 = vmatmul.mubr.msk.bf16.gmra.mrb[12].mxu1 %vm467_vm0, %v11702_v40 }
 0x162   : > { %1759 = vmatprep.mubr.bf16.mxu0 %v11288_v0  ;;  %1812 = vmatprep.mubr.bf16.mxu1 %v11288_v0 }
 0x169   : > { %8980 = vmatmul.mubr.msk.bf16.vlgmr.msra.gmra.mrb[16].mxu0 %vm467_vm0, %v11736_v43  ;;  %8982 = vmatmul.mubr.msk.bf16.vlgmr.msra.gmra.mrb[16].mxu1 %vm467_vm0, %v11736_v43 }
 0x16a   : > { %1874 = vmatpush1.bf16.msra.mxu0 %v10324_v49  ;;  %1927 = vmatpush1.bf16.msra.mxu1 %v10325_v50  ;;  %v10386_v49 = vld [vmem:[#allocation8 + $0x2a0] ss:$16 sps:$4 sm:$0xff]   ;;  %v10389_v50 = vld [vmem:[#allocation8 + $0x2a8] ss:$16 sps:$4 sm:$0xff]  }
 0x16b   : > { %1769 = vmatprep.mubr.bf16.mxu0 %v11288_v0  ;;  %1822 = vmatprep.mubr.bf16.mxu1 %v11288_v0 }
 0x16c   : > { %1875 = vmatprep.subr.bf16.mxu0 %v10326_v51  ;;  %1928 = vmatprep.subr.bf16.mxu1 %v10328_v52  ;;  %v11289_v51 = vmov 0.0   ;;  %v10394_v52 = vld [vmem:[#allocation8 + $0x2c4] ss:$16 sps:$4 sm:$0xff]  }
 0x16d   : > { %3371 = vst.msk [vmem:[#allocation2 + $0x20] ss:$8 sm:$0x3] %vm11955_vm1, %v11289_v51  ;;  %3374 = vst.msk [vmem:[#allocation2 + $0x60] ss:$8 sm:$0x3] %vm11955_vm1, %v11289_v51 }
 0x16e   : > { %1876 = vmatpush1.bf16.msra.mxu0 %v10330_v53  ;;  %1929 = vmatpush1.bf16.msra.mxu1 %v10331_v54  ;;  %3319 = vst.msk [vmem:[#allocation2] ss:$8 sm:$0x3] %vm11955_vm1, %v11289_v51  ;;  %3322 = vst.msk [vmem:[#allocation2 + $0x40] ss:$8 sm:$0x3] %vm11955_vm1, %v11289_v51 }
 0x16f   : > { %2044 = vmatprep.subr.bf16.mxu0 %v11812_v55  ;;  %2097 = vmatprep.subr.bf16.mxu1 %v11814_v56  ;;  %3325 = vst.msk [vmem:[#allocation2 + $0x80] ss:$8 sm:$0x3] %vm11955_vm1, %v11289_v51  ;;  %3328 = vst.msk [vmem:[#allocation2 + $0xc0] ss:$8 sm:$0x3] %vm11955_vm1, %v11289_v51 }
 0x170   : > { %3362 = vst [vmem:[#allocation2 + $0x10] sm:$0x3] %v11289_v51  ;;  %3363 = vst [vmem:[#allocation2 + $0x18] sm:$0x3] %v11289_v51  ;;  %v10397_v53 = vld [vmem:[#allocation8 + $0x2cc] ss:$16 sps:$4 sm:$0xff]  }
 0x171   : > { %8981 = vmatmul.mubr.msk.bf16.gmra.mrb[20].mxu0 %vm467_vm0, %v11754_v48  ;;  %8983 = vmatmul.mubr.msk.bf16.gmra.mrb[20].mxu1 %vm467_vm0, %v11754_v48  ;;  %3364 = vst [vmem:[#allocation2 + $0x50] sm:$0x3] %v11289_v51  ;;  %3365 = vst [vmem:[#allocation2 + $0x58] sm:$0x3] %v11289_v51  ;;  %v10392_v54 = vld [vmem:[#allocation8 + $0x2c0] ss:$16 sps:$4 sm:$0xff]  }
 0x172   : > { %1905 = vmatprep.mubr.bf16.mxu0 %v11288_v0  ;;  %1958 = vmatprep.mubr.bf16.mxu1 %v11288_v0  ;;  %3366 = vst [vmem:[#allocation2 + $0x90] sm:$0x3] %v11289_v51  ;;  %3367 = vst [vmem:[#allocation2 + $0x98] sm:$0x3] %v11289_v51 }
 0x173   : > { %3368 = vst [vmem:[#allocation2 + $0xd0] sm:$0x3] %v11289_v51  ;;  %3369 = vst [vmem:[#allocation2 + $0xd8] sm:$0x3] %v11289_v51 }
 0x174   : > { %3377 = vst.msk [vmem:[#allocation2 + $0xa0] ss:$8 sm:$0x3] %vm11955_vm1, %v11289_v51  ;;  %3380 = vst.msk [vmem:[#allocation2 + $0xe0] ss:$8 sm:$0x3] %vm11955_vm1, %v11289_v51 }
 0x175   : > { %3414 = vst [vmem:[#allocation2 + $0x30] sm:$0x3] %v11289_v51  ;;  %3415 = vst [vmem:[#allocation2 + $0x38] sm:$0x3] %v11289_v51 }
 0x176   : > { %3416 = vst [vmem:[#allocation2 + $0x70] sm:$0x3] %v11289_v51  ;;  %3417 = vst [vmem:[#allocation2 + $0x78] sm:$0x3] %v11289_v51 }
 0x177   : > { %3418 = vst [vmem:[#allocation2 + $0xb0] sm:$0x3] %v11289_v51  ;;  %3419 = vst [vmem:[#allocation2 + $0xb8] sm:$0x3] %v11289_v51 }
 0x178   : > { %3420 = vst [vmem:[#allocation2 + $0xf0] sm:$0x3] %v11289_v51  ;;  %3421 = vst [vmem:[#allocation2 + $0xf8] sm:$0x3] %v11289_v51 }
 0x179   : > { %8990 = vmatmul.mubr.msk.bf16.vlgmr.msra.gmra.mrb[24].mxu0 %vm467_vm0, %v11828_v61  ;;  %8992 = vmatmul.mubr.msk.bf16.vlgmr.msra.gmra.mrb[24].mxu1 %vm467_vm0, %v11828_v61 }
 0x17a   : > { %2045 = vmatpush1.bf16.msra.mxu0 %v10336_v59  ;;  %2098 = vmatpush1.bf16.msra.mxu1 %v10337_v60 }
 0x17b   : > { %1915 = vmatprep.mubr.bf16.mxu0 %v11288_v0  ;;  %1968 = vmatprep.mubr.bf16.mxu1 %v11288_v0 }
 0x17c   : > { %2046 = vmatprep.subr.bf16.mxu0 %v10338_v62  ;;  %2099 = vmatprep.subr.bf16.mxu1 %v10340_v63 }
 0x17e   : > { %2047 = vmatpush1.bf16.msra.mxu0 %v10342_v3  ;;  %2100 = vmatpush1.bf16.msra.mxu1 %v10343_v4 }
 0x17f   : > { %2166 = vmatprep.subr.bf16.mxu0 %v11812_v55  ;;  %2219 = vmatprep.subr.bf16.mxu1 %v11814_v56 }
 0x181   : > { %8991 = vmatmul.mubr.msk.bf16.gmra.mrb[28].mxu0 %vm467_vm0, %v11838_v5  ;;  %8993 = vmatmul.mubr.msk.bf16.gmra.mrb[28].mxu1 %vm467_vm0, %v11838_v5 }
 0x182   : > { %2076 = vmatprep.mubr.bf16.mxu0 %v11288_v0  ;;  %2129 = vmatprep.mubr.bf16.mxu1 %v11288_v0 }
 0x189   : > { %9002 = vmatmul.mubr.msk.bf16.vlgmr.msra.gmra.mrb[0].mxu0 %vm467_vm0, %v11688_v37  ;;  %9004 = vmatmul.mubr.msk.bf16.vlgmr.msra.gmra.mrb[0].mxu1 %vm467_vm0, %v11688_v37  ;;  %v10376_v37 = vld [vmem:[#allocation8 + $0x264] ss:$16 sps:$4 sm:$0xff]  }
 0x18a   : > { %2167 = vmatpush1.bf16.msra.mxu0 %v10336_v59  ;;  %2220 = vmatpush1.bf16.msra.mxu1 %v10337_v60 }
 0x18b   : > { %2086 = vmatprep.mubr.bf16.mxu0 %v11288_v0  ;;  %2139 = vmatprep.mubr.bf16.mxu1 %v11288_v0 }
 0x18c   : > { %2168 = vmatprep.subr.bf16.mxu0 %v10338_v62  ;;  %2221 = vmatprep.subr.bf16.mxu1 %v10340_v63 }
 0x18e   : > { %2169 = vmatpush1.bf16.msra.mxu0 %v10342_v3  ;;  %2222 = vmatpush1.bf16.msra.mxu1 %v10343_v4 }
 0x18f   : > { %2288 = vmatprep.subr.bf16.mxu0 %v11812_v55  ;;  %2341 = vmatprep.subr.bf16.mxu1 %v11814_v56 }
 0x191   : > { %9003 = vmatmul.mubr.msk.bf16.gmra.mrb[4].mxu0 %vm467_vm0, %v11702_v40  ;;  %9005 = vmatmul.mubr.msk.bf16.gmra.mrb[4].mxu1 %vm467_vm0, %v11702_v40  ;;  %v10377_v40 = vld [vmem:[#allocation8 + $0x268] ss:$16 sps:$4 sm:$0xff]  }
 0x192   : > { %2198 = vmatprep.mubr.bf16.mxu0 %v11288_v0  ;;  %2251 = vmatprep.mubr.bf16.mxu1 %v11288_v0 }
 0x199   : > { %9006 = vmatmul.mubr.msk.bf16.vlgmr.msra.gmra.mrb[8].mxu0 %vm467_vm0, %v11736_v43  ;;  %9008 = vmatmul.mubr.msk.bf16.vlgmr.msra.gmra.mrb[8].mxu1 %vm467_vm0, %v11736_v43 }
 0x19a   : > { %2289 = vmatpush1.bf16.msra.mxu0 %v10336_v59  ;;  %2342 = vmatpush1.bf16.msra.mxu1 %v10337_v60 }
 0x19b   : > { %2208 = vmatprep.mubr.bf16.mxu0 %v11288_v0  ;;  %2261 = vmatprep.mubr.bf16.mxu1 %v11288_v0 }
 0x19c   : > { %2290 = vmatprep.subr.bf16.mxu0 %v10338_v62  ;;  %2343 = vmatprep.subr.bf16.mxu1 %v10340_v63 }
 0x19e   : > { %2291 = vmatpush1.bf16.msra.mxu0 %v10342_v3  ;;  %2344 = vmatpush1.bf16.msra.mxu1 %v10343_v4 }
 0x19f   : > { %2434 = vmatprep.subr.bf16.mxu0 %v11812_v55  ;;  %2487 = vmatprep.subr.bf16.mxu1 %v11814_v56  ;;  %v10395_v55 = vld [vmem:[#allocation8 + $0x2c8] ss:$16 sps:$4 sm:$0xff]   ;;  %v10400_v56 = vld [vmem:[#allocation8 + $0x2e4] ss:$16 sps:$4 sm:$0xff]  }
 0x1a1   : > { %9007 = vmatmul.mubr.msk.bf16.gmra.mrb[12].mxu0 %vm467_vm0, %v11754_v48  ;;  %9009 = vmatmul.mubr.msk.bf16.gmra.mrb[12].mxu1 %vm467_vm0, %v11754_v48 }
 0x1a2   : > { %2320 = vmatprep.mubr.bf16.mxu0 %v11288_v0  ;;  %2373 = vmatprep.mubr.bf16.mxu1 %v11288_v0 }
 0x1a9   : > { %9010 = vmatmul.mubr.msk.bf16.vlgmr.msra.gmra.mrb[16].mxu0 %vm467_vm0, %v11828_v61  ;;  %9012 = vmatmul.mubr.msk.bf16.vlgmr.msra.gmra.mrb[16].mxu1 %vm467_vm0, %v11828_v61 }
 0x1aa   : > { %2435 = vmatpush1.bf16.msra.mxu0 %v10336_v59  ;;  %2488 = vmatpush1.bf16.msra.mxu1 %v10337_v60  ;;  %v10401_v59 = vld [vmem:[#allocation8 + $0x2e8] ss:$16 sps:$4 sm:$0xff]   ;;  %v10406_v60 = vld [vmem:[#allocation8 + $0x304] ss:$16 sps:$4 sm:$0xff]  }
 0x1ab   : > { %2330 = vmatprep.mubr.bf16.mxu0 %v11288_v0  ;;  %2383 = vmatprep.mubr.bf16.mxu1 %v11288_v0 }
 0x1ac   : > { %2436 = vmatprep.subr.bf16.mxu0 %v10338_v62  ;;  %2489 = vmatprep.subr.bf16.mxu1 %v10340_v63  ;;  %v10404_v62 = vld [vmem:[#allocation8 + $0x300] ss:$16 sps:$4 sm:$0xff]   ;;  %v10407_v63 = vld [vmem:[#allocation8 + $0x308] ss:$16 sps:$4 sm:$0xff]  }
 0x1ae   : > { %2437 = vmatpush1.bf16.msra.mxu0 %v10342_v3  ;;  %2490 = vmatpush1.bf16.msra.mxu1 %v10343_v4  ;;  %v10410_v3 = vld [vmem:[#allocation8 + $0x320] ss:$16 sps:$4 sm:$0xff]   ;;  %v10413_v4 = vld [vmem:[#allocation8 + $0x328] ss:$16 sps:$4 sm:$0xff]  }
 0x1af   : > { %2605 = vmatprep.subr.bf16.mxu0 %v11882_v6  ;;  %2658 = vmatprep.subr.bf16.mxu1 %v11884_v7 }
 0x1b1   : > { %9011 = vmatmul.mubr.msk.bf16.gmra.mrb[20].mxu0 %vm467_vm0, %v11838_v5  ;;  %9013 = vmatmul.mubr.msk.bf16.gmra.mrb[20].mxu1 %vm467_vm0, %v11838_v5 }
 0x1b2   : > { %2466 = vmatprep.mubr.bf16.mxu0 %v11288_v0  ;;  %2519 = vmatprep.mubr.bf16.mxu1 %v11288_v0 }
 0x1b9   : > { %9020 = vmatmul.mubr.msk.bf16.vlgmr.msra.gmra.mrb[24].mxu0 %vm467_vm0, %v9584_v10  ;;  %9022 = vmatmul.mubr.msk.bf16.vlgmr.msra.gmra.mrb[24].mxu1 %vm467_vm0, %v9584_v10 }
 0x1ba   : > { %2606 = vmatpush1.bf16.msra.mxu0 %v10348_v11  ;;  %2659 = vmatpush1.bf16.msra.mxu1 %v10349_v12 }
 0x1bb   : > { %2476 = vmatprep.mubr.bf16.mxu0 %v11288_v0  ;;  %2529 = vmatprep.mubr.bf16.mxu1 %v11288_v0 }
 0x1bc   : > { %2607 = vmatprep.subr.bf16.mxu0 %v10350_v13  ;;  %2660 = vmatprep.subr.bf16.mxu1 %v10352_v14 }
 0x1be   : > { %2608 = vmatpush1.bf16.msra.mxu0 %v10354_v17  ;;  %2661 = vmatpush1.bf16.msra.mxu1 %v10355_v18 }
 0x1bf   : > { %2727 = vmatprep.subr.bf16.mxu0 %v11882_v6  ;;  %2780 = vmatprep.subr.bf16.mxu1 %v11884_v7 }
 0x1c1   : > { %9021 = vmatmul.mubr.msk.bf16.gmra.mrb[28].mxu0 %vm467_vm0, %v9585_v19  ;;  %9023 = vmatmul.mubr.msk.bf16.gmra.mrb[28].mxu1 %vm467_vm0, %v9585_v19 }
 0x1c2   : > { %2637 = vmatprep.mubr.bf16.mxu0 %v11288_v0  ;;  %2690 = vmatprep.mubr.bf16.mxu1 %v11288_v0 }
 0x1c9   : > { %9032 = vmatmul.mubr.msk.bf16.vlgmr.msra.gmra.mrb[0].mxu0 %vm467_vm0, %v11736_v43  ;;  %9034 = vmatmul.mubr.msk.bf16.vlgmr.msra.gmra.mrb[0].mxu1 %vm467_vm0, %v11736_v43  ;;  %v10380_v43 = vld [vmem:[#allocation8 + $0x280] ss:$16 sps:$4 sm:$0xff]  }
 0x1ca   : > { %2728 = vmatpush1.bf16.msra.mxu0 %v10348_v11  ;;  %2781 = vmatpush1.bf16.msra.mxu1 %v10349_v12 }
 0x1cb   : > { %2647 = vmatprep.mubr.bf16.mxu0 %v11288_v0  ;;  %2700 = vmatprep.mubr.bf16.mxu1 %v11288_v0 }
 0x1cc   : > { %2729 = vmatprep.subr.bf16.mxu0 %v10350_v13  ;;  %2782 = vmatprep.subr.bf16.mxu1 %v10352_v14 }
 0x1ce   : > { %2730 = vmatpush1.bf16.msra.mxu0 %v10354_v17  ;;  %2783 = vmatpush1.bf16.msra.mxu1 %v10355_v18 }
 0x1cf   : > { %2849 = vmatprep.subr.bf16.mxu0 %v11882_v6  ;;  %2902 = vmatprep.subr.bf16.mxu1 %v11884_v7 }
 0x1d1   : > { %9033 = vmatmul.mubr.msk.bf16.gmra.mrb[4].mxu0 %vm467_vm0, %v11754_v48  ;;  %9035 = vmatmul.mubr.msk.bf16.gmra.mrb[4].mxu1 %vm467_vm0, %v11754_v48 }
 0x1d2   : > { %2759 = vmatprep.mubr.bf16.mxu0 %v11288_v0  ;;  %2812 = vmatprep.mubr.bf16.mxu1 %v11288_v0 }
 0x1d9   : > { %9036 = vmatmul.mubr.msk.bf16.vlgmr.msra.gmra.mrb[8].mxu0 %vm467_vm0, %v11828_v61  ;;  %9038 = vmatmul.mubr.msk.bf16.vlgmr.msra.gmra.mrb[8].mxu1 %vm467_vm0, %v11828_v61  ;;  %v10409_v61 = vld [vmem:[#allocation8 + $0x30c] ss:$16 sps:$4 sm:$0xff]  }
 0x1da   : > { %2850 = vmatpush1.bf16.msra.mxu0 %v10348_v11  ;;  %2903 = vmatpush1.bf16.msra.mxu1 %v10349_v12 }
 0x1db   : > { %2769 = vmatprep.mubr.bf16.mxu0 %v11288_v0  ;;  %2822 = vmatprep.mubr.bf16.mxu1 %v11288_v0 }
 0x1dc   : > { %2851 = vmatprep.subr.bf16.mxu0 %v10350_v13  ;;  %2904 = vmatprep.subr.bf16.mxu1 %v10352_v14 }
 0x1de   : > { %2852 = vmatpush1.bf16.msra.mxu0 %v10354_v17  ;;  %2905 = vmatpush1.bf16.msra.mxu1 %v10355_v18 }
 0x1df   : > { %2995 = vmatprep.subr.bf16.mxu0 %v11882_v6  ;;  %3048 = vmatprep.subr.bf16.mxu1 %v11884_v7  ;;  %v10421_v6 = vld [vmem:[#allocation8 + $0x34c] ss:$16 sps:$4 sm:$0xff]   ;;  %v10416_v7 = vld [vmem:[#allocation8 + $0x340] ss:$16 sps:$4 sm:$0xff]  }
 0x1e1   : > { %9037 = vmatmul.mubr.msk.bf16.gmra.mrb[12].mxu0 %vm467_vm0, %v11838_v5  ;;  %9039 = vmatmul.mubr.msk.bf16.gmra.mrb[12].mxu1 %vm467_vm0, %v11838_v5  ;;  %v10418_v5 = vld [vmem:[#allocation8 + $0x344] ss:$16 sps:$4 sm:$0xff]  }
 0x1e2   : > { %2881 = vmatprep.mubr.bf16.mxu0 %v11288_v0  ;;  %2934 = vmatprep.mubr.bf16.mxu1 %v11288_v0 }
 0x1e9   : > { %9040 = vmatmul.mubr.msk.bf16.vlgmr.msra.gmra.mrb[16].mxu0 %vm467_vm0, %v9584_v10  ;;  %9042 = vmatmul.mubr.msk.bf16.vlgmr.msra.gmra.mrb[16].mxu1 %vm467_vm0, %v9584_v10  ;;  %v10427_v10 = vld [vmem:[#allocation8 + $0x36c] ss:$16 sps:$4 sm:$0xff]  }
 0x1ea   : > { %2996 = vmatpush1.bf16.msra.mxu0 %v10348_v11  ;;  %3049 = vmatpush1.bf16.msra.mxu1 %v10349_v12  ;;  %v10422_v11 = vld [vmem:[#allocation8 + $0x360] ss:$16 sps:$4 sm:$0xff]   ;;  %v10425_v12 = vld [vmem:[#allocation8 + $0x368] ss:$16 sps:$4 sm:$0xff]  }
 0x1eb   : > { %2891 = vmatprep.mubr.bf16.mxu0 %v11288_v0  ;;  %2944 = vmatprep.mubr.bf16.mxu1 %v11288_v0 }
 0x1ec   : > { %2997 = vmatprep.subr.bf16.mxu0 %v10350_v13  ;;  %3050 = vmatprep.subr.bf16.mxu1 %v10352_v14  ;;  %v10430_v13 = vld [vmem:[#allocation8 + $0x384] ss:$16 sps:$4 sm:$0xff]   ;;  %v10433_v14 = vld [vmem:[#allocation8 + $0x38c] ss:$16 sps:$4 sm:$0xff]  }
 0x1ee   : > { %2998 = vmatpush1.bf16.msra.mxu0 %v10354_v17  ;;  %3051 = vmatpush1.bf16.msra.mxu1 %v10355_v18  ;;  %v10436_v17 = vld [vmem:[#allocation8 + $0x3a4] ss:$16 sps:$4 sm:$0xff]   ;;  %v10439_v18 = vld [vmem:[#allocation8 + $0x3ac] ss:$16 sps:$4 sm:$0xff]  }
 0x1ef   : > { %4058 = vmatprep.subr.bf16.mxu0 %v10358_v26  ;;  %4111 = vmatprep.subr.bf16.mxu1 %v10361_v27  ;;  %v10451_v26 = vld [vmem:[#allocation8 + $0x3ec] ss:$16 sps:$4 sm:$0xff]   ;;  %v10446_v27 = vld [vmem:[#allocation8 + $0x3e0] ss:$16 sps:$4 sm:$0xff]  }
 0x1f1   : > { %9041 = vmatmul.mubr.msk.bf16.gmra.mrb[20].mxu0 %vm467_vm0, %v9585_v19  ;;  %9043 = vmatmul.mubr.msk.bf16.gmra.mrb[20].mxu1 %vm467_vm0, %v9585_v19  ;;  %v10434_v19 = vld [vmem:[#allocation8 + $0x3a0] ss:$16 sps:$4 sm:$0xff]  }
 0x1f2   : > { %3027 = vmatprep.mubr.bf16.mxu0 %v11288_v0  ;;  %3080 = vmatprep.mubr.bf16.mxu1 %v11288_v0 }
 0x1f9   : > { %9050 = vmatmul.mubr.msk.bf16.vlgmr.msra.gmra.mrb[24].mxu0 %vm467_vm0, %v9586_v22  ;;  %9052 = vmatmul.mubr.msk.bf16.vlgmr.msra.gmra.mrb[24].mxu1 %vm467_vm0, %v9586_v22  ;;  %v10445_v22 = vld [vmem:[#allocation8 + $0x3cc] ss:$16 sps:$4 sm:$0xff]  }
 0x1fa   : > { %3037 = vmatprep.mubr.bf16.mxu0 %v11288_v0  ;;  %3090 = vmatprep.mubr.bf16.mxu1 %v11288_v0  ;;  %v10370_v0 = vld [vmem:[#allocation8 + $0x244] ss:$16 sps:$4 sm:$0xff]  }
 0x1fb   : > { %4059 = vmatpush1.bf16.msra.mxu0 %v10356_v28  ;;  %4112 = vmatpush1.bf16.msra.mxu1 %v10359_v29  ;;  %v10449_v28 = vld [vmem:[#allocation8 + $0x3e8] ss:$16 sps:$4 sm:$0xff]   ;;  %v10454_v29 = vld [vmem:[#allocation8 + $0x4] ss:$16 sps:$4 sm:$0xff]  }
 0x1fc   : > { %4060 = vmatprep.subr.bf16.mxu0 %v10364_v30  ;;  %4113 = vmatprep.subr.bf16.mxu1 %v10367_v31  ;;  %v10457_v30 = vld [vmem:[#allocation8 + $0xc] ss:$16 sps:$4 sm:$0xff]   ;;  %v11976_v31 = vshrl.u32 %v3119_v45, 7 }
 0x1fe   : > { %13639 = vst [vmem:[#allocation23_spill] sm:$0xff] %v11976_v31 }
 0x1ff   : > { %4061 = vmatpush1.bf16.msra.mxu0 %v10362_v32  ;;  %4114 = vmatpush1.bf16.msra.mxu1 %v10365_v33 }
 0x200   : > { %4062 = vmatprep.subr.bf16.mxu0 %v10370_v0  ;;  %4115 = vmatprep.subr.bf16.mxu1 %v10373_v34 }
 0x201   : > { %9051 = vmatmul.mubr.msk.bf16.gmra.mrb[28].mxu0 %vm467_vm0, %v9587_v25  ;;  %9053 = vmatmul.mubr.msk.bf16.gmra.mrb[28].mxu1 %vm467_vm0, %v9587_v25  ;;  %v10448_v25 = vld [vmem:[#allocation8 + $0x3e4] ss:$16 sps:$4 sm:$0xff]  }
 0x203   : > { %4063 = vmatpush1.bf16.msra.mxu0 %v10368_v35  ;;  %4116 = vmatpush1.bf16.msra.mxu1 %v10371_v36  ;;  %v13526_v35 = vsub.s32 0, %v11976_v31  ;;  %v13525_v36 = vsub.s32 2, %v11976_v31 }
 0x204   : > { %4064 = vmatprep.subr.bf16.mxu0 %v10376_v37  ;;  %4117 = vmatprep.subr.bf16.mxu1 %v10379_v38  ;;  %v13524_v37 = vsub.s32 1, %v11976_v31  ;;  %v13523_v38 = vsub.s32 3, %v11976_v31  ;;  %v12302_v31 = vld [vmem:[#allocation8 + $0x1c4] ss:$16 sps:$4 sm:$0xff]  }
 0x205   : > { %13659 = vst [vmem:[#allocation43_spill] sm:$0xff] %v12302_v31 }
 0x207   : > { %4065 = vmatpush1.bf16.msra.mxu0 %v10374_v39  ;;  %4118 = vmatpush1.bf16.msra.mxu1 %v10377_v40 }
 0x208   : > { %4066 = vmatprep.subr.bf16.mxu0 %v10382_v41  ;;  %4119 = vmatprep.subr.bf16.mxu1 %v10385_v42  ;;  %v3117_v41 = vld [vmem:[#allocation6] sm:$0xf] }
 0x209   : > { %v11988_v45 = vrot.slane %v3117_v41, %v13525_v36  ;;  %v12296_v36 = vld [vmem:[#allocation8 + $0x1a0] ss:$16 sps:$4 sm:$0xff]  }
 0x20a   : > { %13657 = vst [vmem:[#allocation41_spill] sm:$0xff] %v12296_v36 }
 0x20b   : > { %4067 = vmatpush1.bf16.msra.mxu0 %v10380_v43  ;;  %4120 = vmatpush1.bf16.msra.mxu1 %v10383_v44  ;;  %v11984_v44 = vrot.slane %v3117_v41, %v13526_v35  ;;  %v12298_v35 = vld [vmem:[#allocation8 + $0x1a8] ss:$16 sps:$4 sm:$0xff]  }
 0x20c   : > { %4068 = vmatprep.subr.bf16.mxu0 %v10388_v46  ;;  %4121 = vmatprep.subr.bf16.mxu1 %v10391_v47  ;;  %v11992_v46 = vrot.slane %v3117_v41, %v13524_v37  ;;  %v11996_v47 = vrot.slane %v3117_v41, %v13523_v38  ;;  %13658 = vst [vmem:[#allocation42_spill] sm:$0xff] %v12298_v35 }
 0x20f   : > { %4069 = vmatpush1.bf16.msra.mxu0 %v10386_v49  ;;  %4122 = vmatpush1.bf16.msra.mxu1 %v10389_v50 }
 0x210   : > { %4070 = vmatprep.subr.bf16.mxu0 %v10394_v52  ;;  %4123 = vmatprep.subr.bf16.mxu1 %v10397_v53 }
 0x213   : > { %4071 = vmatpush1.bf16.msra.mxu0 %v10392_v54  ;;  %4124 = vmatpush1.bf16.msra.mxu1 %v10395_v55 }
 0x214   : > { %4072 = vmatprep.subr.bf16.mxu0 %v10400_v56  ;;  %4125 = vmatprep.subr.bf16.mxu1 %v10403_v57 }
 0x217   : > { %4073 = vmatpush1.bf16.msra.mxu0 %v10398_v58  ;;  %4126 = vmatpush1.bf16.msra.mxu1 %v10401_v59 }
 0x218   : > { %4074 = vmatprep.subr.bf16.mxu0 %v10406_v60  ;;  %4127 = vmatprep.subr.bf16.mxu1 %v10409_v61 }
 0x21b   : > { %4075 = vmatpush1.bf16.msra.mxu0 %v10404_v62  ;;  %4128 = vmatpush1.bf16.msra.mxu1 %v10407_v63 }
 0x21c   : > { %4076 = vmatprep.subr.bf16.mxu0 %v10412_v1  ;;  %4129 = vmatprep.subr.bf16.mxu1 %v10415_v2 }
 0x21f   : > { %4077 = vmatpush1.bf16.msra.mxu0 %v10410_v3  ;;  %4130 = vmatpush1.bf16.msra.mxu1 %v10413_v4 }
 0x220   : > { %4078 = vmatprep.subr.bf16.mxu0 %v10418_v5  ;;  %4131 = vmatprep.subr.bf16.mxu1 %v10421_v6 }
 0x223   : > { %4079 = vmatpush1.bf16.msra.mxu0 %v10416_v7  ;;  %4132 = vmatpush1.bf16.msra.mxu1 %v10419_v8 }
 0x224   : > { %4080 = vmatprep.subr.bf16.mxu0 %v10424_v9  ;;  %4133 = vmatprep.subr.bf16.mxu1 %v10427_v10 }
 0x227   : > { %4081 = vmatpush1.bf16.msra.mxu0 %v10422_v11  ;;  %4134 = vmatpush1.bf16.msra.mxu1 %v10425_v12 }
 0x228   : > { %4082 = vmatprep.subr.bf16.mxu0 %v10430_v13  ;;  %4135 = vmatprep.subr.bf16.mxu1 %v10433_v14 }
 0x22b   : > { %4083 = vmatpush1.bf16.msra.mxu0 %v10428_v15  ;;  %4136 = vmatpush1.bf16.msra.mxu1 %v10431_v16 }
 0x22c   : > { %4084 = vmatprep.subr.bf16.mxu0 %v10436_v17  ;;  %4137 = vmatprep.subr.bf16.mxu1 %v10439_v18 }
 0x22f   : > { %4085 = vmatpush1.bf16.msra.mxu0 %v10434_v19  ;;  %4138 = vmatpush1.bf16.msra.mxu1 %v10437_v20 }
 0x230   : > { %4086 = vmatprep.subr.bf16.mxu0 %v10442_v21  ;;  %4139 = vmatprep.subr.bf16.mxu1 %v10445_v22 }
 0x233   : > { %4087 = vmatpush1.bf16.msra.mxu0 %v10440_v23  ;;  %4140 = vmatpush1.bf16.msra.mxu1 %v10443_v24 }
 0x234   : > { %4088 = vmatprep.subr.bf16.mxu0 %v10448_v25  ;;  %4141 = vmatprep.subr.bf16.mxu1 %v10451_v26 }
 0x237   : > { %4089 = vmatpush1.bf16.msra.mxu0 %v10446_v27  ;;  %4142 = vmatpush1.bf16.msra.mxu1 %v10449_v28 }
 0x238   : > { %4492 = vmatprep.subr.bf16.mxu0 %v10454_v29  ;;  %4545 = vmatprep.subr.bf16.mxu1 %v10457_v30 }
 0x29c   : > { %v2639_v32 = vpop.f32.mrb[0].mxu0  ;;  %v2692_v33 = vpop.f32.mrb[0].mxu1 }
 0x29d   : > { %v2641_v0 = vpop.f32.mrb[1].mxu0  ;;  %v2694_v34 = vpop.f32.mrb[1].mxu1  ;;  %v3139_v52 = vadd.f32 %v11984_v44, %v2639_v32  ;;  %v3141_v53 = vadd.f32 %v11988_v45, %v2692_v33 }
 0x29e   : > { %v2643_v39 = vpop.f32.mrb[2].mxu0  ;;  %v2696_v40 = vpop.f32.mrb[2].mxu1  ;;  %v3140_v54 = vadd.f32 %v11992_v46, %v2641_v0  ;;  %v3142_v55 = vadd.f32 %v11996_v47, %v2694_v34 }
 0x29f   : > { %v2645_v42 = vpop.f32.mrb[3].mxu0  ;;  %v2698_v43 = vpop.f32.mrb[3].mxu1  ;;  %v3143_v58 = vadd.f32 %v11984_v44, %v2643_v39  ;;  %v3145_v59 = vadd.f32 %v11988_v45, %v2696_v40  ;;  %v3155_v5 = vmax.f32 %v3139_v52, 0.0  ;;  %v3157_v6 = vmax.f32 %v3141_v53, 0.0 }
 0x2a0   : > { %v3144_v60 = vadd.f32 %v11992_v46, %v2645_v42  ;;  %v3146_v61 = vadd.f32 %v11996_v47, %v2698_v43  ;;  %v3156_v7 = vmax.f32 %v3140_v54, 0.0  ;;  %v3158_v8 = vmax.f32 %v3142_v55, 0.0 }
 0x2a1   : > { %v3159_v9 = vmax.f32 %v3143_v58, 0.0  ;;  %v3161_v10 = vmax.f32 %v3145_v59, 0.0 }
 0x2a2   : > { %v3160_v11 = vmax.f32 %v3144_v60, 0.0  ;;  %v3162_v12 = vmax.f32 %v3146_v61, 0.0 }
 0x2a4   : > { %v2649_v48 = vpop.f32.mrb[4].mxu0  ;;  %v2702_v49 = vpop.f32.mrb[4].mxu1 }
 0x2a5   : > { %v2651_v50 = vpop.f32.mrb[5].mxu0  ;;  %v2704_v51 = vpop.f32.mrb[5].mxu1  ;;  %v12007_v1 = vadd.f32 %v11984_v44, %v2649_v48  ;;  %v12010_v2 = vadd.f32 %v11988_v45, %v2702_v49 }
 0x2a6   : > { %v2653_v56 = vpop.f32.mrb[6].mxu0  ;;  %v2706_v57 = vpop.f32.mrb[6].mxu1  ;;  %v12013_v3 = vadd.f32 %v11992_v46, %v2651_v50  ;;  %v12016_v4 = vadd.f32 %v11996_v47, %v2704_v51 }
 0x2a7   : > { %v2655_v62 = vpop.f32.mrb[7].mxu0  ;;  %v2708_v63 = vpop.f32.mrb[7].mxu1  ;;  %v3163_v13 = vmax.f32 %v12007_v1, 0.0  ;;  %v3165_v14 = vmax.f32 %v12010_v2, 0.0  ;;  %v12021_v15 = vadd.f32 %v11984_v44, %v2653_v56  ;;  %v12024_v16 = vadd.f32 %v11988_v45, %v2706_v57 }
 0x2a8   : > { %v3164_v19 = vmax.f32 %v12013_v3, 0.0  ;;  %v3166_v20 = vmax.f32 %v12016_v4, 0.0  ;;  %v12031_v25 = vadd.f32 %v11992_v46, %v2655_v62  ;;  %v12034_v26 = vadd.f32 %v11996_v47, %v2708_v63 }
 0x2a9   : > { %v3167_v57 = vmax.f32 %v12021_v15, 0.0  ;;  %v3169_v61 = vmax.f32 %v12024_v16, 0.0 }
 0x2aa   : > { %v3170_v2 = vmax.f32 %v12034_v26, 0.0 }
 0x2ac   : > { %v2761_v17 = vpop.f32.mrb[8].mxu0  ;;  %v2814_v18 = vpop.f32.mrb[8].mxu1 }
 0x2ad   : > { %v3171_v21 = vadd.f32 %v11984_v44, %v2761_v17  ;;  %v3173_v22 = vadd.f32 %v11988_v45, %v2814_v18  ;;  %v2763_v23 = vpop.f32.mrb[9].mxu0  ;;  %v2816_v24 = vpop.f32.mrb[9].mxu1 }
 0x2ae   : > { %v3172_v27 = vadd.f32 %v11992_v46, %v2763_v23  ;;  %v3174_v28 = vadd.f32 %v11996_v47, %v2816_v24  ;;  %v2765_v29 = vpop.f32.mrb[10].mxu0  ;;  %v2818_v30 = vpop.f32.mrb[10].mxu1 }
 0x2af   : > { %v3187_v32 = vmax.f32 %v3171_v21, 0.0  ;;  %v3189_v33 = vmax.f32 %v3173_v22, 0.0  ;;  %v3175_v0 = vadd.f32 %v11984_v44, %v2765_v29  ;;  %v3177_v34 = vadd.f32 %v11988_v45, %v2818_v30  ;;  %v2767_v39 = vpop.f32.mrb[11].mxu0  ;;  %v2820_v40 = vpop.f32.mrb[11].mxu1 }
 0x2b0   : > { %v3188_v41 = vmax.f32 %v3172_v27, 0.0  ;;  %v3190_v42 = vmax.f32 %v3174_v28, 0.0  ;;  %v3176_v43 = vadd.f32 %v11992_v46, %v2767_v39  ;;  %v3178_v48 = vadd.f32 %v11996_v47, %v2820_v40 }
 0x2b1   : > { %v3267_v49 = vmax.f32 %v3155_v5, %v3187_v32  ;;  %v3269_v50 = vmax.f32 %v3157_v6, %v3189_v33  ;;  %v3191_v51 = vmax.f32 %v3175_v0, 0.0  ;;  %v3193_v52 = vmax.f32 %v3177_v34, 0.0 }
 0x2b2   : > { %v3268_v53 = vmax.f32 %v3156_v7, %v3188_v41  ;;  %v3270_v54 = vmax.f32 %v3158_v8, %v3190_v42  ;;  %v3192_v55 = vmax.f32 %v3176_v43, 0.0  ;;  %v3194_v56 = vmax.f32 %v3178_v48, 0.0 }
 0x2b3   : > { %v3299_v58 = vmax.f32 %v3267_v49, %v3269_v50  ;;  %v3271_v59 = vmax.f32 %v3159_v9, %v3191_v51  ;;  %v3273_v60 = vmax.f32 %v3161_v10, %v3193_v52  ;;  %v3168_v52 = vmax.f32 %v12031_v25, 0.0 }
 0x2b4   : > { %v3300_v62 = vmax.f32 %v3268_v53, %v3270_v54  ;;  %v3272_v63 = vmax.f32 %v3160_v11, %v3192_v55  ;;  %v3274_v17 = vmax.f32 %v3162_v12, %v3194_v56  ;;  %v2771_v18 = vpop.f32.mrb[12].mxu0  ;;  %v2824_v21 = vpop.f32.mrb[12].mxu1 }
 0x2b5   : > { %v3338_v5 = vrot.slane %v3299_v58, 7  ;;  %v3301_v6 = vmax.f32 %v3271_v59, %v3273_v60  ;;  %v3179_v22 = vadd.f32 %v11984_v44, %v2771_v18  ;;  %v3181_v7 = vadd.f32 %v11988_v45, %v2824_v21  ;;  %v2773_v8 = vpop.f32.mrb[13].mxu0  ;;  %v2826_v23 = vpop.f32.mrb[13].mxu1 }
 0x2b6   : > { %v3339_v24 = vrot.slane %v3300_v62, 7  ;;  %v3302_v15 = vmax.f32 %v3272_v63, %v3274_v17  ;;  %v3180_v9 = vadd.f32 %v11992_v46, %v2773_v8  ;;  %v3182_v10 = vadd.f32 %v11996_v47, %v2826_v23  ;;  %v2775_v16 = vpop.f32.mrb[14].mxu0  ;;  %v2828_v27 = vpop.f32.mrb[14].mxu1 }
 0x2b7   : > { %3354 = vst [vmem:[#allocation2] sm:$0xfe] %v3338_v5  ;;  %v3340_v11 = vrot.slane %v3301_v6, 7  ;;  %v3195_v12 = vmax.f32 %v3179_v22, 0.0  ;;  %v3197_v28 = vmax.f32 %v3181_v7, 0.0  ;;  %v3183_v29 = vadd.f32 %v11984_v44, %v2775_v16  ;;  %v2777_v30 = vpop.f32.mrb[15].mxu0 }
 0x2b8   : > { %v2830_v32 = vpop.f32.mrb[15].mxu1  ;;  %3355 = vst [vmem:[#allocation2 + $0x8] sm:$0xfe] %v3339_v24  ;;  %v3341_v33 = vrot.slane %v3302_v15, 7  ;;  %v3196_v0 = vmax.f32 %v3180_v9, 0.0  ;;  %v3198_v34 = vmax.f32 %v3182_v10, 0.0  ;;  %v3185_v39 = vadd.f32 %v11988_v45, %v2828_v27 }
 0x2b9   : > { %3356 = vst [vmem:[#allocation2 + $0x40] sm:$0xfe] %v3340_v11  ;;  %v3275_v40 = vmax.f32 %v3163_v13, %v3195_v12  ;;  %v3277_v41 = vmax.f32 %v3165_v14, %v3197_v28  ;;  %v3199_v42 = vmax.f32 %v3183_v29, 0.0  ;;  %v3184_v43 = vadd.f32 %v11992_v46, %v2777_v30 }
 0x2ba   : > { %3357 = vst [vmem:[#allocation2 + $0x48] sm:$0xfe] %v3341_v33  ;;  %v3276_v48 = vmax.f32 %v3164_v19, %v3196_v0  ;;  %v3278_v49 = vmax.f32 %v3166_v20, %v3198_v34  ;;  %v3201_v50 = vmax.f32 %v3185_v39, 0.0  ;;  %v3186_v51 = vadd.f32 %v11996_v47, %v2830_v32 }
 0x2bb   : > { %v3303_v1 = vmax.f32 %v3275_v40, %v3277_v41  ;;  %v3279_v13 = vmax.f32 %v3167_v57, %v3199_v42  ;;  %v3200_v53 = vmax.f32 %v3184_v43, 0.0 }
 0x2bc   : > { %v3304_v14 = vmax.f32 %v3276_v48, %v3278_v49  ;;  %v3281_v54 = vmax.f32 %v3169_v61, %v3201_v50  ;;  %v3202_v55 = vmax.f32 %v3186_v51, 0.0  ;;  %v2883_v56 = vpop.f32.mrb[16].mxu0  ;;  %v2936_v58 = vpop.f32.mrb[16].mxu1 }
 0x2bd   : > { %v3342_v3 = vrot.slane %v3303_v1, 7  ;;  %v3280_v19 = vmax.f32 %v3168_v52, %v3200_v53  ;;  %v2885_v59 = vpop.f32.mrb[17].mxu0  ;;  %v2938_v4 = vpop.f32.mrb[17].mxu1  ;;  %v3203_v7 = vadd.f32 %v11984_v44, %v2883_v56  ;;  %v3205_v8 = vadd.f32 %v11988_v45, %v2936_v58 }
 0x2be   : > { %v3343_v20 = vrot.slane %v3304_v14, 7  ;;  %v3305_v60 = vmax.f32 %v3279_v13, %v3281_v54  ;;  %v3282_v62 = vmax.f32 %v3170_v2, %v3202_v55  ;;  %v2887_v63 = vpop.f32.mrb[18].mxu0  ;;  %v2940_v17 = vpop.f32.mrb[18].mxu1  ;;  %v3204_v23 = vadd.f32 %v11992_v46, %v2885_v59 }
 0x2bf   : > { %3358 = vst [vmem:[#allocation2 + $0x80] sm:$0xfe] %v3342_v3  ;;  %v2889_v25 = vpop.f32.mrb[19].mxu0  ;;  %v2942_v57 = vpop.f32.mrb[19].mxu1  ;;  %v3206_v24 = vadd.f32 %v11996_v47, %v2938_v4  ;;  %v3207_v10 = vadd.f32 %v11984_v44, %v2887_v63  ;;  %v3209_v16 = vadd.f32 %v11988_v45, %v2940_v17  ;;  %v3219_v0 = vmax.f32 %v3203_v7, 0.0 }
 0x2c0   : > { %3359 = vst [vmem:[#allocation2 + $0x88] sm:$0xfe] %v3343_v20  ;;  %v3344_v18 = vrot.slane %v3305_v60, 7  ;;  %v3306_v26 = vmax.f32 %v3280_v19, %v3282_v62  ;;  %v3208_v27 = vadd.f32 %v11992_v46, %v2889_v25  ;;  %v3210_v11 = vadd.f32 %v11996_v47, %v2942_v57  ;;  %v3616_v38 = vld [vmem:[#allocation2 + $0x8] sm:$0xfe] }
 0x2c1   : > { %v3221_v34 = vmax.f32 %v3205_v8, 0.0  ;;  %v3220_v39 = vmax.f32 %v3204_v23, 0.0  ;;  %v3222_v40 = vmax.f32 %v3206_v24, 0.0  ;;  %v3223_v41 = vmax.f32 %v3207_v10, 0.0 }
 0x2c2   : > { %3360 = vst [vmem:[#allocation2 + $0xc0] sm:$0xfe] %v3344_v18  ;;  %v3345_v61 = vrot.slane %v3306_v26, 7  ;;  %v3225_v42 = vmax.f32 %v3209_v16, 0.0  ;;  %v3224_v43 = vmax.f32 %v3208_v27, 0.0  ;;  %v3226_v48 = vmax.f32 %v3210_v11, 0.0 }
 0x2c4   : > { %3361 = vst [vmem:[#allocation2 + $0xc8] sm:$0xfe] %v3345_v61  ;;  %v2893_v21 = vpop.f32.mrb[20].mxu0  ;;  %v2946_v5 = vpop.f32.mrb[20].mxu1 }
 0x2c5   : > { %v2895_v6 = vpop.f32.mrb[21].mxu0  ;;  %v2948_v22 = vpop.f32.mrb[21].mxu1  ;;  %v12071_v29 = vadd.f32 %v11984_v44, %v2893_v21  ;;  %v12074_v30 = vadd.f32 %v11988_v45, %v2946_v5 }
 0x2c6   : > { %v2897_v15 = vpop.f32.mrb[22].mxu0  ;;  %v2950_v9 = vpop.f32.mrb[22].mxu1  ;;  %v12077_v32 = vadd.f32 %v11992_v46, %v2895_v6  ;;  %v12080_v33 = vadd.f32 %v11996_v47, %v2948_v22 }
 0x2c7   : > { %v2899_v12 = vpop.f32.mrb[23].mxu0  ;;  %v2952_v28 = vpop.f32.mrb[23].mxu1  ;;  %v3227_v49 = vmax.f32 %v12071_v29, 0.0  ;;  %v3229_v50 = vmax.f32 %v12074_v30, 0.0  ;;  %v12085_v51 = vadd.f32 %v11984_v44, %v2897_v15  ;;  %v12088_v52 = vadd.f32 %v11988_v45, %v2950_v9 }
 0x2c8   : > { %v3228_v53 = vmax.f32 %v12077_v32, 0.0  ;;  %v3230_v2 = vmax.f32 %v12080_v33, 0.0  ;;  %v12095_v58 = vadd.f32 %v11992_v46, %v2899_v12  ;;  %v12098_v3 = vadd.f32 %v11996_v47, %v2952_v28 }
 0x2c9   : > { %v3231_v9 = vmax.f32 %v12085_v51, 0.0  ;;  %v3233_v11 = vmax.f32 %v12088_v52, 0.0 }
 0x2ca   : > { %v3234_v30 = vmax.f32 %v12098_v3, 0.0  ;;  %v12128_v3 = vld [vmem:[#allocation8] ss:$16 sps:$4 sm:$0xff]  }
 0x2cc   : > { %v3029_v1 = vpop.f32.mrb[24].mxu0  ;;  %v3082_v13 = vpop.f32.mrb[24].mxu1 }
 0x2cd   : > { %v3235_v14 = vadd.f32 %v11984_v44, %v3029_v1  ;;  %v3237_v54 = vadd.f32 %v11988_v45, %v3082_v13  ;;  %v3031_v55 = vpop.f32.mrb[25].mxu0  ;;  %v3084_v56 = vpop.f32.mrb[25].mxu1 }
 0x2ce   : > { %v3236_v19 = vadd.f32 %v11992_v46, %v3031_v55  ;;  %v3238_v59 = vadd.f32 %v11996_v47, %v3084_v56  ;;  %v3033_v4 = vpop.f32.mrb[26].mxu0  ;;  %v3086_v20 = vpop.f32.mrb[26].mxu1 }
 0x2cf   : > { %v3251_v60 = vmax.f32 %v3235_v14, 0.0  ;;  %v3253_v62 = vmax.f32 %v3237_v54, 0.0  ;;  %v3239_v63 = vadd.f32 %v11984_v44, %v3033_v4  ;;  %v3241_v17 = vadd.f32 %v11988_v45, %v3086_v20  ;;  %v3035_v25 = vpop.f32.mrb[27].mxu0  ;;  %v3088_v57 = vpop.f32.mrb[27].mxu1 }
 0x2d0   : > { %v3252_v18 = vmax.f32 %v3236_v19, 0.0  ;;  %v3254_v26 = vmax.f32 %v3238_v59, 0.0  ;;  %v3240_v61 = vadd.f32 %v11992_v46, %v3035_v25  ;;  %v3242_v21 = vadd.f32 %v11996_v47, %v3088_v57 }
 0x2d1   : > { %v3283_v5 = vmax.f32 %v3219_v0, %v3251_v60  ;;  %v3285_v6 = vmax.f32 %v3221_v34, %v3253_v62  ;;  %v3255_v22 = vmax.f32 %v3239_v63, 0.0  ;;  %v3257_v7 = vmax.f32 %v3241_v17, 0.0 }
 0x2d2   : > { %v3284_v8 = vmax.f32 %v3220_v39, %v3252_v18  ;;  %v3286_v23 = vmax.f32 %v3222_v40, %v3254_v26  ;;  %v3256_v24 = vmax.f32 %v3240_v61, 0.0  ;;  %v3258_v15 = vmax.f32 %v3242_v21, 0.0 }
 0x2d3   : > { %v3307_v10 = vmax.f32 %v3283_v5, %v3285_v6  ;;  %v3287_v16 = vmax.f32 %v3223_v41, %v3255_v22  ;;  %v3289_v27 = vmax.f32 %v3225_v42, %v3257_v7  ;;  %v3232_v6 = vmax.f32 %v12095_v58, 0.0 }
 0x2d4   : > { %v3308_v12 = vmax.f32 %v3284_v8, %v3286_v23  ;;  %v3288_v28 = vmax.f32 %v3224_v43, %v3256_v24  ;;  %v3290_v1 = vmax.f32 %v3226_v48, %v3258_v15  ;;  %v3039_v13 = vpop.f32.mrb[28].mxu0  ;;  %v3092_v14 = vpop.f32.mrb[28].mxu1 }
 0x2d5   : > { %v3390_v0 = vrot.slane %v3307_v10, 7  ;;  %v3309_v34 = vmax.f32 %v3287_v16, %v3289_v27  ;;  %v3243_v54 = vadd.f32 %v11984_v44, %v3039_v13  ;;  %v3245_v39 = vadd.f32 %v11988_v45, %v3092_v14  ;;  %v3041_v40 = vpop.f32.mrb[29].mxu0  ;;  %v3094_v55 = vpop.f32.mrb[29].mxu1  ;;  %v12130_v16 = vld [vmem:[#allocation8 + $0x8] ss:$16 sps:$4 sm:$0xff]  }
 0x2d6   : > { %v3391_v56 = vrot.slane %v3308_v12, 7  ;;  %v3310_v51 = vmax.f32 %v3288_v28, %v3290_v1  ;;  %v3244_v41 = vadd.f32 %v11992_v46, %v3041_v40  ;;  %v3246_v42 = vadd.f32 %v11996_v47, %v3094_v55  ;;  %v3043_v52 = vpop.f32.mrb[30].mxu0  ;;  %v3096_v19 = vpop.f32.mrb[30].mxu1  ;;  %v12134_v12 = vld [vmem:[#allocation8 + $0x24] ss:$16 sps:$4 sm:$0xff]  }
 0x2d7   : > { %3406 = vst [vmem:[#allocation2 + $0x20] sm:$0xfe] %v3390_v0  ;;  %v3392_v43 = vrot.slane %v3309_v34, 7  ;;  %v3259_v48 = vmax.f32 %v3243_v54, 0.0  ;;  %v3261_v59 = vmax.f32 %v3245_v39, 0.0  ;;  %v3247_v4 = vadd.f32 %v11984_v44, %v3043_v52  ;;  %v3045_v20 = vpop.f32.mrb[31].mxu0 }
 0x2d8   : > { %v3098_v60 = vpop.f32.mrb[31].mxu1  ;;  %3407 = vst [vmem:[#allocation2 + $0x28] sm:$0xfe] %v3391_v56  ;;  %v3393_v62 = vrot.slane %v3310_v51, 7  ;;  %v3260_v63 = vmax.f32 %v3244_v41, 0.0  ;;  %v3262_v17 = vmax.f32 %v3246_v42, 0.0  ;;  %v3249_v25 = vadd.f32 %v11988_v45, %v3096_v19 }
 0x2d9   : > { %3408 = vst [vmem:[#allocation2 + $0x60] sm:$0xfe] %v3392_v43  ;;  %v3291_v57 = vmax.f32 %v3227_v49, %v3259_v48  ;;  %v3293_v18 = vmax.f32 %v3229_v50, %v3261_v59  ;;  %v3263_v26 = vmax.f32 %v3247_v4, 0.0  ;;  %v3248_v61 = vadd.f32 %v11992_v46, %v3045_v20  ;;  %v12136_v28 = vld [vmem:[#allocation8 + $0x2c] ss:$16 sps:$4 sm:$0xff]   ;;  %v3489_v41 = vld [vmem:[#allocation2 + $0x48] sm:$0xff] }
 0x2da   : > { %3409 = vst [vmem:[#allocation2 + $0x68] sm:$0xfe] %v3393_v62  ;;  %v3292_v44 = vmax.f32 %v3228_v53, %v3260_v63  ;;  %v3294_v21 = vmax.f32 %v3230_v2, %v3262_v17  ;;  %v3265_v5 = vmax.f32 %v3249_v25, 0.0  ;;  %v3250_v45 = vadd.f32 %v11996_v47, %v3098_v60  ;;  %v12144_v1 = vld [vmem:[#allocation8 + $0x20] ss:$16 sps:$4 sm:$0xff]   ;;  %v3487_v52 = vld [vmem:[#allocation2 + $0x8] sm:$0xff] }
 0x2db   : > { %v3311_v29 = vmax.f32 %v3291_v57, %v3293_v18  ;;  %v3295_v49 = vmax.f32 %v3231_v9, %v3263_v26  ;;  %v3264_v22 = vmax.f32 %v3248_v61, 0.0  ;;  %v12146_v13 = vld [vmem:[#allocation8 + $0x28] ss:$16 sps:$4 sm:$0xff]   ;;  %v12150_v14 = vld [vmem:[#allocation8 + $0x44] ss:$16 sps:$4 sm:$0xff]   ;;  %v9601_v48 = vpack.c.bf16 %v3489_v41, %v3487_v52 }
 0x2dc   : > { %v3312_v50 = vmax.f32 %v3292_v44, %v3294_v21  ;;  %v3297_v7 = vmax.f32 %v3233_v11, %v3265_v5  ;;  %v3266_v46 = vmax.f32 %v3250_v45, 0.0  ;;  %v12152_v0 = vld [vmem:[#allocation8 + $0x4c] ss:$16 sps:$4 sm:$0xff]   ;;  %v12156_v40 = vld [vmem:[#allocation8 + $0x40] ss:$16 sps:$4 sm:$0xff]  }
 0x2dd   : > { %v3394_v8 = vrot.slane %v3311_v29, 7  ;;  %v3296_v23 = vmax.f32 %v3232_v6, %v3264_v22  ;;  %v12162_v56 = vld [vmem:[#allocation8 + $0x48] ss:$16 sps:$4 sm:$0xff]   ;;  %v12168_v19 = vld [vmem:[#allocation8 + $0x64] ss:$16 sps:$4 sm:$0xff]  }
 0x2de   : > { %v3395_v32 = vrot.slane %v3312_v50, 7  ;;  %v3313_v53 = vmax.f32 %v3295_v49, %v3297_v7  ;;  %v3298_v24 = vmax.f32 %v3234_v30, %v3266_v46  ;;  %v3494_v27 = vld [vmem:[#allocation2 + $0x20] sm:$0xff]  ;;  %v12178_v4 = vld [vmem:[#allocation8 + $0x68] ss:$16 sps:$4 sm:$0xff]   ;;  %v12180_v20 = vld [vmem:[#allocation8 + $0x84] ss:$16 sps:$4 sm:$0xff]  }
 0x2df   : > { %3410 = vst [vmem:[#allocation2 + $0xa0] sm:$0xfe] %v3394_v8  ;;  %v3495_v15 = vld [vmem:[#allocation2 + $0x28] sm:$0xff]  ;;  %v12170_v43 = vld [vmem:[#allocation8 + $0x6c] ss:$16 sps:$4 sm:$0xff]  }
 0x2e0   : > { %3411 = vst [vmem:[#allocation2 + $0xa8] sm:$0xfe] %v3395_v32  ;;  %v3396_v33 = vrot.slane %v3313_v53, 7  ;;  %v3314_v2 = vmax.f32 %v3296_v23, %v3298_v24  ;;  %v3496_v47 = vld [vmem:[#allocation2 + $0x60] sm:$0xff]  ;;  %v12190_v63 = vld [vmem:[#allocation8 + $0x88] ss:$16 sps:$4 sm:$0xff]  }
 0x2e1   : > { %v3497_v58 = vld [vmem:[#allocation2 + $0x68] sm:$0xff]  ;;  %v12132_v11 = vpack.c.bf16 %v3496_v47, %v3494_v27  ;;  %v12176_v59 = vld [vmem:[#allocation8 + $0x60] ss:$16 sps:$4 sm:$0xff]   ;;  %v12182_v60 = vld [vmem:[#allocation8 + $0x8c] ss:$16 sps:$4 sm:$0xff]  }
 0x2e2   : > { %3412 = vst [vmem:[#allocation2 + $0xe0] sm:$0xfe] %v3396_v33  ;;  %v3397_v9 = vrot.slane %v3314_v2, 7  ;;  %v12126_v10 = vpack.c.bf16 %v3497_v58, %v3495_v15  ;;  %v12188_v62 = vld [vmem:[#allocation8 + $0x80] ss:$16 sps:$4 sm:$0xff]  }
 0x2e3   : > { %13640 = vst [vmem:[#allocation24_spill] sm:$0xff] %v12132_v11  ;;  %v12194_v17 = vld [vmem:[#allocation8 + $0xa4] ss:$16 sps:$4 sm:$0xff]   ;;  %v12196_v25 = vld [vmem:[#allocation8 + $0xac] ss:$16 sps:$4 sm:$0xff]  }
 0x2e4   : > { %3413 = vst [vmem:[#allocation2 + $0xe8] sm:$0xfe] %v3397_v9  ;;  %4090 = vmatprep.mubr.bf16.mxu0 %v12126_v10  ;;  %4143 = vmatprep.mubr.bf16.mxu1 %v12126_v10  ;;  %v12200_v57 = vld [vmem:[#allocation8 + $0xa0] ss:$16 sps:$4 sm:$0xff]   ;;  %v12202_v18 = vld [vmem:[#allocation8 + $0xa8] ss:$16 sps:$4 sm:$0xff]  }
 0x2e5   : > { %4091 = vmatmul.mubr.bf16.vlgmr.msra.gmra.mrb[32].mxu0 %v12132_v11  ;;  %4144 = vmatmul.mubr.bf16.vlgmr.msra.gmra.mrb[32].mxu1 %v12132_v11  ;;  %v12206_v26 = vld [vmem:[#allocation8 + $0xc4] ss:$16 sps:$4 sm:$0xff]   ;;  %v12208_v61 = vld [vmem:[#allocation8 + $0xcc] ss:$16 sps:$4 sm:$0xff]   ;;  %v12212_v44 = vld [vmem:[#allocation8 + $0xc0] ss:$16 sps:$4 sm:$0xff]  }
 0x2e6   : > { %4493 = vmatpush1.bf16.msra.mxu0 %v12128_v3  ;;  %4546 = vmatpush1.bf16.msra.mxu1 %v12130_v16  ;;  %v3498_v51 = vld [vmem:[#allocation2 + $0xa0] sm:$0xff]  ;;  %v12214_v21 = vld [vmem:[#allocation8 + $0xc8] ss:$16 sps:$4 sm:$0xff]   ;;  %v12218_v5 = vld [vmem:[#allocation8 + $0xe4] ss:$16 sps:$4 sm:$0xff]  }
 0x2e7   : > { %4494 = vmatprep.subr.bf16.mxu0 %v12134_v12  ;;  %4547 = vmatprep.subr.bf16.mxu1 %v12136_v28  ;;  %v3499_v54 = vld [vmem:[#allocation2 + $0xa8] sm:$0xff]  ;;  %v12220_v45 = vld [vmem:[#allocation8 + $0xec] ss:$16 sps:$4 sm:$0xff]   ;;  %v12224_v6 = vld [vmem:[#allocation8 + $0xe0] ss:$16 sps:$4 sm:$0xff]  }
 0x2e8   : > { %v12226_v29 = vld [vmem:[#allocation8 + $0xe8] ss:$16 sps:$4 sm:$0xff]   ;;  %v12230_v49 = vld [vmem:[#allocation8 + $0x104] ss:$16 sps:$4 sm:$0xff]   ;;  %v12232_v22 = vld [vmem:[#allocation8 + $0x10c] ss:$16 sps:$4 sm:$0xff]  }
 0x2e9   : > { %v3500_v34 = vld [vmem:[#allocation2 + $0xe0] sm:$0xff]  ;;  %v12238_v50 = vld [vmem:[#allocation8 + $0x108] ss:$16 sps:$4 sm:$0xff]   ;;  %v12242_v7 = vld [vmem:[#allocation8 + $0x124] ss:$16 sps:$4 sm:$0xff]  }
 0x2ea   : > { %4495 = vmatpush1.bf16.msra.mxu0 %v12144_v1  ;;  %4548 = vmatpush1.bf16.msra.mxu1 %v12146_v13  ;;  %v12164_v42 = vpack.c.bf16 %v3500_v34, %v3498_v51  ;;  %v12236_v30 = vld [vmem:[#allocation8 + $0x100] ss:$16 sps:$4 sm:$0xff]   ;;  %v12244_v46 = vld [vmem:[#allocation8 + $0x12c] ss:$16 sps:$4 sm:$0xff]   ;;  %v12250_v23 = vld [vmem:[#allocation8 + $0x128] ss:$16 sps:$4 sm:$0xff]  }
 0x2eb   : > { %v3501_v39 = vld [vmem:[#allocation2 + $0xe8] sm:$0xff]  ;;  %4496 = vmatprep.subr.bf16.mxu0 %v12150_v14  ;;  %4549 = vmatprep.subr.bf16.mxu1 %v12152_v0  ;;  %v12248_v8 = vld [vmem:[#allocation8 + $0x120] ss:$16 sps:$4 sm:$0xff]   ;;  %v12256_v53 = vld [vmem:[#allocation8 + $0x14c] ss:$16 sps:$4 sm:$0xff]  }
 0x2ec   : > { %v12160_v55 = vpack.c.bf16 %v3501_v39, %v3499_v54  ;;  %13642 = vst [vmem:[#allocation26_spill] sm:$0xff] %v12164_v42  ;;  %v12254_v32 = vld [vmem:[#allocation8 + $0x144] ss:$16 sps:$4 sm:$0xff]   ;;  %13644 = vst [vmem:[#allocation28_spill] sm:$0xff] %v12256_v53  ;;  %v12260_v24 = vld [vmem:[#allocation8 + $0x140] ss:$16 sps:$4 sm:$0xff]  }
 0x2ed   : > { %13643 = vst [vmem:[#allocation27_spill] sm:$0xff] %v12254_v32  ;;  %13645 = vst [vmem:[#allocation29_spill] sm:$0xff] %v12260_v24  ;;  %v12262_v33 = vld [vmem:[#allocation8 + $0x148] ss:$16 sps:$4 sm:$0xff]   ;;  %v12266_v2 = vld [vmem:[#allocation8 + $0x164] ss:$16 sps:$4 sm:$0xff]  }
 0x2ee   : > { %13641 = vst [vmem:[#allocation25_spill] sm:$0xff] %v12160_v55  ;;  %4100 = vmatprep.mubr.bf16.mxu0 %v12160_v55  ;;  %4153 = vmatprep.mubr.bf16.mxu1 %v12160_v55  ;;  %13646 = vst [vmem:[#allocation30_spill] sm:$0xff] %v12262_v33  ;;  %v12268_v47 = vld [vmem:[#allocation8 + $0x16c] ss:$16 sps:$4 sm:$0xff]   ;;  %v12272_v15 = vld [vmem:[#allocation8 + $0x160] ss:$16 sps:$4 sm:$0xff]  }
 0x2ef   : > { %4101 = vmatmul.mubr.bf16.gmra.mrb[36].mxu0 %v12164_v42  ;;  %4154 = vmatmul.mubr.bf16.gmra.mrb[36].mxu1 %v12164_v42  ;;  %13647 = vst [vmem:[#allocation31_spill] sm:$0xff] %v12266_v2  ;;  %13648 = vst [vmem:[#allocation32_spill] sm:$0xff] %v12268_v47  ;;  %v12274_v58 = vld [vmem:[#allocation8 + $0x168] ss:$16 sps:$4 sm:$0xff]   ;;  %v12278_v9 = vld [vmem:[#allocation8 + $0x184] ss:$16 sps:$4 sm:$0xff]  }
 0x2f0   : > { %4497 = vmatpush1.bf16.msra.mxu0 %v12156_v40  ;;  %4550 = vmatpush1.bf16.msra.mxu1 %v12162_v56  ;;  %13649 = vst [vmem:[#allocation33_spill] sm:$0xff] %v12272_v15  ;;  %13650 = vst [vmem:[#allocation34_spill] sm:$0xff] %v12274_v58  ;;  %v12280_v27 = vld [vmem:[#allocation8 + $0x18c] ss:$16 sps:$4 sm:$0xff]   ;;  %v12282_v34 = vld [vmem:[#allocation8 + $0x180] ss:$16 sps:$4 sm:$0xff]  }
 0x2f1   : > { %4524 = vmatprep.mubr.bf16.mxu0 %v9601_v48  ;;  %4577 = vmatprep.mubr.bf16.mxu1 %v9601_v48  ;;  %13651 = vst [vmem:[#allocation35_spill] sm:$0xff] %v12278_v9  ;;  %13652 = vst [vmem:[#allocation36_spill] sm:$0xff] %v12280_v27  ;;  %v12286_v54 = vld [vmem:[#allocation8 + $0x188] ss:$16 sps:$4 sm:$0xff]   ;;  %v3619_v39 = vld [vmem:[#allocation2 + $0x40] sm:$0xfe] }
 0x2f2   : > { %4498 = vmatprep.subr.bf16.mxu0 %v12168_v19  ;;  %4551 = vmatprep.subr.bf16.mxu1 %v12170_v43  ;;  %13653 = vst [vmem:[#allocation37_spill] sm:$0xff] %v12282_v34  ;;  %13654 = vst [vmem:[#allocation38_spill] sm:$0xff] %v12286_v54  ;;  %v3620_v51 = vld [vmem:[#allocation2 + $0x48] sm:$0xfe]  ;;  %v12292_v52 = vld [vmem:[#allocation8 + $0x1ac] ss:$16 sps:$4 sm:$0xff]  }
 0x2f3   : > { %v12290_v41 = vld [vmem:[#allocation8 + $0x1a4] ss:$16 sps:$4 sm:$0xff]   ;;  %13656 = vst [vmem:[#allocation40_spill] sm:$0xff] %v12292_v52  ;;  %v3615_v48 = vld [vmem:[#allocation2] sm:$0xfe]  ;;  %v9590_v37 = vpack.c.bf16 %v3620_v51, %v3619_v39 }
 0x2f4   : > { %4499 = vmatpush1.bf16.msra.mxu0 %v12176_v59  ;;  %4552 = vmatpush1.bf16.msra.mxu1 %v12178_v4  ;;  %13655 = vst [vmem:[#allocation39_spill] sm:$0xff] %v12290_v41  ;;  %v12304_v42 = vld [vmem:[#allocation8 + $0x1cc] ss:$16 sps:$4 sm:$0xff]   ;;  %v9588_v55 = vpack.c.bf16 %v3616_v38, %v3615_v48  ;;  %v12308_v51 = vld [vmem:[#allocation8 + $0x1c0] ss:$16 sps:$4 sm:$0xff]  }
 0x2f5   : > { %4500 = vmatprep.subr.bf16.mxu0 %v12180_v20  ;;  %4553 = vmatprep.subr.bf16.mxu1 %v12182_v60  ;;  %13660 = vst [vmem:[#allocation44_spill] sm:$0xff] %v12304_v42  ;;  %v3621_v11 = vld [vmem:[#allocation2 + $0x50] sm:$0x1]  ;;  %v3692_v39 = vshll.u32 %v9590_v37, 16  ;;  %13661 = vst [vmem:[#allocation45_spill] sm:$0xff] %v12308_v51 }
 0x2f6   : > { %v3675_v38 = vshrl.u32 %v9588_v55, 16  ;;  %v3678_v48 = vshll.u32 %v9588_v55, 16 }
 0x2f8   : > { %4501 = vmatpush1.bf16.msra.mxu0 %v12188_v62  ;;  %4554 = vmatpush1.bf16.msra.mxu1 %v12190_v63  ;;  %v3680_v55 = vrot.slane %v3678_v48, 5  ;;  %v10968_v48 = vld [vmem:[#allocation8 + $0x224] ss:$16 sps:$4 sm:$0xff]  }
 0x2f9   : > { %4502 = vmatprep.subr.bf16.mxu0 %v12194_v17  ;;  %4555 = vmatprep.subr.bf16.mxu1 %v12196_v25 }
 0x2fc   : > { %4503 = vmatpush1.bf16.msra.mxu0 %v12200_v57  ;;  %4556 = vmatpush1.bf16.msra.mxu1 %v12202_v18 }
 0x2fd   : > { %4504 = vmatprep.subr.bf16.mxu0 %v12206_v26  ;;  %4557 = vmatprep.subr.bf16.mxu1 %v12208_v61 }
 0x300   : > { %4505 = vmatpush1.bf16.msra.mxu0 %v12212_v44  ;;  %4558 = vmatpush1.bf16.msra.mxu1 %v12214_v21 }
 0x301   : > { %4506 = vmatprep.subr.bf16.mxu0 %v12218_v5  ;;  %4559 = vmatprep.subr.bf16.mxu1 %v12220_v45 }
 0x304   : > { %4507 = vmatpush1.bf16.msra.mxu0 %v12224_v6  ;;  %4560 = vmatpush1.bf16.msra.mxu1 %v12226_v29 }
 0x305   : > { %4508 = vmatprep.subr.bf16.mxu0 %v12230_v49  ;;  %4561 = vmatprep.subr.bf16.mxu1 %v12232_v22 }
 0x308   : > { %4509 = vmatpush1.bf16.msra.mxu0 %v12236_v30  ;;  %4562 = vmatpush1.bf16.msra.mxu1 %v12238_v50 }
 0x309   : > { %4510 = vmatprep.subr.bf16.mxu0 %v12242_v7  ;;  %4563 = vmatprep.subr.bf16.mxu1 %v12244_v46 }
 0x30c   : > { %4511 = vmatpush1.bf16.msra.mxu0 %v12248_v8  ;;  %4564 = vmatpush1.bf16.msra.mxu1 %v12250_v23 }
 0x30d   : > { %4512 = vmatprep.subr.bf16.mxu0 %v12254_v32  ;;  %4565 = vmatprep.subr.bf16.mxu1 %v12256_v53  ;;  %v11018_v32 = vld [vmem:[#allocation8 + $0x3a0] ss:$16 sps:$4 sm:$0xff]  }
 0x310   : > { %4513 = vmatpush1.bf16.msra.mxu0 %v12260_v24  ;;  %4566 = vmatpush1.bf16.msra.mxu1 %v12262_v33  ;;  %v3493_v33 = vld [vmem:[#allocation2 + $0xc8] sm:$0xff] }
 0x311   : > { %4514 = vmatprep.subr.bf16.mxu0 %v12266_v2  ;;  %4567 = vmatprep.subr.bf16.mxu1 %v12268_v47  ;;  %v3677_v47 = vrot.slane %v3675_v38, 4  ;;  %v3488_v2 = vld [vmem:[#allocation2 + $0x40] sm:$0xff]  ;;  %v10967_v38 = vld [vmem:[#allocation8 + $0x208] ss:$16 sps:$4 sm:$0xff]  }
 0x313   : > { %v3681_v24 = vor.u32 %v3680_v55, %v3677_v47 }
 0x314   : > { %4515 = vmatpush1.bf16.msra.mxu0 %v12272_v15  ;;  %4568 = vmatpush1.bf16.msra.mxu1 %v12274_v58  ;;  %v12320_v15 = vld [vmem:[#allocation8 + $0x1e0] ss:$16 sps:$4 sm:$0xff]  }
 0x315   : > { %4516 = vmatprep.subr.bf16.mxu0 %v12278_v9  ;;  %4569 = vmatprep.subr.bf16.mxu1 %v12280_v27  ;;  %v3689_v27 = vshrl.u32 %v9590_v37, 16  ;;  %v3617_v37 = vld [vmem:[#allocation2 + $0x10] sm:$0x1]  ;;  %v3618_v9 = vld [vmem:[#allocation2 + $0x18] sm:$0x1]  ;;  %13665 = vst [vmem:[#allocation49_spill] sm:$0xff] %v12320_v15 }
 0x317   : > { %v3691_v58 = vrot.slane %v3689_v27, 4 }
 0x318   : > { %4517 = vmatpush1.bf16.msra.mxu0 %v12282_v34  ;;  %4570 = vmatpush1.bf16.msra.mxu1 %v12286_v54  ;;  %v12310_v54 = vld [vmem:[#allocation8 + $0x1c8] ss:$16 sps:$4 sm:$0xff]   ;;  %v3622_v34 = vld [vmem:[#allocation2 + $0x58] sm:$0x1] }
 0x319   : > { %4518 = vmatprep.subr.bf16.mxu0 %v12290_v41  ;;  %4571 = vmatprep.subr.bf16.mxu1 %v12292_v52  ;;  %13662 = vst [vmem:[#allocation46_spill] sm:$0xff] %v12310_v54  ;;  %v12314_v52 = vld [vmem:[#allocation8 + $0x1e4] ss:$16 sps:$4 sm:$0xff]   ;;  %v12316_v41 = vld [vmem:[#allocation8 + $0x1ec] ss:$16 sps:$4 sm:$0xff]  }
 0x31a   : > { %13663 = vst [vmem:[#allocation47_spill] sm:$0xff] %v12314_v52  ;;  %13664 = vst [vmem:[#allocation48_spill] sm:$0xff] %v12316_v41 }
 0x31c   : > { %4519 = vmatpush1.bf16.msra.mxu0 %v12296_v36  ;;  %4572 = vmatpush1.bf16.msra.mxu1 %v12298_v35  ;;  %v9591_v36 = vpack.c.bf16 %v3622_v34, %v3621_v11  ;;  %v3694_v35 = vrot.slane %v3692_v39, 5  ;;  %v3486_v34 = vld [vmem:[#allocation2] sm:$0xff] }
 0x31d   : > { %4520 = vmatprep.subr.bf16.mxu0 %v12302_v31  ;;  %4573 = vmatprep.subr.bf16.mxu1 %v12304_v42  ;;  %v12322_v31 = vld [vmem:[#allocation8 + $0x1e8] ss:$16 sps:$4 sm:$0xff]   ;;  %v9589_v42 = vpack.c.bf16 %v3618_v9, %v3617_v37  ;;  %v9600_v39 = vpack.c.bf16 %v3488_v2, %v3486_v34  ;;  %v3682_v2 = vrot.slane %v3681_v24, 4  ;;  %v10970_v37 = vld [vmem:[#allocation8 + $0x220] ss:$16 sps:$4 sm:$0xff]  }
 0x31e   : > { %13666 = vst [vmem:[#allocation50_spill] sm:$0xff] %v12322_v31  ;;  %v3695_v11 = vor.u32 %v3694_v35, %v3691_v58  ;;  %v3698_v27 = vshll.u32 %v9591_v36, 16  ;;  %v10966_v58 = vld [vmem:[#allocation8 + $0x200] ss:$16 sps:$4 sm:$0xff]   ;;  %v10971_v24 = vld [vmem:[#allocation8 + $0x228] ss:$16 sps:$4 sm:$0xff]  }
 0x320   : > { %4521 = vmatpush1.bf16.msra.mxu0 %v12308_v51  ;;  %4574 = vmatpush1.bf16.msra.mxu1 %v12310_v54  ;;  %v10964_v54 = vld [vmem:[#allocation8 + $0x204] ss:$16 sps:$4 sm:$0xff]   ;;  %v10965_v51 = vld [vmem:[#allocation8 + $0x20c] ss:$16 sps:$4 sm:$0xff]   ;;  %v3696_v35 = vrot.slane %v3695_v11, 4  ;;  %v3700_v36 = vrot.slane %v3698_v27, 5 }
 0x321   : > { %4522 = vmatprep.subr.bf16.mxu0 %v12314_v52  ;;  %4575 = vmatprep.subr.bf16.mxu1 %v12316_v41  ;;  %v3491_v52 = vld [vmem:[#allocation2 + $0x88] sm:$0xff]  ;;  %v3684_v41 = vshll.u32 %v9589_v42, 16  ;;  %v3492_v42 = vld [vmem:[#allocation2 + $0xc0] sm:$0xff] }
 0x322   : > { %v9603_v9 = vpack.c.bf16 %v3493_v33, %v3491_v52  ;;  %v12336_v47 = vsel %vm12330_vm4, %v3696_v35, %v3700_v36  ;;  %v3490_v52 = vld [vmem:[#allocation2 + $0x80] sm:$0xff]  ;;  %v10972_v11 = vld [vmem:[#allocation8 + $0x244] ss:$16 sps:$4 sm:$0xff]  }
 0x323   : > { %v10973_v27 = vld [vmem:[#allocation8 + $0x24c] ss:$16 sps:$4 sm:$0xff]   ;;  %v10976_v35 = vld [vmem:[#allocation8 + $0x264] ss:$16 sps:$4 sm:$0xff]   ;;  %v12744_v33 = vld [vmem:[#allocation8 + $0x620] ss:$16 sps:$4 sm:$0xff]  }
 0x324   : > { %4523 = vmatpush1.bf16.msra.mxu0 %v12320_v15  ;;  %4576 = vmatpush1.bf16.msra.mxu1 %v12322_v31  ;;  %v10977_v36 = vld [vmem:[#allocation8 + $0x26c] ss:$16 sps:$4 sm:$0xff]  }
 0x325   : > { %4614 = vmatprep.subr.bf16.mxu0 %v10964_v54  ;;  %4667 = vmatprep.subr.bf16.mxu1 %v10965_v51  ;;  %v3686_v54 = vrot.slane %v3684_v41, 5  ;;  %v10969_v51 = vld [vmem:[#allocation8 + $0x22c] ss:$16 sps:$4 sm:$0xff]   ;;  %v9602_v41 = vpack.c.bf16 %v3492_v42, %v3490_v52  ;;  %v10984_v42 = vld [vmem:[#allocation8 + $0x2a4] ss:$16 sps:$4 sm:$0xff]  }
 0x326   : > { %v10985_v52 = vld [vmem:[#allocation8 + $0x2ac] ss:$16 sps:$4 sm:$0xff]  }
 0x327   : > { %4525 = vmatmul.mubr.bf16.vlgmr.msra.gmra.mrb[32].mxu0 %v9600_v39  ;;  %4578 = vmatmul.mubr.bf16.vlgmr.msra.gmra.mrb[32].mxu1 %v9600_v39  ;;  %v12340_v55 = vsel %vm12330_vm4, %v3682_v2, %v3686_v54  ;;  %v10974_v39 = vld [vmem:[#allocation8 + $0x240] ss:$16 sps:$4 sm:$0xff]   ;;  %v10980_v2 = vld [vmem:[#allocation8 + $0x284] ss:$16 sps:$4 sm:$0xff]   ;;  %v10981_v54 = vld [vmem:[#allocation8 + $0x28c] ss:$16 sps:$4 sm:$0xff]  }
 0x328   : > { %4534 = vmatprep.mubr.bf16.mxu0 %v9603_v9  ;;  %4587 = vmatprep.mubr.bf16.mxu1 %v9603_v9  ;;  %v12344_v34 = vcombine.high %v12340_v55, %v12336_v47  ;;  %v10975_v9 = vld [vmem:[#allocation8 + $0x248] ss:$16 sps:$4 sm:$0xff]  }
 0x329   : > { %4615 = vmatpush1.bf16.msra.mxu0 %v10966_v58  ;;  %4668 = vmatpush1.bf16.msra.mxu1 %v10967_v38  ;;  %v10978_v58 = vld [vmem:[#allocation8 + $0x260] ss:$16 sps:$4 sm:$0xff]   ;;  %v10979_v38 = vld [vmem:[#allocation8 + $0x268] ss:$16 sps:$4 sm:$0xff]  }
 0x32a   : > { %4616 = vmatprep.subr.bf16.mxu0 %v10968_v48  ;;  %4669 = vmatprep.subr.bf16.mxu1 %v10969_v51  ;;  %13669 = vst [vmem:[#allocation51_spill] sm:$0xff] %v12344_v34  ;;  %v10982_v48 = vld [vmem:[#allocation8 + $0x280] ss:$16 sps:$4 sm:$0xff]   ;;  %v10983_v51 = vld [vmem:[#allocation8 + $0x288] ss:$16 sps:$4 sm:$0xff]  }
 0x32d   : > { %4617 = vmatpush1.bf16.msra.mxu0 %v10970_v37  ;;  %4670 = vmatpush1.bf16.msra.mxu1 %v10971_v24  ;;  %v10986_v37 = vld [vmem:[#allocation8 + $0x2a0] ss:$16 sps:$4 sm:$0xff]   ;;  %v10987_v24 = vld [vmem:[#allocation8 + $0x2a8] ss:$16 sps:$4 sm:$0xff]  }
 0x32e   : > { %4618 = vmatprep.subr.bf16.mxu0 %v10972_v11  ;;  %4671 = vmatprep.subr.bf16.mxu1 %v10973_v27  ;;  %v10989_v11 = vld [vmem:[#allocation8 + $0x2cc] ss:$16 sps:$4 sm:$0xff]   ;;  %v10990_v27 = vld [vmem:[#allocation8 + $0x2c0] ss:$16 sps:$4 sm:$0xff]  }
 0x32f   : > { %4535 = vmatmul.mubr.bf16.gmra.mrb[36].mxu0 %v9602_v41  ;;  %4588 = vmatmul.mubr.bf16.gmra.mrb[36].mxu1 %v9602_v41  ;;  %v10988_v41 = vld [vmem:[#allocation8 + $0x2c4] ss:$16 sps:$4 sm:$0xff]  }
 0x330   : > { %4646 = vmatprep.mubr.bf16.mxu0 %v12344_v34  ;;  %4699 = vmatprep.mubr.bf16.mxu1 %v12344_v34  ;;  %v3626_v34 = vld [vmem:[#allocation2 + $0x98] sm:$0x1] }
 0x331   : > { %4619 = vmatpush1.bf16.msra.mxu0 %v10974_v39  ;;  %4672 = vmatpush1.bf16.msra.mxu1 %v10975_v9  ;;  %v10991_v39 = vld [vmem:[#allocation8 + $0x2c8] ss:$16 sps:$4 sm:$0xff]   ;;  %v10992_v9 = vld [vmem:[#allocation8 + $0x2e4] ss:$16 sps:$4 sm:$0xff]  }
 0x332   : > { %4620 = vmatprep.subr.bf16.mxu0 %v10976_v35  ;;  %4673 = vmatprep.subr.bf16.mxu1 %v10977_v36  ;;  %v10993_v35 = vld [vmem:[#allocation8 + $0x2ec] ss:$16 sps:$4 sm:$0xff]   ;;  %v10994_v36 = vld [vmem:[#allocation8 + $0x2e0] ss:$16 sps:$4 sm:$0xff]  }
 0x335   : > { %4621 = vmatpush1.bf16.msra.mxu0 %v10978_v58  ;;  %4674 = vmatpush1.bf16.msra.mxu1 %v10979_v38  ;;  %v10995_v58 = vld [vmem:[#allocation8 + $0x2e8] ss:$16 sps:$4 sm:$0xff]   ;;  %v10996_v38 = vld [vmem:[#allocation8 + $0x304] ss:$16 sps:$4 sm:$0xff]  }
 0x336   : > { %4622 = vmatprep.subr.bf16.mxu0 %v10980_v2  ;;  %4675 = vmatprep.subr.bf16.mxu1 %v10981_v54  ;;  %v10997_v2 = vld [vmem:[#allocation8 + $0x30c] ss:$16 sps:$4 sm:$0xff]   ;;  %v10998_v54 = vld [vmem:[#allocation8 + $0x300] ss:$16 sps:$4 sm:$0xff]  }
 0x339   : > { %4623 = vmatpush1.bf16.msra.mxu0 %v10982_v48  ;;  %4676 = vmatpush1.bf16.msra.mxu1 %v10983_v51  ;;  %v10999_v48 = vld [vmem:[#allocation8 + $0x308] ss:$16 sps:$4 sm:$0xff]   ;;  %v11000_v51 = vld [vmem:[#allocation8 + $0x324] ss:$16 sps:$4 sm:$0xff]  }
 0x33a   : > { %4624 = vmatprep.subr.bf16.mxu0 %v10984_v42  ;;  %4677 = vmatprep.subr.bf16.mxu1 %v10985_v52  ;;  %v11001_v42 = vld [vmem:[#allocation8 + $0x32c] ss:$16 sps:$4 sm:$0xff]   ;;  %v11002_v52 = vld [vmem:[#allocation8 + $0x320] ss:$16 sps:$4 sm:$0xff]  }
 0x33d   : > { %4625 = vmatpush1.bf16.msra.mxu0 %v10986_v37  ;;  %4678 = vmatpush1.bf16.msra.mxu1 %v10987_v24  ;;  %v11003_v37 = vld [vmem:[#allocation8 + $0x328] ss:$16 sps:$4 sm:$0xff]   ;;  %v3627_v24 = vld [vmem:[#allocation2 + $0xc0] sm:$0xfe] }
 0x33e   : > { %4626 = vmatprep.subr.bf16.mxu0 %v10988_v41  ;;  %4679 = vmatprep.subr.bf16.mxu1 %v10989_v11  ;;  %v3628_v41 = vld [vmem:[#allocation2 + $0xc8] sm:$0xfe] }
 0x33f   : > { %v11004_v11 = vld [vmem:[#allocation8 + $0x344] ss:$16 sps:$4 sm:$0xff]  }
 0x341   : > { %4627 = vmatpush1.bf16.msra.mxu0 %v10990_v27  ;;  %4680 = vmatpush1.bf16.msra.mxu1 %v10991_v39  ;;  %v11005_v27 = vld [vmem:[#allocation8 + $0x34c] ss:$16 sps:$4 sm:$0xff]  }
 0x342   : > { %4628 = vmatprep.subr.bf16.mxu0 %v10992_v9  ;;  %4681 = vmatprep.subr.bf16.mxu1 %v10993_v35  ;;  %v3623_v39 = vld [vmem:[#allocation2 + $0x80] sm:$0xfe]  ;;  %v3624_v9 = vld [vmem:[#allocation2 + $0x88] sm:$0xfe]  ;;  %v9594_v35 = vpack.c.bf16 %v3628_v41, %v3627_v24 }
 0x343   : > { %v11013_v24 = vld [vmem:[#allocation8 + $0x38c] ss:$16 sps:$4 sm:$0xff]  }
 0x345   : > { %4629 = vmatpush1.bf16.msra.mxu0 %v10994_v36  ;;  %4682 = vmatpush1.bf16.msra.mxu1 %v10995_v58  ;;  %v11006_v36 = vld [vmem:[#allocation8 + $0x340] ss:$16 sps:$4 sm:$0xff]   ;;  %v11007_v58 = vld [vmem:[#allocation8 + $0x348] ss:$16 sps:$4 sm:$0xff]  }
 0x346   : > { %4630 = vmatprep.subr.bf16.mxu0 %v10996_v38  ;;  %4683 = vmatprep.subr.bf16.mxu1 %v10997_v2  ;;  %v11008_v38 = vld [vmem:[#allocation8 + $0x364] ss:$16 sps:$4 sm:$0xff]   ;;  %v11009_v2 = vld [vmem:[#allocation8 + $0x36c] ss:$16 sps:$4 sm:$0xff]  }
 0x349   : > { %4631 = vmatpush1.bf16.msra.mxu0 %v10998_v54  ;;  %4684 = vmatpush1.bf16.msra.mxu1 %v10999_v48  ;;  %v9592_v54 = vpack.c.bf16 %v3624_v9, %v3623_v39  ;;  %v3717_v48 = vshrl.u32 %v9594_v35, 16  ;;  %v11014_v39 = vld [vmem:[#allocation8 + $0x380] ss:$16 sps:$4 sm:$0xff]   ;;  %v11015_v9 = vld [vmem:[#allocation8 + $0x388] ss:$16 sps:$4 sm:$0xff]  }
 0x34a   : > { %4632 = vmatprep.subr.bf16.mxu0 %v11000_v51  ;;  %4685 = vmatprep.subr.bf16.mxu1 %v11001_v42  ;;  %v3720_v51 = vshll.u32 %v9594_v35, 16  ;;  %v11010_v42 = vld [vmem:[#allocation8 + $0x360] ss:$16 sps:$4 sm:$0xff]   ;;  %v11016_v35 = vld [vmem:[#allocation8 + $0x3a4] ss:$16 sps:$4 sm:$0xff]  }
 0x34b   : > { %v3703_v41 = vshrl.u32 %v9592_v54, 16  ;;  %v3719_v31 = vrot.slane %v3717_v48, 4  ;;  %v11021_v48 = vld [vmem:[#allocation8 + $0x3cc] ss:$16 sps:$4 sm:$0xff]  }
 0x34d   : > { %4633 = vmatpush1.bf16.msra.mxu0 %v11002_v52  ;;  %4686 = vmatpush1.bf16.msra.mxu1 %v11003_v37  ;;  %v11011_v52 = vld [vmem:[#allocation8 + $0x368] ss:$16 sps:$4 sm:$0xff]   ;;  %v3629_v37 = vld [vmem:[#allocation2 + $0xd0] sm:$0x1]  ;;  %v3705_v15 = vrot.slane %v3703_v41, 4 }
 0x34e   : > { %4634 = vmatprep.subr.bf16.mxu0 %v11004_v11  ;;  %4687 = vmatprep.subr.bf16.mxu1 %v11005_v27  ;;  %v3630_v11 = vld [vmem:[#allocation2 + $0xd8] sm:$0x1] }
 0x34f   : > { %v11012_v27 = vld [vmem:[#allocation8 + $0x384] ss:$16 sps:$4 sm:$0xff]  }
 0x351   : > { %4635 = vmatpush1.bf16.msra.mxu0 %v11006_v36  ;;  %4688 = vmatpush1.bf16.msra.mxu1 %v11007_v58  ;;  %v3706_v36 = vshll.u32 %v9592_v54, 16  ;;  %v3625_v58 = vld [vmem:[#allocation2 + $0x90] sm:$0x1]  ;;  %v11019_v54 = vld [vmem:[#allocation8 + $0x3a8] ss:$16 sps:$4 sm:$0xff]  }
 0x352   : > { %4636 = vmatprep.subr.bf16.mxu0 %v11008_v38  ;;  %4689 = vmatprep.subr.bf16.mxu1 %v11009_v2  ;;  %v9595_v38 = vpack.c.bf16 %v3630_v11, %v3629_v37  ;;  %v3722_v2 = vrot.slane %v3720_v51, 5  ;;  %v11020_v37 = vld [vmem:[#allocation8 + $0x3c4] ss:$16 sps:$4 sm:$0xff]  }
 0x354   : > { %v3723_v53 = vor.u32 %v3722_v2, %v3719_v31  ;;  %v11025_v31 = vld [vmem:[#allocation8 + $0x3ec] ss:$16 sps:$4 sm:$0xff]  }
 0x355   : > { %4637 = vmatpush1.bf16.msra.mxu0 %v11010_v42  ;;  %4690 = vmatpush1.bf16.msra.mxu1 %v11011_v52  ;;  %v11017_v42 = vld [vmem:[#allocation8 + $0x3ac] ss:$16 sps:$4 sm:$0xff]   ;;  %v9593_v52 = vpack.c.bf16 %v3626_v34, %v3625_v58  ;;  %v11024_v34 = vld [vmem:[#allocation8 + $0x3e4] ss:$16 sps:$4 sm:$0xff]   ;;  %v11026_v58 = vld [vmem:[#allocation8 + $0x3e0] ss:$16 sps:$4 sm:$0xff]  }
 0x356   : > { %4638 = vmatprep.subr.bf16.mxu0 %v11012_v27  ;;  %4691 = vmatprep.subr.bf16.mxu1 %v11013_v24  ;;  %v3708_v27 = vrot.slane %v3706_v36, 5  ;;  %v3726_v24 = vshll.u32 %v9595_v38, 16  ;;  %v11027_v38 = vld [vmem:[#allocation8 + $0x3e8] ss:$16 sps:$4 sm:$0xff]   ;;  %v11029_v2 = vld [vmem:[#allocation8 + $0xc] ss:$16 sps:$4 sm:$0xff]  }
 0x357   : > { %v3712_v11 = vshll.u32 %v9593_v52, 16 }
 0x358   : > { %v3709_v51 = vor.u32 %v3708_v27, %v3705_v15  ;;  %v11028_v15 = vld [vmem:[#allocation8 + $0x4] ss:$16 sps:$4 sm:$0xff]  }
 0x359   : > { %4639 = vmatpush1.bf16.msra.mxu0 %v11014_v39  ;;  %4692 = vmatpush1.bf16.msra.mxu1 %v11015_v9  ;;  %v3724_v39 = vrot.slane %v3723_v53, 4  ;;  %v3728_v9 = vrot.slane %v3726_v24, 5  ;;  %v12352_v53 = vcombine.low %v12340_v55, %v12336_v47  ;;  %v12470_v55 = vld [vmem:[#allocation8 + $0x46c] ss:$16 sps:$4 sm:$0xff]  }
 0x35a   : > { %4640 = vmatprep.subr.bf16.mxu0 %v11016_v35  ;;  %4693 = vmatprep.subr.bf16.mxu1 %v11017_v42  ;;  %v11022_v35 = vld [vmem:[#allocation8 + $0x3c0] ss:$16 sps:$4 sm:$0xff]   ;;  %v11023_v42 = vld [vmem:[#allocation8 + $0x3c8] ss:$16 sps:$4 sm:$0xff]   ;;  %v3710_v41 = vrot.slane %v3709_v51, 4 }
 0x35b   : > { %v3729_v36 = vsel %vm12330_vm4, %v3724_v39, %v3728_v9  ;;  %v13696_v24 = vld [vmem:[#allocation26_spill] sm:$0xff]  ;;  %v12490_v39 = vld [vmem:[#allocation8 + $0x480] ss:$16 sps:$4 sm:$0xff]  }
 0x35c   : > { %v12484_v51 = vld [vmem:[#allocation8 + $0x484] ss:$16 sps:$4 sm:$0xff]   ;;  %v12492_v9 = vld [vmem:[#allocation8 + $0x488] ss:$16 sps:$4 sm:$0xff]  }
 0x35d   : > { %4641 = vmatpush1.bf16.msra.mxu0 %v11018_v32  ;;  %4694 = vmatpush1.bf16.msra.mxu1 %v11019_v54  ;;  %v3714_v32 = vrot.slane %v3712_v11, 5  ;;  %v13697_v54 = vld [vmem:[#allocation51_spill] sm:$0xff] }
 0x35e   : > { %4642 = vmatprep.subr.bf16.mxu0 %v11020_v37  ;;  %4695 = vmatprep.subr.bf16.mxu1 %v11021_v48  ;;  %v12478_v37 = vld [vmem:[#allocation8 + $0x460] ss:$16 sps:$4 sm:$0xff]   ;;  %v12480_v48 = vld [vmem:[#allocation8 + $0x468] ss:$16 sps:$4 sm:$0xff]   ;;  %v12486_v11 = vld [vmem:[#allocation8 + $0x48c] ss:$16 sps:$4 sm:$0xff]  }
 0x35f   : > { %v3715_v52 = vsel %vm12330_vm4, %v3710_v41, %v3714_v32  ;;  %v12508_v41 = vld [vmem:[#allocation8 + $0x4c4] ss:$16 sps:$4 sm:$0xff]   ;;  %v12510_v32 = vld [vmem:[#allocation8 + $0x4cc] ss:$16 sps:$4 sm:$0xff]  }
 0x360   : > { %v12356_v27 = vcombine.high %v3715_v52, %v3729_v36  ;;  %v12368_v47 = vcombine.low %v3715_v52, %v3729_v36  ;;  %v12514_v36 = vld [vmem:[#allocation8 + $0x4c0] ss:$16 sps:$4 sm:$0xff]   ;;  %v12528_v52 = vld [vmem:[#allocation8 + $0x4e8] ss:$16 sps:$4 sm:$0xff]  }
 0x361   : > { %4643 = vmatpush1.bf16.msra.mxu0 %v11022_v35  ;;  %4696 = vmatpush1.bf16.msra.mxu1 %v11023_v42  ;;  %v12496_v35 = vld [vmem:[#allocation8 + $0x4a4] ss:$16 sps:$4 sm:$0xff]   ;;  %v12498_v42 = vld [vmem:[#allocation8 + $0x4ac] ss:$16 sps:$4 sm:$0xff]  }
 0x362   : > { %4644 = vmatprep.subr.bf16.mxu0 %v11024_v34  ;;  %4697 = vmatprep.subr.bf16.mxu1 %v11025_v31  ;;  %v12502_v34 = vld [vmem:[#allocation8 + $0x4a0] ss:$16 sps:$4 sm:$0xff]   ;;  %v12504_v31 = vld [vmem:[#allocation8 + $0x4a8] ss:$16 sps:$4 sm:$0xff]  }
 0x365   : > { %4645 = vmatpush1.bf16.msra.mxu0 %v11026_v58  ;;  %4698 = vmatpush1.bf16.msra.mxu1 %v11027_v38  ;;  %v12516_v58 = vld [vmem:[#allocation8 + $0x4c8] ss:$16 sps:$4 sm:$0xff]   ;;  %v12520_v38 = vld [vmem:[#allocation8 + $0x4e4] ss:$16 sps:$4 sm:$0xff]  }
 0x366   : > { %4720 = vmatprep.subr.bf16.mxu0 %v11028_v15  ;;  %4773 = vmatprep.subr.bf16.mxu1 %v11029_v2  ;;  %v12522_v15 = vld [vmem:[#allocation8 + $0x4ec] ss:$16 sps:$4 sm:$0xff]   ;;  %v12526_v2 = vld [vmem:[#allocation8 + $0x4e0] ss:$16 sps:$4 sm:$0xff]  }
 0x368   : > { %4647 = vmatmul.mubr.bf16.vlgmr.msra.gmra.mrb[40].mxu0 %v12352_v53  ;;  %4700 = vmatmul.mubr.bf16.vlgmr.msra.gmra.mrb[40].mxu1 %v12352_v53 }
 0x369   : > { %4656 = vmatprep.mubr.bf16.mxu0 %v12356_v27  ;;  %4709 = vmatprep.mubr.bf16.mxu1 %v12356_v27 }
 0x36a   : > { %4721 = vmatpush1.bf16.msra.mxu0 %v12128_v3  ;;  %4774 = vmatpush1.bf16.msra.mxu1 %v12130_v16  ;;  %v13671_v3 = vld [vmem:[#allocation28_spill] sm:$0xff]  ;;  %v13672_v16 = vld [vmem:[#allocation29_spill] sm:$0xff] }
 0x36b   : > { %4722 = vmatprep.subr.bf16.mxu0 %v12134_v12  ;;  %4775 = vmatprep.subr.bf16.mxu1 %v12136_v28  ;;  %v13673_v12 = vld [vmem:[#allocation30_spill] sm:$0xff]  ;;  %v13674_v28 = vld [vmem:[#allocation31_spill] sm:$0xff] }
 0x36e   : > { %4723 = vmatpush1.bf16.msra.mxu0 %v12144_v1  ;;  %4776 = vmatpush1.bf16.msra.mxu1 %v12146_v13  ;;  %v13675_v1 = vld [vmem:[#allocation32_spill] sm:$0xff]  ;;  %v13676_v13 = vld [vmem:[#allocation33_spill] sm:$0xff] }
 0x36f   : > { %4724 = vmatprep.subr.bf16.mxu0 %v12150_v14  ;;  %4777 = vmatprep.subr.bf16.mxu1 %v12152_v0  ;;  %v13677_v14 = vld [vmem:[#allocation34_spill] sm:$0xff]  ;;  %v13678_v0 = vld [vmem:[#allocation35_spill] sm:$0xff] }
 0x370   : > { %4657 = vmatmul.mubr.bf16.gmra.mrb[44].mxu0 %v12368_v47  ;;  %4710 = vmatmul.mubr.bf16.gmra.mrb[44].mxu1 %v12368_v47 }
 0x371   : > { %4752 = vmatprep.mubr.bf16.mxu0 %v12126_v10  ;;  %4805 = vmatprep.mubr.bf16.mxu1 %v12126_v10  ;;  %v13670_v10 = vld [vmem:[#allocation27_spill] sm:$0xff] }
 0x372   : > { %4725 = vmatpush1.bf16.msra.mxu0 %v12156_v40  ;;  %4778 = vmatpush1.bf16.msra.mxu1 %v12162_v56  ;;  %v13679_v40 = vld [vmem:[#allocation36_spill] sm:$0xff]  ;;  %v13680_v56 = vld [vmem:[#allocation37_spill] sm:$0xff] }
 0x373   : > { %4726 = vmatprep.subr.bf16.mxu0 %v12168_v19  ;;  %4779 = vmatprep.subr.bf16.mxu1 %v12170_v43  ;;  %v13681_v19 = vld [vmem:[#allocation38_spill] sm:$0xff]  ;;  %v13682_v43 = vld [vmem:[#allocation39_spill] sm:$0xff] }
 0x376   : > { %4727 = vmatpush1.bf16.msra.mxu0 %v12176_v59  ;;  %4780 = vmatpush1.bf16.msra.mxu1 %v12178_v4  ;;  %v13683_v59 = vld [vmem:[#allocation40_spill] sm:$0xff]  ;;  %v13684_v4 = vld [vmem:[#allocation41_spill] sm:$0xff] }
 0x377   : > { %4728 = vmatprep.subr.bf16.mxu0 %v12180_v20  ;;  %4781 = vmatprep.subr.bf16.mxu1 %v12182_v60  ;;  %v13685_v20 = vld [vmem:[#allocation42_spill] sm:$0xff]  ;;  %v13686_v60 = vld [vmem:[#allocation43_spill] sm:$0xff] }
 0x37a   : > { %4729 = vmatpush1.bf16.msra.mxu0 %v12188_v62  ;;  %4782 = vmatpush1.bf16.msra.mxu1 %v12190_v63  ;;  %v13687_v62 = vld [vmem:[#allocation44_spill] sm:$0xff]  ;;  %v13688_v63 = vld [vmem:[#allocation45_spill] sm:$0xff] }
 0x37b   : > { %4730 = vmatprep.subr.bf16.mxu0 %v12194_v17  ;;  %4783 = vmatprep.subr.bf16.mxu1 %v12196_v25  ;;  %v13689_v17 = vld [vmem:[#allocation46_spill] sm:$0xff]  ;;  %v13690_v25 = vld [vmem:[#allocation47_spill] sm:$0xff] }
 0x37e   : > { %4731 = vmatpush1.bf16.msra.mxu0 %v12200_v57  ;;  %4784 = vmatpush1.bf16.msra.mxu1 %v12202_v18  ;;  %v13691_v57 = vld [vmem:[#allocation48_spill] sm:$0xff] }
 0x37f   : > { %4732 = vmatprep.subr.bf16.mxu0 %v12206_v26  ;;  %4785 = vmatprep.subr.bf16.mxu1 %v12208_v61  ;;  %v12428_v18 = vld [vmem:[#allocation8 + $0x404] ss:$16 sps:$4 sm:$0xff]   ;;  %v12430_v26 = vld [vmem:[#allocation8 + $0x40c] ss:$16 sps:$4 sm:$0xff]  }
 0x380   : > { %v13692_v61 = vld [vmem:[#allocation49_spill] sm:$0xff] }
 0x382   : > { %4733 = vmatpush1.bf16.msra.mxu0 %v12212_v44  ;;  %4786 = vmatpush1.bf16.msra.mxu1 %v12214_v21  ;;  %v13693_v44 = vld [vmem:[#allocation50_spill] sm:$0xff]  ;;  %v12434_v21 = vld [vmem:[#allocation8 + $0x400] ss:$16 sps:$4 sm:$0xff]  }
 0x383   : > { %4734 = vmatprep.subr.bf16.mxu0 %v12218_v5  ;;  %4787 = vmatprep.subr.bf16.mxu1 %v12220_v45  ;;  %v12437_v5 = vld [vmem:[#allocation8 + $0x408] ss:$16 sps:$4 sm:$0xff]   ;;  %v12440_v45 = vld [vmem:[#allocation8 + $0x424] ss:$16 sps:$4 sm:$0xff]  }
 0x386   : > { %4735 = vmatpush1.bf16.msra.mxu0 %v12224_v6  ;;  %4788 = vmatpush1.bf16.msra.mxu1 %v12226_v29  ;;  %v12442_v6 = vld [vmem:[#allocation8 + $0x42c] ss:$16 sps:$4 sm:$0xff]  }
 0x387   : > { %4736 = vmatprep.subr.bf16.mxu0 %v12230_v49  ;;  %4789 = vmatprep.subr.bf16.mxu1 %v12232_v22  ;;  %v13694_v29 = vld [vmem:[#allocation24_spill] sm:$0xff]  ;;  %v13695_v49 = vld [vmem:[#allocation25_spill] sm:$0xff] }
 0x388   : > { %v12450_v22 = vld [vmem:[#allocation8 + $0x420] ss:$16 sps:$4 sm:$0xff]  }
 0x38a   : > { %4737 = vmatpush1.bf16.msra.mxu0 %v12236_v30  ;;  %4790 = vmatpush1.bf16.msra.mxu1 %v12238_v50  ;;  %v12452_v30 = vld [vmem:[#allocation8 + $0x428] ss:$16 sps:$4 sm:$0xff]   ;;  %v12456_v50 = vld [vmem:[#allocation8 + $0x444] ss:$16 sps:$4 sm:$0xff]  }
 0x38b   : > { %4738 = vmatprep.subr.bf16.mxu0 %v12242_v7  ;;  %4791 = vmatprep.subr.bf16.mxu1 %v12244_v46  ;;  %v12458_v7 = vld [vmem:[#allocation8 + $0x44c] ss:$16 sps:$4 sm:$0xff]   ;;  %v12462_v46 = vld [vmem:[#allocation8 + $0x440] ss:$16 sps:$4 sm:$0xff]  }
 0x38e   : > { %4739 = vmatpush1.bf16.msra.mxu0 %v12248_v8  ;;  %4792 = vmatpush1.bf16.msra.mxu1 %v12250_v23  ;;  %v12464_v8 = vld [vmem:[#allocation8 + $0x448] ss:$16 sps:$4 sm:$0xff]   ;;  %v12468_v23 = vld [vmem:[#allocation8 + $0x464] ss:$16 sps:$4 sm:$0xff]  }
 0x38f   : > { %4740 = vmatprep.subr.bf16.mxu0 %v13670_v10  ;;  %4793 = vmatprep.subr.bf16.mxu1 %v13671_v3  ;;  %v12532_v10 = vld [vmem:[#allocation8 + $0x504] ss:$16 sps:$4 sm:$0xff]   ;;  %v12534_v3 = vld [vmem:[#allocation8 + $0x50c] ss:$16 sps:$4 sm:$0xff]  }
 0x392   : > { %4741 = vmatpush1.bf16.msra.mxu0 %v13672_v16  ;;  %4794 = vmatpush1.bf16.msra.mxu1 %v13673_v12  ;;  %v12538_v16 = vld [vmem:[#allocation8 + $0x500] ss:$16 sps:$4 sm:$0xff]   ;;  %v12540_v12 = vld [vmem:[#allocation8 + $0x508] ss:$16 sps:$4 sm:$0xff]  }
 0x393   : > { %4742 = vmatprep.subr.bf16.mxu0 %v13674_v28  ;;  %4795 = vmatprep.subr.bf16.mxu1 %v13675_v1  ;;  %v12544_v28 = vld [vmem:[#allocation8 + $0x524] ss:$16 sps:$4 sm:$0xff]   ;;  %v12546_v1 = vld [vmem:[#allocation8 + $0x52c] ss:$16 sps:$4 sm:$0xff]  }
 0x396   : > { %4743 = vmatpush1.bf16.msra.mxu0 %v13676_v13  ;;  %4796 = vmatpush1.bf16.msra.mxu1 %v13677_v14  ;;  %v12550_v13 = vld [vmem:[#allocation8 + $0x520] ss:$16 sps:$4 sm:$0xff]   ;;  %v12552_v14 = vld [vmem:[#allocation8 + $0x528] ss:$16 sps:$4 sm:$0xff]  }
 0x397   : > { %4744 = vmatprep.subr.bf16.mxu0 %v13678_v0  ;;  %4797 = vmatprep.subr.bf16.mxu1 %v13679_v40  ;;  %13698 = vst [vmem:[#allocation27_spill] sm:$0xff] %v12550_v13  ;;  %13699 = vst [vmem:[#allocation28_spill] sm:$0xff] %v12552_v14  ;;  %v12556_v0 = vld [vmem:[#allocation8 + $0x544] ss:$16 sps:$4 sm:$0xff]   ;;  %v12558_v40 = vld [vmem:[#allocation8 + $0x54c] ss:$16 sps:$4 sm:$0xff]  }
 0x398   : > { %13700 = vst [vmem:[#allocation29_spill] sm:$0xff] %v12556_v0  ;;  %13701 = vst [vmem:[#allocation30_spill] sm:$0xff] %v12558_v40 }
 0x39a   : > { %4745 = vmatpush1.bf16.msra.mxu0 %v13680_v56  ;;  %4798 = vmatpush1.bf16.msra.mxu1 %v13681_v19  ;;  %v12562_v56 = vld [vmem:[#allocation8 + $0x540] ss:$16 sps:$4 sm:$0xff]   ;;  %v12564_v19 = vld [vmem:[#allocation8 + $0x548] ss:$16 sps:$4 sm:$0xff]  }
 0x39b   : > { %4746 = vmatprep.subr.bf16.mxu0 %v13682_v43  ;;  %4799 = vmatprep.subr.bf16.mxu1 %v13683_v59  ;;  %13702 = vst [vmem:[#allocation31_spill] sm:$0xff] %v12562_v56  ;;  %13703 = vst [vmem:[#allocation32_spill] sm:$0xff] %v12564_v19  ;;  %v12568_v43 = vld [vmem:[#allocation8 + $0x564] ss:$16 sps:$4 sm:$0xff]   ;;  %v12570_v59 = vld [vmem:[#allocation8 + $0x56c] ss:$16 sps:$4 sm:$0xff]  }
 0x39c   : > { %13704 = vst [vmem:[#allocation33_spill] sm:$0xff] %v12568_v43  ;;  %13705 = vst [vmem:[#allocation34_spill] sm:$0xff] %v12570_v59 }
 0x39e   : > { %4747 = vmatpush1.bf16.msra.mxu0 %v13684_v4  ;;  %4800 = vmatpush1.bf16.msra.mxu1 %v13685_v20  ;;  %v12574_v4 = vld [vmem:[#allocation8 + $0x560] ss:$16 sps:$4 sm:$0xff]   ;;  %v12576_v20 = vld [vmem:[#allocation8 + $0x568] ss:$16 sps:$4 sm:$0xff]  }
 0x39f   : > { %4748 = vmatprep.subr.bf16.mxu0 %v13686_v60  ;;  %4801 = vmatprep.subr.bf16.mxu1 %v13687_v62  ;;  %13706 = vst [vmem:[#allocation35_spill] sm:$0xff] %v12574_v4  ;;  %13707 = vst [vmem:[#allocation36_spill] sm:$0xff] %v12576_v20  ;;  %v12580_v60 = vld [vmem:[#allocation8 + $0x584] ss:$16 sps:$4 sm:$0xff]   ;;  %v12582_v62 = vld [vmem:[#allocation8 + $0x58c] ss:$16 sps:$4 sm:$0xff]  }
 0x3a0   : > { %13708 = vst [vmem:[#allocation37_spill] sm:$0xff] %v12580_v60  ;;  %13709 = vst [vmem:[#allocation38_spill] sm:$0xff] %v12582_v62 }
 0x3a2   : > { %4749 = vmatpush1.bf16.msra.mxu0 %v13688_v63  ;;  %4802 = vmatpush1.bf16.msra.mxu1 %v13689_v17  ;;  %v4895_v63 = vld [vmem:[#allocation2 + $0x60] sm:$0xfe] }
 0x3a3   : > { %4750 = vmatprep.subr.bf16.mxu0 %v13690_v25  ;;  %4803 = vmatprep.subr.bf16.mxu1 %v13691_v57  ;;  %v12586_v17 = vld [vmem:[#allocation8 + $0x580] ss:$16 sps:$4 sm:$0xff]   ;;  %v12588_v25 = vld [vmem:[#allocation8 + $0x588] ss:$16 sps:$4 sm:$0xff]  }
 0x3a4   : > { %13710 = vst [vmem:[#allocation39_spill] sm:$0xff] %v12586_v17  ;;  %13711 = vst [vmem:[#allocation40_spill] sm:$0xff] %v12588_v25  ;;  %v4896_v57 = vld [vmem:[#allocation2 + $0x68] sm:$0xfe] }
 0x3a6   : > { %4751 = vmatpush1.bf16.msra.mxu0 %v13692_v61  ;;  %4804 = vmatpush1.bf16.msra.mxu1 %v13693_v44  ;;  %v12592_v61 = vld [vmem:[#allocation8 + $0x5a4] ss:$16 sps:$4 sm:$0xff]   ;;  %v12594_v44 = vld [vmem:[#allocation8 + $0x5ac] ss:$16 sps:$4 sm:$0xff]  }
 0x3a7   : > { %5323 = vmatprep.subr.bf16.mxu0 %v12428_v18  ;;  %5376 = vmatprep.subr.bf16.mxu1 %v12430_v26  ;;  %13712 = vst [vmem:[#allocation41_spill] sm:$0xff] %v12592_v61  ;;  %13713 = vst [vmem:[#allocation42_spill] sm:$0xff] %v12594_v44 }
 0x3a9   : > { %4753 = vmatmul.mubr.bf16.vlgmr.msra.gmra.mrb[40].mxu0 %v13694_v29  ;;  %4806 = vmatmul.mubr.bf16.vlgmr.msra.gmra.mrb[40].mxu1 %v13694_v29  ;;  %v4891_v29 = vld [vmem:[#allocation2 + $0x20] sm:$0xfe] }
 0x3aa   : > { %4762 = vmatprep.mubr.bf16.mxu0 %v13695_v49  ;;  %4815 = vmatprep.mubr.bf16.mxu1 %v13695_v49  ;;  %v4892_v49 = vld [vmem:[#allocation2 + $0x28] sm:$0xfe] }
 0x3ab   : > { %5324 = vmatpush1.bf16.msra.mxu0 %v12434_v21  ;;  %5377 = vmatpush1.bf16.msra.mxu1 %v12437_v5 }
 0x3ac   : > { %5325 = vmatprep.subr.bf16.mxu0 %v12440_v45  ;;  %5378 = vmatprep.subr.bf16.mxu1 %v12442_v6 }
 0x3af   : > { %5326 = vmatpush1.bf16.msra.mxu0 %v12450_v22  ;;  %5379 = vmatpush1.bf16.msra.mxu1 %v12452_v30 }
 0x3b0   : > { %5327 = vmatprep.subr.bf16.mxu0 %v12456_v50  ;;  %5380 = vmatprep.subr.bf16.mxu1 %v12458_v7 }
 0x3b1   : > { %4763 = vmatmul.mubr.bf16.gmra.mrb[44].mxu0 %v13696_v24  ;;  %4816 = vmatmul.mubr.bf16.gmra.mrb[44].mxu1 %v13696_v24  ;;  %v9606_v24 = vpack.c.bf16 %v4896_v57, %v4895_v63  ;;  %v12610_v57 = vld [vmem:[#allocation8 + $0x5c0] ss:$16 sps:$4 sm:$0xff]  }
 0x3b2   : > { %5355 = vmatprep.mubr.bf16.mxu0 %v13697_v54  ;;  %5408 = vmatprep.mubr.bf16.mxu1 %v13697_v54  ;;  %v12598_v54 = vld [vmem:[#allocation8 + $0x5a0] ss:$16 sps:$4 sm:$0xff]  }
 0x3b3   : > { %5328 = vmatpush1.bf16.msra.mxu0 %v12462_v46  ;;  %5381 = vmatpush1.bf16.msra.mxu1 %v12464_v8  ;;  %13714 = vst [vmem:[#allocation43_spill] sm:$0xff] %v12598_v54  ;;  %v4965_v63 = vshll.u32 %v9606_v24, 16 }
 0x3b4   : > { %5329 = vmatprep.subr.bf16.mxu0 %v12468_v23  ;;  %5382 = vmatprep.subr.bf16.mxu1 %v12470_v55 }
 0x3b7   : > { %5330 = vmatpush1.bf16.msra.mxu0 %v12478_v37  ;;  %5383 = vmatpush1.bf16.msra.mxu1 %v12480_v48 }
 0x3b8   : > { %5331 = vmatprep.subr.bf16.mxu0 %v12484_v51  ;;  %5384 = vmatprep.subr.bf16.mxu1 %v12486_v11 }
 0x3bb   : > { %5332 = vmatpush1.bf16.msra.mxu0 %v12490_v39  ;;  %5385 = vmatpush1.bf16.msra.mxu1 %v12492_v9 }
 0x3bc   : > { %5333 = vmatprep.subr.bf16.mxu0 %v12496_v35  ;;  %5386 = vmatprep.subr.bf16.mxu1 %v12498_v42 }
 0x3bf   : > { %5334 = vmatpush1.bf16.msra.mxu0 %v12502_v34  ;;  %5387 = vmatpush1.bf16.msra.mxu1 %v12504_v31 }
 0x3c0   : > { %5335 = vmatprep.subr.bf16.mxu0 %v12508_v41  ;;  %5388 = vmatprep.subr.bf16.mxu1 %v12510_v32 }
 0x3c3   : > { %5336 = vmatpush1.bf16.msra.mxu0 %v12514_v36  ;;  %5389 = vmatpush1.bf16.msra.mxu1 %v12516_v58 }
 0x3c4   : > { %5337 = vmatprep.subr.bf16.mxu0 %v12520_v38  ;;  %5390 = vmatprep.subr.bf16.mxu1 %v12522_v15 }
 0x3c7   : > { %5338 = vmatpush1.bf16.msra.mxu0 %v12526_v2  ;;  %5391 = vmatpush1.bf16.msra.mxu1 %v12528_v52 }
 0x3c8   : > { %5339 = vmatprep.subr.bf16.mxu0 %v12532_v10  ;;  %5392 = vmatprep.subr.bf16.mxu1 %v12534_v3 }
 0x3cb   : > { %5340 = vmatpush1.bf16.msra.mxu0 %v12538_v16  ;;  %5393 = vmatpush1.bf16.msra.mxu1 %v12540_v12 }
 0x3cc   : > { %5341 = vmatprep.subr.bf16.mxu0 %v12544_v28  ;;  %5394 = vmatprep.subr.bf16.mxu1 %v12546_v1 }
 0x3cf   : > { %5342 = vmatpush1.bf16.msra.mxu0 %v12550_v13  ;;  %5395 = vmatpush1.bf16.msra.mxu1 %v12552_v14 }
 0x3d0   : > { %5343 = vmatprep.subr.bf16.mxu0 %v12556_v0  ;;  %5396 = vmatprep.subr.bf16.mxu1 %v12558_v40  ;;  %v12622_v40 = vld [vmem:[#allocation8 + $0x5e0] ss:$16 sps:$4 sm:$0xff]  }
 0x3d3   : > { %5344 = vmatpush1.bf16.msra.mxu0 %v12562_v56  ;;  %5397 = vmatpush1.bf16.msra.mxu1 %v12564_v19  ;;  %v4894_v19 = vld [vmem:[#allocation2 + $0x38] sm:$0x1] }
 0x3d4   : > { %5345 = vmatprep.subr.bf16.mxu0 %v12568_v43  ;;  %5398 = vmatprep.subr.bf16.mxu1 %v12570_v59  ;;  %v4897_v59 = vld [vmem:[#allocation2 + $0x70] sm:$0x1]  ;;  %v4962_v43 = vshrl.u32 %v9606_v24, 16 }
 0x3d5   : > { %v4893_v24 = vld [vmem:[#allocation2 + $0x30] sm:$0x1] }
 0x3d6   : > { %v4964_v56 = vrot.slane %v4962_v43, 4 }
 0x3d7   : > { %5346 = vmatpush1.bf16.msra.mxu0 %v12574_v4  ;;  %5399 = vmatpush1.bf16.msra.mxu1 %v12576_v20  ;;  %v12600_v20 = vld [vmem:[#allocation8 + $0x5a8] ss:$16 sps:$4 sm:$0xff]   ;;  %v9604_v4 = vpack.c.bf16 %v4892_v49, %v4891_v29 }
 0x3d8   : > { %5347 = vmatprep.subr.bf16.mxu0 %v12580_v60  ;;  %5400 = vmatprep.subr.bf16.mxu1 %v12582_v62  ;;  %13715 = vst [vmem:[#allocation44_spill] sm:$0xff] %v12600_v20  ;;  %v12604_v62 = vld [vmem:[#allocation8 + $0x5c4] ss:$16 sps:$4 sm:$0xff]   ;;  %v12606_v60 = vld [vmem:[#allocation8 + $0x5cc] ss:$16 sps:$4 sm:$0xff]  }
 0x3d9   : > { %13716 = vst [vmem:[#allocation45_spill] sm:$0xff] %v12604_v62  ;;  %13717 = vst [vmem:[#allocation46_spill] sm:$0xff] %v12606_v60  ;;  %v4948_v29 = vshrl.u32 %v9604_v4, 16  ;;  %v4951_v49 = vshll.u32 %v9604_v4, 16 }
 0x3db   : > { %5348 = vmatpush1.bf16.msra.mxu0 %v12586_v17  ;;  %5401 = vmatpush1.bf16.msra.mxu1 %v12588_v25  ;;  %v12612_v25 = vld [vmem:[#allocation8 + $0x5c8] ss:$16 sps:$4 sm:$0xff]   ;;  %v4898_v17 = vld [vmem:[#allocation2 + $0x78] sm:$0x1]  ;;  %v4950_v0 = vrot.slane %v4948_v29, 4  ;;  %v4953_v4 = vrot.slane %v4951_v49, 5 }
 0x3dc   : > { %5349 = vmatprep.subr.bf16.mxu0 %v12592_v61  ;;  %5402 = vmatprep.subr.bf16.mxu1 %v12594_v44  ;;  %v12616_v44 = vld [vmem:[#allocation8 + $0x5e4] ss:$16 sps:$4 sm:$0xff]   ;;  %v12618_v61 = vld [vmem:[#allocation8 + $0x5ec] ss:$16 sps:$4 sm:$0xff]  }
 0x3dd   : > { %v4954_v43 = vor.u32 %v4953_v4, %v4950_v0  ;;  %v12714_v4 = vld [vmem:[#allocation8 + $0x60c] ss:$16 sps:$4 sm:$0xff]  }
 0x3df   : > { %5350 = vmatpush1.bf16.msra.mxu0 %v12598_v54  ;;  %5403 = vmatpush1.bf16.msra.mxu1 %v12600_v20  ;;  %v9607_v54 = vpack.c.bf16 %v4898_v17, %v4897_v59  ;;  %v4967_v20 = vrot.slane %v4965_v63, 5  ;;  %v13735_v0 = vld [vmem:[#allocation44_spill] sm:$0xff] }
 0x3e0   : > { %5351 = vmatprep.subr.bf16.mxu0 %v12604_v62  ;;  %5404 = vmatprep.subr.bf16.mxu1 %v12606_v60  ;;  %v12624_v62 = vld [vmem:[#allocation8 + $0x5e8] ss:$16 sps:$4 sm:$0xff]   ;;  %v9605_v60 = vpack.c.bf16 %v4894_v19, %v4893_v24  ;;  %v12712_v24 = vld [vmem:[#allocation8 + $0x604] ss:$16 sps:$4 sm:$0xff]  }
 0x3e1   : > { %v4968_v14 = vor.u32 %v4967_v20, %v4964_v56  ;;  %v4971_v13 = vshll.u32 %v9607_v54, 16  ;;  %v4955_v56 = vrot.slane %v4954_v43, 4  ;;  %v13736_v20 = vld [vmem:[#allocation45_spill] sm:$0xff] }
 0x3e2   : > { %v4957_v59 = vshll.u32 %v9605_v60, 16  ;;  %v13737_v60 = vld [vmem:[#allocation46_spill] sm:$0xff] }
 0x3e3   : > { %5352 = vmatpush1.bf16.msra.mxu0 %v12610_v57  ;;  %5405 = vmatpush1.bf16.msra.mxu1 %v12612_v25  ;;  %v4969_v17 = vrot.slane %v4968_v14, 4  ;;  %v4973_v19 = vrot.slane %v4971_v13, 5  ;;  %v13734_v14 = vld [vmem:[#allocation43_spill] sm:$0xff] }
 0x3e4   : > { %5353 = vmatprep.subr.bf16.mxu0 %v12616_v44  ;;  %5406 = vmatprep.subr.bf16.mxu1 %v12618_v61 }
 0x3e7   : > { %5354 = vmatpush1.bf16.msra.mxu0 %v12622_v40  ;;  %5407 = vmatpush1.bf16.msra.mxu1 %v12624_v62 }
 0x3e8   : > { %5461 = vmatprep.subr.bf16.mxu0 %v12428_v18  ;;  %5514 = vmatprep.subr.bf16.mxu1 %v12430_v26  ;;  %v4959_v18 = vrot.slane %v4957_v59, 5  ;;  %v12642_v26 = vsel %vm12330_vm4, %v4969_v17, %v4973_v19 }
 0x3ea   : > { %5356 = vmatmul.mubr.bf16.vlgmr.msra.gmra.mrb[32].mxu0 %v12352_v53  ;;  %5409 = vmatmul.mubr.bf16.vlgmr.msra.gmra.mrb[32].mxu1 %v12352_v53  ;;  %v12648_v53 = vsel %vm12330_vm4, %v4955_v56, %v4959_v18  ;;  %v12746_v56 = vld [vmem:[#allocation8 + $0x628] ss:$16 sps:$4 sm:$0xff]   ;;  %v12750_v18 = vld [vmem:[#allocation8 + $0x644] ss:$16 sps:$4 sm:$0xff]  }
 0x3eb   : > { %5365 = vmatprep.mubr.bf16.mxu0 %v12356_v27  ;;  %5418 = vmatprep.mubr.bf16.mxu1 %v12356_v27  ;;  %v12654_v27 = vcombine.high %v12648_v53, %v12642_v26 }
 0x3ec   : > { %5462 = vmatpush1.bf16.msra.mxu0 %v12434_v21  ;;  %5515 = vmatpush1.bf16.msra.mxu1 %v12437_v5  ;;  %v13719_v21 = vld [vmem:[#allocation28_spill] sm:$0xff] }
 0x3ed   : > { %5463 = vmatprep.subr.bf16.mxu0 %v12440_v45  ;;  %5516 = vmatprep.subr.bf16.mxu1 %v12442_v6  ;;  %v4903_v5 = vld [vmem:[#allocation2 + $0xe0] sm:$0xfe]  ;;  %v4904_v45 = vld [vmem:[#allocation2 + $0xe8] sm:$0xfe] }
 0x3ee   : > { %v13720_v6 = vld [vmem:[#allocation29_spill] sm:$0xff] }
 0x3f0   : > { %5464 = vmatpush1.bf16.msra.mxu0 %v12450_v22  ;;  %5517 = vmatpush1.bf16.msra.mxu1 %v12452_v30  ;;  %v13721_v22 = vld [vmem:[#allocation30_spill] sm:$0xff]  ;;  %v4899_v30 = vld [vmem:[#allocation2 + $0xa0] sm:$0xfe] }
 0x3f1   : > { %5465 = vmatprep.subr.bf16.mxu0 %v12456_v50  ;;  %5518 = vmatprep.subr.bf16.mxu1 %v12458_v7  ;;  %v4900_v50 = vld [vmem:[#allocation2 + $0xa8] sm:$0xfe]  ;;  %v9610_v7 = vpack.c.bf16 %v4904_v45, %v4903_v5  ;;  %v12766_v45 = vld [vmem:[#allocation8 + $0x66c] ss:$16 sps:$4 sm:$0xff]  }
 0x3f2   : > { %5366 = vmatmul.mubr.bf16.gmra.mrb[36].mxu0 %v12368_v47  ;;  %5419 = vmatmul.mubr.bf16.gmra.mrb[36].mxu1 %v12368_v47  ;;  %v13718_v47 = vld [vmem:[#allocation27_spill] sm:$0xff] }
 0x3f3   : > { %5493 = vmatprep.mubr.bf16.mxu0 %v12654_v27  ;;  %5546 = vmatprep.mubr.bf16.mxu1 %v12654_v27  ;;  %v12764_v5 = vld [vmem:[#allocation8 + $0x664] ss:$16 sps:$4 sm:$0xff]  }
 0x3f4   : > { %5466 = vmatpush1.bf16.msra.mxu0 %v12462_v46  ;;  %5519 = vmatpush1.bf16.msra.mxu1 %v12464_v8  ;;  %v13722_v46 = vld [vmem:[#allocation31_spill] sm:$0xff]  ;;  %v13723_v8 = vld [vmem:[#allocation32_spill] sm:$0xff] }
 0x3f5   : > { %5467 = vmatprep.subr.bf16.mxu0 %v12468_v23  ;;  %5520 = vmatprep.subr.bf16.mxu1 %v12470_v55  ;;  %v13724_v23 = vld [vmem:[#allocation33_spill] sm:$0xff]  ;;  %v13725_v55 = vld [vmem:[#allocation34_spill] sm:$0xff] }
 0x3f8   : > { %5468 = vmatpush1.bf16.msra.mxu0 %v12478_v37  ;;  %5521 = vmatpush1.bf16.msra.mxu1 %v12480_v48  ;;  %v9608_v37 = vpack.c.bf16 %v4900_v50, %v4899_v30  ;;  %v4990_v48 = vshrl.u32 %v9610_v7, 16  ;;  %v12780_v30 = vld [vmem:[#allocation8 + $0x684] ss:$16 sps:$4 sm:$0xff]   ;;  %v12782_v50 = vld [vmem:[#allocation8 + $0x68c] ss:$16 sps:$4 sm:$0xff]  }
 0x3f9   : > { %5469 = vmatprep.subr.bf16.mxu0 %v12484_v51  ;;  %5522 = vmatprep.subr.bf16.mxu1 %v12486_v11  ;;  %v4993_v51 = vshll.u32 %v9610_v7, 16  ;;  %v13726_v11 = vld [vmem:[#allocation35_spill] sm:$0xff]  ;;  %v12788_v7 = vld [vmem:[#allocation8 + $0x688] ss:$16 sps:$4 sm:$0xff]  }
 0x3fc   : > { %5470 = vmatpush1.bf16.msra.mxu0 %v12490_v39  ;;  %5523 = vmatpush1.bf16.msra.mxu1 %v12492_v9  ;;  %v13727_v39 = vld [vmem:[#allocation36_spill] sm:$0xff]  ;;  %v4905_v9 = vld [vmem:[#allocation2 + $0xf0] sm:$0x1] }
 0x3fd   : > { %5471 = vmatprep.subr.bf16.mxu0 %v12496_v35  ;;  %5524 = vmatprep.subr.bf16.mxu1 %v12498_v42  ;;  %v4906_v35 = vld [vmem:[#allocation2 + $0xf8] sm:$0x1]  ;;  %v13728_v42 = vld [vmem:[#allocation37_spill] sm:$0xff] }
 0x400   : > { %5472 = vmatpush1.bf16.msra.mxu0 %v12502_v34  ;;  %5525 = vmatpush1.bf16.msra.mxu1 %v12504_v31  ;;  %v13729_v34 = vld [vmem:[#allocation38_spill] sm:$0xff]  ;;  %v4976_v31 = vshrl.u32 %v9608_v37, 16 }
 0x401   : > { %5473 = vmatprep.subr.bf16.mxu0 %v12508_v41  ;;  %5526 = vmatprep.subr.bf16.mxu1 %v12510_v32  ;;  %v4979_v41 = vshll.u32 %v9608_v37, 16  ;;  %v4901_v32 = vld [vmem:[#allocation2 + $0xb0] sm:$0x1]  ;;  %v12804_v37 = vld [vmem:[#allocation8 + $0x6c4] ss:$16 sps:$4 sm:$0xff]  }
 0x404   : > { %5474 = vmatpush1.bf16.msra.mxu0 %v12514_v36  ;;  %5527 = vmatpush1.bf16.msra.mxu1 %v12516_v58  ;;  %v4902_v36 = vld [vmem:[#allocation2 + $0xb8] sm:$0x1]  ;;  %v9611_v58 = vpack.c.bf16 %v4906_v35, %v4905_v9  ;;  %v12818_v9 = vld [vmem:[#allocation8 + $0x6ec] ss:$16 sps:$4 sm:$0xff]   ;;  %v12822_v35 = vld [vmem:[#allocation8 + $0x6e0] ss:$16 sps:$4 sm:$0xff]  }
 0x405   : > { %5475 = vmatprep.subr.bf16.mxu0 %v12520_v38  ;;  %5528 = vmatprep.subr.bf16.mxu1 %v12522_v15  ;;  %v4992_v38 = vrot.slane %v4990_v48, 4  ;;  %v4995_v15 = vrot.slane %v4993_v51, 5  ;;  %v12806_v48 = vld [vmem:[#allocation8 + $0x6cc] ss:$16 sps:$4 sm:$0xff]   ;;  %v12810_v51 = vld [vmem:[#allocation8 + $0x6c0] ss:$16 sps:$4 sm:$0xff]  }
 0x406   : > { %v4999_v13 = vshll.u32 %v9611_v58, 16  ;;  %v12842_v58 = vld [vmem:[#allocation8 + $0x72c] ss:$16 sps:$4 sm:$0xff]  }
 0x408   : > { %5476 = vmatpush1.bf16.msra.mxu0 %v12526_v2  ;;  %5529 = vmatpush1.bf16.msra.mxu1 %v12528_v52  ;;  %v13730_v2 = vld [vmem:[#allocation39_spill] sm:$0xff]  ;;  %v13731_v52 = vld [vmem:[#allocation40_spill] sm:$0xff]  ;;  %v5001_v49 = vrot.slane %v4999_v13, 5 }
 0x409   : > { %5477 = vmatprep.subr.bf16.mxu0 %v12532_v10  ;;  %5530 = vmatprep.subr.bf16.mxu1 %v12534_v3  ;;  %v13732_v10 = vld [vmem:[#allocation41_spill] sm:$0xff]  ;;  %v13733_v3 = vld [vmem:[#allocation42_spill] sm:$0xff] }
 0x40a   : > { %v12876_v13 = vld [vmem:[#allocation8 + $0x784] ss:$16 sps:$4 sm:$0xff]  }
 0x40b   : > { %13741 = vst [vmem:[#allocation50_spill] sm:$0xff] %v12876_v13 }
 0x40c   : > { %5478 = vmatpush1.bf16.msra.mxu0 %v12538_v16  ;;  %5531 = vmatpush1.bf16.msra.mxu1 %v12540_v12  ;;  %v9609_v16 = vpack.c.bf16 %v4902_v36, %v4901_v32  ;;  %v4978_v12 = vrot.slane %v4976_v31, 4  ;;  %v12830_v31 = vld [vmem:[#allocation8 + $0x70c] ss:$16 sps:$4 sm:$0xff]   ;;  %v12836_v32 = vld [vmem:[#allocation8 + $0x708] ss:$16 sps:$4 sm:$0xff]  }
 0x40d   : > { %5479 = vmatprep.subr.bf16.mxu0 %v12544_v28  ;;  %5532 = vmatprep.subr.bf16.mxu1 %v12546_v1  ;;  %v4981_v28 = vrot.slane %v4979_v41, 5  ;;  %v4996_v1 = vor.u32 %v4995_v15, %v4992_v38  ;;  %v12834_v41 = vld [vmem:[#allocation8 + $0x700] ss:$16 sps:$4 sm:$0xff]   ;;  %v12840_v36 = vld [vmem:[#allocation8 + $0x724] ss:$16 sps:$4 sm:$0xff]  }
 0x40e   : > { %v4985_v63 = vshll.u32 %v9609_v16, 16  ;;  %v12846_v38 = vld [vmem:[#allocation8 + $0x720] ss:$16 sps:$4 sm:$0xff]   ;;  %v12848_v15 = vld [vmem:[#allocation8 + $0x728] ss:$16 sps:$4 sm:$0xff]  }
 0x40f   : > { %v4982_v54 = vor.u32 %v4981_v28, %v4978_v12  ;;  %v4997_v29 = vrot.slane %v4996_v1, 4  ;;  %v12864_v16 = vld [vmem:[#allocation8 + $0x764] ss:$16 sps:$4 sm:$0xff]   ;;  %v12866_v12 = vld [vmem:[#allocation8 + $0x76c] ss:$16 sps:$4 sm:$0xff]  }
 0x410   : > { %5480 = vmatpush1.bf16.msra.mxu0 %v13718_v47  ;;  %5533 = vmatpush1.bf16.msra.mxu1 %v13719_v21  ;;  %v4987_v59 = vrot.slane %v4985_v63, 5  ;;  %v12758_v47 = vld [vmem:[#allocation8 + $0x640] ss:$16 sps:$4 sm:$0xff]   ;;  %v12760_v21 = vld [vmem:[#allocation8 + $0x648] ss:$16 sps:$4 sm:$0xff]   ;;  %13738 = vst [vmem:[#allocation47_spill] sm:$0xff] %v12866_v12 }
 0x411   : > { %5481 = vmatprep.subr.bf16.mxu0 %v13720_v6  ;;  %5534 = vmatprep.subr.bf16.mxu1 %v13721_v22  ;;  %v4983_v43 = vrot.slane %v4982_v54, 4  ;;  %v5002_v17 = vsel %vm12330_vm4, %v4997_v29, %v5001_v49  ;;  %v12774_v6 = vld [vmem:[#allocation8 + $0x660] ss:$16 sps:$4 sm:$0xff]   ;;  %v12776_v22 = vld [vmem:[#allocation8 + $0x668] ss:$16 sps:$4 sm:$0xff]  }
 0x412   : > { %v12870_v28 = vld [vmem:[#allocation8 + $0x760] ss:$16 sps:$4 sm:$0xff]   ;;  %v12872_v1 = vld [vmem:[#allocation8 + $0x768] ss:$16 sps:$4 sm:$0xff]   ;;  %v12890_v54 = vld [vmem:[#allocation8 + $0x7ac] ss:$16 sps:$4 sm:$0xff]  }
 0x413   : > { %13739 = vst [vmem:[#allocation48_spill] sm:$0xff] %v12870_v28  ;;  %13740 = vst [vmem:[#allocation49_spill] sm:$0xff] %v12872_v1  ;;  %v12894_v63 = vld [vmem:[#allocation8 + $0x7a0] ss:$16 sps:$4 sm:$0xff]   ;;  %v12896_v29 = vld [vmem:[#allocation8 + $0x7a8] ss:$16 sps:$4 sm:$0xff]  }
 0x414   : > { %5482 = vmatpush1.bf16.msra.mxu0 %v13722_v46  ;;  %5535 = vmatpush1.bf16.msra.mxu1 %v13723_v8  ;;  %v12792_v46 = vld [vmem:[#allocation8 + $0x6a4] ss:$16 sps:$4 sm:$0xff]   ;;  %v12794_v8 = vld [vmem:[#allocation8 + $0x6ac] ss:$16 sps:$4 sm:$0xff]   ;;  %13746 = vst [vmem:[#allocation27_spill] sm:$0xff] %v12890_v54  ;;  %13747 = vst [vmem:[#allocation28_spill] sm:$0xff] %v12894_v63 }
 0x415   : > { %5483 = vmatprep.subr.bf16.mxu0 %v13724_v23  ;;  %5536 = vmatprep.subr.bf16.mxu1 %v13725_v55  ;;  %v12798_v23 = vld [vmem:[#allocation8 + $0x6a0] ss:$16 sps:$4 sm:$0xff]   ;;  %v12800_v55 = vld [vmem:[#allocation8 + $0x6a8] ss:$16 sps:$4 sm:$0xff]   ;;  %13748 = vst [vmem:[#allocation29_spill] sm:$0xff] %v12896_v29 }
 0x416   : > { %v12900_v49 = vld [vmem:[#allocation8 + $0x7c4] ss:$16 sps:$4 sm:$0xff]  }
 0x417   : > { %13749 = vst [vmem:[#allocation30_spill] sm:$0xff] %v12900_v49 }
 0x418   : > { %5484 = vmatpush1.bf16.msra.mxu0 %v13726_v11  ;;  %5537 = vmatpush1.bf16.msra.mxu1 %v13727_v39  ;;  %v12812_v11 = vld [vmem:[#allocation8 + $0x6c8] ss:$16 sps:$4 sm:$0xff]   ;;  %v12816_v39 = vld [vmem:[#allocation8 + $0x6e4] ss:$16 sps:$4 sm:$0xff]  }
 0x419   : > { %5485 = vmatprep.subr.bf16.mxu0 %v13728_v42  ;;  %5538 = vmatprep.subr.bf16.mxu1 %v13729_v34  ;;  %v12824_v42 = vld [vmem:[#allocation8 + $0x6e8] ss:$16 sps:$4 sm:$0xff]   ;;  %v12828_v34 = vld [vmem:[#allocation8 + $0x704] ss:$16 sps:$4 sm:$0xff]  }
 0x41c   : > { %5486 = vmatpush1.bf16.msra.mxu0 %v13730_v2  ;;  %5539 = vmatpush1.bf16.msra.mxu1 %v13731_v52  ;;  %v12852_v2 = vld [vmem:[#allocation8 + $0x744] ss:$16 sps:$4 sm:$0xff]   ;;  %v12854_v52 = vld [vmem:[#allocation8 + $0x74c] ss:$16 sps:$4 sm:$0xff]  }
 0x41d   : > { %5487 = vmatprep.subr.bf16.mxu0 %v13732_v10  ;;  %5540 = vmatprep.subr.bf16.mxu1 %v13733_v3  ;;  %v12858_v10 = vld [vmem:[#allocation8 + $0x740] ss:$16 sps:$4 sm:$0xff]   ;;  %v12860_v3 = vld [vmem:[#allocation8 + $0x748] ss:$16 sps:$4 sm:$0xff]  }
 0x420   : > { %5488 = vmatpush1.bf16.msra.mxu0 %v13734_v14  ;;  %5541 = vmatpush1.bf16.msra.mxu1 %v13735_v0  ;;  %v12878_v14 = vld [vmem:[#allocation8 + $0x78c] ss:$16 sps:$4 sm:$0xff]   ;;  %v12882_v0 = vld [vmem:[#allocation8 + $0x780] ss:$16 sps:$4 sm:$0xff]  }
 0x421   : > { %5489 = vmatprep.subr.bf16.mxu0 %v13736_v20  ;;  %5542 = vmatprep.subr.bf16.mxu1 %v13737_v60  ;;  %13742 = vst [vmem:[#allocation24_spill] sm:$0xff] %v12878_v14  ;;  %13743 = vst [vmem:[#allocation25_spill] sm:$0xff] %v12882_v0  ;;  %v12884_v20 = vld [vmem:[#allocation8 + $0x788] ss:$16 sps:$4 sm:$0xff]   ;;  %v12888_v60 = vld [vmem:[#allocation8 + $0x7a4] ss:$16 sps:$4 sm:$0xff]  }
 0x422   : > { %13744 = vst [vmem:[#allocation26_spill] sm:$0xff] %v12884_v20  ;;  %13745 = vst [vmem:[#allocation51_spill] sm:$0xff] %v12888_v60 }
 0x424   : > { %5490 = vmatpush1.bf16.msra.mxu0 %v12610_v57  ;;  %5543 = vmatpush1.bf16.msra.mxu1 %v12612_v25  ;;  %v12722_v25 = vcombine.low %v12648_v53, %v12642_v26  ;;  %v4988_v57 = vsel %vm12330_vm4, %v4983_v43, %v4987_v59  ;;  %v12752_v26 = vld [vmem:[#allocation8 + $0x64c] ss:$16 sps:$4 sm:$0xff]   ;;  %v12906_v59 = vld [vmem:[#allocation8 + $0x7c0] ss:$16 sps:$4 sm:$0xff]  }
 0x425   : > { %5491 = vmatprep.subr.bf16.mxu0 %v12616_v44  ;;  %5544 = vmatprep.subr.bf16.mxu1 %v12618_v61  ;;  %v12724_v44 = vld [vmem:[#allocation8 + $0x600] ss:$16 sps:$4 sm:$0xff]   ;;  %v12727_v61 = vld [vmem:[#allocation8 + $0x608] ss:$16 sps:$4 sm:$0xff]   ;;  %v12732_v19 = vcombine.high %v4988_v57, %v5002_v17  ;;  %v12756_v53 = vcombine.low %v4988_v57, %v5002_v17  ;;  %v12902_v43 = vld [vmem:[#allocation8 + $0x7cc] ss:$16 sps:$4 sm:$0xff]  }
 0x426   : > { %13750 = vst [vmem:[#allocation31_spill] sm:$0xff] %v12902_v43  ;;  %13751 = vst [vmem:[#allocation32_spill] sm:$0xff] %v12906_v59  ;;  %v12908_v17 = vld [vmem:[#allocation8 + $0x7c8] ss:$16 sps:$4 sm:$0xff]   ;;  %v12912_v57 = vld [vmem:[#allocation8 + $0x7e4] ss:$16 sps:$4 sm:$0xff]  }
 0x427   : > { %13752 = vst [vmem:[#allocation33_spill] sm:$0xff] %v12908_v17  ;;  %13753 = vst [vmem:[#allocation34_spill] sm:$0xff] %v12912_v57 }
 0x428   : > { %5492 = vmatpush1.bf16.msra.mxu0 %v12622_v40  ;;  %5545 = vmatpush1.bf16.msra.mxu1 %v12624_v62  ;;  %v12734_v40 = vld [vmem:[#allocation8 + $0x624] ss:$16 sps:$4 sm:$0xff]   ;;  %v12736_v62 = vld [vmem:[#allocation8 + $0x62c] ss:$16 sps:$4 sm:$0xff]  }
 0x429   : > { %6043 = vmatprep.subr.bf16.mxu0 %v12712_v24  ;;  %6096 = vmatprep.subr.bf16.mxu1 %v12714_v4 }
 0x42b   : > { %5494 = vmatmul.mubr.bf16.vlgmr.msra.gmra.mrb[40].mxu0 %v12722_v25  ;;  %5547 = vmatmul.mubr.bf16.vlgmr.msra.gmra.mrb[40].mxu1 %v12722_v25 }
 0x42c   : > { %5503 = vmatprep.mubr.bf16.mxu0 %v12732_v19  ;;  %5556 = vmatprep.mubr.bf16.mxu1 %v12732_v19 }
 0x42d   : > { %6044 = vmatpush1.bf16.msra.mxu0 %v12724_v44  ;;  %6097 = vmatpush1.bf16.msra.mxu1 %v12727_v61 }
 0x42e   : > { %6045 = vmatprep.subr.bf16.mxu0 %v12734_v40  ;;  %6098 = vmatprep.subr.bf16.mxu1 %v12736_v62 }
 0x431   : > { %6046 = vmatpush1.bf16.msra.mxu0 %v12744_v33  ;;  %6099 = vmatpush1.bf16.msra.mxu1 %v12746_v56 }
 0x432   : > { %6047 = vmatprep.subr.bf16.mxu0 %v12750_v18  ;;  %6100 = vmatprep.subr.bf16.mxu1 %v12752_v26 }
 0x433   : > { %5504 = vmatmul.mubr.bf16.gmra.mrb[44].mxu0 %v12756_v53  ;;  %5557 = vmatmul.mubr.bf16.gmra.mrb[44].mxu1 %v12756_v53 }
 0x434   : > { %6075 = vmatprep.mubr.bf16.mxu0 %v12654_v27  ;;  %6128 = vmatprep.mubr.bf16.mxu1 %v12654_v27  ;;  %v12786_v27 = vld [vmem:[#allocation8 + $0x680] ss:$16 sps:$4 sm:$0xff]  }
 0x435   : > { %6048 = vmatpush1.bf16.msra.mxu0 %v12758_v47  ;;  %6101 = vmatpush1.bf16.msra.mxu1 %v12760_v21 }
 0x436   : > { %6049 = vmatprep.subr.bf16.mxu0 %v12764_v5  ;;  %6102 = vmatprep.subr.bf16.mxu1 %v12766_v45 }
 0x439   : > { %6050 = vmatpush1.bf16.msra.mxu0 %v12774_v6  ;;  %6103 = vmatpush1.bf16.msra.mxu1 %v12776_v22 }
 0x43a   : > { %6051 = vmatprep.subr.bf16.mxu0 %v12780_v30  ;;  %6104 = vmatprep.subr.bf16.mxu1 %v12782_v50 }
 0x43d   : > { %6052 = vmatpush1.bf16.msra.mxu0 %v12786_v27  ;;  %6105 = vmatpush1.bf16.msra.mxu1 %v12788_v7 }
 0x43e   : > { %6053 = vmatprep.subr.bf16.mxu0 %v12792_v46  ;;  %6106 = vmatprep.subr.bf16.mxu1 %v12794_v8 }
 0x441   : > { %6054 = vmatpush1.bf16.msra.mxu0 %v12798_v23  ;;  %6107 = vmatpush1.bf16.msra.mxu1 %v12800_v55 }
 0x442   : > { %6055 = vmatprep.subr.bf16.mxu0 %v12804_v37  ;;  %6108 = vmatprep.subr.bf16.mxu1 %v12806_v48 }
 0x445   : > { %6056 = vmatpush1.bf16.msra.mxu0 %v12810_v51  ;;  %6109 = vmatpush1.bf16.msra.mxu1 %v12812_v11 }
 0x446   : > { %6057 = vmatprep.subr.bf16.mxu0 %v12816_v39  ;;  %6110 = vmatprep.subr.bf16.mxu1 %v12818_v9 }
 0x449   : > { %6058 = vmatpush1.bf16.msra.mxu0 %v12822_v35  ;;  %6111 = vmatpush1.bf16.msra.mxu1 %v12824_v42 }
 0x44a   : > { %6059 = vmatprep.subr.bf16.mxu0 %v12828_v34  ;;  %6112 = vmatprep.subr.bf16.mxu1 %v12830_v31 }
 0x44d   : > { %6060 = vmatpush1.bf16.msra.mxu0 %v12834_v41  ;;  %6113 = vmatpush1.bf16.msra.mxu1 %v12836_v32 }
 0x44e   : > { %6061 = vmatprep.subr.bf16.mxu0 %v12840_v36  ;;  %6114 = vmatprep.subr.bf16.mxu1 %v12842_v58 }
 0x451   : > { %6062 = vmatpush1.bf16.msra.mxu0 %v12846_v38  ;;  %6115 = vmatpush1.bf16.msra.mxu1 %v12848_v15 }
 0x452   : > { %6063 = vmatprep.subr.bf16.mxu0 %v12852_v2  ;;  %6116 = vmatprep.subr.bf16.mxu1 %v12854_v52 }
 0x455   : > { %6064 = vmatpush1.bf16.msra.mxu0 %v12858_v10  ;;  %6117 = vmatpush1.bf16.msra.mxu1 %v12860_v3 }
 0x456   : > { %6065 = vmatprep.subr.bf16.mxu0 %v12864_v16  ;;  %6118 = vmatprep.subr.bf16.mxu1 %v12866_v12 }
 0x459   : > { %6066 = vmatpush1.bf16.msra.mxu0 %v12870_v28  ;;  %6119 = vmatpush1.bf16.msra.mxu1 %v12872_v1  ;;  %v5651_v1 = vld [vmem:[#allocation2 + $0x18] sm:$0x3] }
 0x45a   : > { %6067 = vmatprep.subr.bf16.mxu0 %v12876_v13  ;;  %6120 = vmatprep.subr.bf16.mxu1 %v12878_v14  ;;  %v5653_v14 = vld [vmem:[#allocation2 + $0x48] sm:$0xfc] }
 0x45b   : > { %v5649_v13 = vld [vmem:[#allocation2 + $0x8] sm:$0xfc] }
 0x45d   : > { %6068 = vmatpush1.bf16.msra.mxu0 %v12882_v0  ;;  %6121 = vmatpush1.bf16.msra.mxu1 %v12884_v20  ;;  %v5654_v20 = vld [vmem:[#allocation2 + $0x50] sm:$0x3]  ;;  %v5655_v0 = vld [vmem:[#allocation2 + $0x58] sm:$0x3] }
 0x45e   : > { %6069 = vmatprep.subr.bf16.mxu0 %v12888_v60  ;;  %6122 = vmatprep.subr.bf16.mxu1 %v12890_v54  ;;  %v12914_v60 = vld [vmem:[#allocation8 + $0x7ec] ss:$16 sps:$4 sm:$0xff]   ;;  %v9615_v12 = vpack.c.bf16 %v5655_v0, %v5654_v20  ;;  %v13058_v20 = vld [vmem:[#allocation8 + $0x840] ss:$16 sps:$4 sm:$0xff]  }
 0x45f   : > { %13754 = vst [vmem:[#allocation35_spill] sm:$0xff] %v12914_v60  ;;  %v5652_v54 = vld [vmem:[#allocation2 + $0x40] sm:$0xfc] }
 0x460   : > { %v9614_v28 = vpack.c.bf16 %v5653_v14, %v5652_v54  ;;  %v13052_v14 = vld [vmem:[#allocation8 + $0x84c] ss:$16 sps:$4 sm:$0xff]   ;;  %v13064_v54 = vld [vmem:[#allocation8 + $0x864] ss:$16 sps:$4 sm:$0xff]  }
 0x461   : > { %6070 = vmatpush1.bf16.msra.mxu0 %v12894_v63  ;;  %6123 = vmatpush1.bf16.msra.mxu1 %v12896_v29  ;;  %v12918_v29 = vld [vmem:[#allocation8 + $0x7e0] ss:$16 sps:$4 sm:$0xff]   ;;  %v12920_v63 = vld [vmem:[#allocation8 + $0x7e8] ss:$16 sps:$4 sm:$0xff]  }
 0x462   : > { %6071 = vmatprep.subr.bf16.mxu0 %v12900_v49  ;;  %6124 = vmatprep.subr.bf16.mxu1 %v12902_v43  ;;  %v5650_v43 = vld [vmem:[#allocation2 + $0x10] sm:$0x3]  ;;  %v5648_v49 = vld [vmem:[#allocation2] sm:$0xfc] }
 0x465   : > { %6072 = vmatpush1.bf16.msra.mxu0 %v12906_v59  ;;  %6125 = vmatpush1.bf16.msra.mxu1 %v12908_v17  ;;  %v9612_v17 = vpack.c.bf16 %v5649_v13, %v5648_v49  ;;  %v9613_v59 = vpack.c.bf16 %v5651_v1, %v5650_v43  ;;  %v13046_v1 = vld [vmem:[#allocation8 + $0x828] ss:$16 sps:$4 sm:$0xff]   ;;  %v13050_v13 = vld [vmem:[#allocation8 + $0x844] ss:$16 sps:$4 sm:$0xff]  }
 0x466   : > { %6073 = vmatprep.subr.bf16.mxu0 %v12912_v57  ;;  %6126 = vmatprep.subr.bf16.mxu1 %v12914_v60  ;;  %v9287_v60 = vrot.slane %v9614_v28, 9  ;;  %v5713_v57 = vrot.slane %v9615_v12, 5  ;;  %v13044_v28 = vld [vmem:[#allocation8 + $0x820] ss:$16 sps:$4 sm:$0xff]   ;;  %v13076_v49 = vld [vmem:[#allocation8 + $0x868] ss:$16 sps:$4 sm:$0xff]  }
 0x467   : > { %v13080_v43 = vld [vmem:[#allocation8 + $0x884] ss:$16 sps:$4 sm:$0xff]  }
 0x468   : > { %v12942_v12 = vsel %vm12936_vm7, %v9287_v60, %v5713_v57  ;;  %v13060_v60 = vld [vmem:[#allocation8 + $0x848] ss:$16 sps:$4 sm:$0xff]  }
 0x469   : > { %6074 = vmatpush1.bf16.msra.mxu0 %v12918_v29  ;;  %6127 = vmatpush1.bf16.msra.mxu1 %v12920_v63  ;;  %v13088_v57 = vld [vmem:[#allocation8 + $0x888] ss:$16 sps:$4 sm:$0xff]  }
 0x46a   : > { %6181 = vmatprep.subr.bf16.mxu0 %v12712_v24  ;;  %6234 = vmatprep.subr.bf16.mxu1 %v12714_v4  ;;  %v9286_v24 = vrot.slane %v9612_v17, 9  ;;  %v5709_v4 = vrot.slane %v9613_v59, 5  ;;  %v13082_v59 = vld [vmem:[#allocation8 + $0x88c] ss:$16 sps:$4 sm:$0xff]   ;;  %v13086_v17 = vld [vmem:[#allocation8 + $0x880] ss:$16 sps:$4 sm:$0xff]  }
 0x46c   : > { %6076 = vmatmul.mubr.bf16.vlgmr.msra.gmra.mrb[32].mxu0 %v12722_v25  ;;  %6129 = vmatmul.mubr.bf16.vlgmr.msra.gmra.mrb[32].mxu1 %v12722_v25  ;;  %v10843_v25 = vld [vmem:[#allocation11 + $0x88] sm:$0xff]  }
 0x46d   : > { %6085 = vmatprep.mubr.bf16.mxu0 %v12732_v19  ;;  %6138 = vmatprep.mubr.bf16.mxu1 %v12732_v19  ;;  %v13757_v19 = vld [vmem:[#allocation47_spill] sm:$0xff] }
 0x46e   : > { %6182 = vmatpush1.bf16.msra.mxu0 %v12724_v44  ;;  %6235 = vmatpush1.bf16.msra.mxu1 %v12727_v61  ;;  %v12948_v44 = vsel %vm12936_vm7, %v9286_v24, %v5709_v4  ;;  %v13092_v24 = vld [vmem:[#allocation8 + $0x8a4] ss:$16 sps:$4 sm:$0xff]   ;;  %v13094_v4 = vld [vmem:[#allocation8 + $0x8ac] ss:$16 sps:$4 sm:$0xff]  }
 0x46f   : > { %6183 = vmatprep.subr.bf16.mxu0 %v12734_v40  ;;  %6236 = vmatprep.subr.bf16.mxu1 %v12736_v62  ;;  %v12954_v61 = vcombine.high %v12948_v44, %v12942_v12  ;;  %v13758_v40 = vld [vmem:[#allocation48_spill] sm:$0xff]  ;;  %v13759_v62 = vld [vmem:[#allocation49_spill] sm:$0xff] }
 0x472   : > { %6184 = vmatpush1.bf16.msra.mxu0 %v12744_v33  ;;  %6237 = vmatpush1.bf16.msra.mxu1 %v12746_v56  ;;  %v13760_v33 = vld [vmem:[#allocation50_spill] sm:$0xff]  ;;  %v13761_v56 = vld [vmem:[#allocation24_spill] sm:$0xff] }
 0x473   : > { %6185 = vmatprep.subr.bf16.mxu0 %v12750_v18  ;;  %6238 = vmatprep.subr.bf16.mxu1 %v12752_v26  ;;  %v5662_v18 = vld [vmem:[#allocation2 + $0xd0] sm:$0x3]  ;;  %v13762_v26 = vld [vmem:[#allocation25_spill] sm:$0xff] }
 0x474   : > { %6086 = vmatmul.mubr.bf16.gmra.mrb[36].mxu0 %v12756_v53  ;;  %6139 = vmatmul.mubr.bf16.gmra.mrb[36].mxu1 %v12756_v53  ;;  %v13763_v53 = vld [vmem:[#allocation26_spill] sm:$0xff] }
 0x475   : > { %6213 = vmatprep.mubr.bf16.mxu0 %v12954_v61  ;;  %6266 = vmatprep.mubr.bf16.mxu1 %v12954_v61 }
 0x476   : > { %6186 = vmatpush1.bf16.msra.mxu0 %v12758_v47  ;;  %6239 = vmatpush1.bf16.msra.mxu1 %v12760_v21  ;;  %v5660_v47 = vld [vmem:[#allocation2 + $0xc0] sm:$0xfc]  ;;  %v5661_v21 = vld [vmem:[#allocation2 + $0xc8] sm:$0xfc] }
 0x477   : > { %6187 = vmatprep.subr.bf16.mxu0 %v12764_v5  ;;  %6240 = vmatprep.subr.bf16.mxu1 %v12766_v45  ;;  %v5663_v5 = vld [vmem:[#allocation2 + $0xd8] sm:$0x3] }
 0x478   : > { %v13764_v45 = vld [vmem:[#allocation51_spill] sm:$0xff] }
 0x47a   : > { %6188 = vmatpush1.bf16.msra.mxu0 %v12774_v6  ;;  %6241 = vmatpush1.bf16.msra.mxu1 %v12776_v22  ;;  %v13765_v6 = vld [vmem:[#allocation27_spill] sm:$0xff]  ;;  %v5658_v22 = vld [vmem:[#allocation2 + $0x90] sm:$0x3] }
 0x47b   : > { %6189 = vmatprep.subr.bf16.mxu0 %v12780_v30  ;;  %6242 = vmatprep.subr.bf16.mxu1 %v12782_v50  ;;  %v5656_v30 = vld [vmem:[#allocation2 + $0x80] sm:$0xfc]  ;;  %v5657_v50 = vld [vmem:[#allocation2 + $0x88] sm:$0xfc] }
 0x47e   : > { %6190 = vmatpush1.bf16.msra.mxu0 %v12786_v27  ;;  %6243 = vmatpush1.bf16.msra.mxu1 %v12788_v7  ;;  %v5659_v27 = vld [vmem:[#allocation2 + $0x98] sm:$0x3]  ;;  %v9618_v7 = vpack.c.bf16 %v5661_v21, %v5660_v47  ;;  %v13130_v47 = vld [vmem:[#allocation8 + $0x90c] ss:$16 sps:$4 sm:$0xff]   ;;  %v13134_v21 = vld [vmem:[#allocation8 + $0x900] ss:$16 sps:$4 sm:$0xff]  }
 0x47f   : > { %6191 = vmatprep.subr.bf16.mxu0 %v12792_v46  ;;  %6244 = vmatprep.subr.bf16.mxu1 %v12794_v8  ;;  %v9619_v46 = vpack.c.bf16 %v5663_v5, %v5662_v18  ;;  %v13766_v8 = vld [vmem:[#allocation28_spill] sm:$0xff]  ;;  %v13122_v18 = vld [vmem:[#allocation8 + $0x8e0] ss:$16 sps:$4 sm:$0xff]  }
 0x480   : > { %v13136_v5 = vld [vmem:[#allocation8 + $0x908] ss:$16 sps:$4 sm:$0xff]  }
 0x482   : > { %6192 = vmatpush1.bf16.msra.mxu0 %v12798_v23  ;;  %6245 = vmatpush1.bf16.msra.mxu1 %v12800_v55  ;;  %v13767_v23 = vld [vmem:[#allocation29_spill] sm:$0xff]  ;;  %v13768_v55 = vld [vmem:[#allocation30_spill] sm:$0xff] }
 0x483   : > { %6193 = vmatprep.subr.bf16.mxu0 %v12804_v37  ;;  %6246 = vmatprep.subr.bf16.mxu1 %v12806_v48  ;;  %v13769_v37 = vld [vmem:[#allocation31_spill] sm:$0xff]  ;;  %v9616_v48 = vpack.c.bf16 %v5657_v50, %v5656_v30  ;;  %v13148_v30 = vld [vmem:[#allocation8 + $0x928] ss:$16 sps:$4 sm:$0xff]  }
 0x484   : > { %v13152_v50 = vld [vmem:[#allocation8 + $0x944] ss:$16 sps:$4 sm:$0xff]  }
 0x486   : > { %6194 = vmatpush1.bf16.msra.mxu0 %v12810_v51  ;;  %6247 = vmatpush1.bf16.msra.mxu1 %v12812_v11  ;;  %v9617_v51 = vpack.c.bf16 %v5659_v27, %v5658_v22  ;;  %v9289_v11 = vrot.slane %v9618_v7, 9  ;;  %v13146_v22 = vld [vmem:[#allocation8 + $0x920] ss:$16 sps:$4 sm:$0xff]   ;;  %v13154_v27 = vld [vmem:[#allocation8 + $0x94c] ss:$16 sps:$4 sm:$0xff]  }
 0x487   : > { %6195 = vmatprep.subr.bf16.mxu0 %v12816_v39  ;;  %6248 = vmatprep.subr.bf16.mxu1 %v12818_v9  ;;  %v5721_v39 = vrot.slane %v9619_v46, 5  ;;  %v13770_v9 = vld [vmem:[#allocation32_spill] sm:$0xff]  ;;  %v13158_v7 = vld [vmem:[#allocation8 + $0x940] ss:$16 sps:$4 sm:$0xff]  }
 0x488   : > { %v13160_v46 = vld [vmem:[#allocation8 + $0x948] ss:$16 sps:$4 sm:$0xff]  }
 0x48a   : > { %6196 = vmatpush1.bf16.msra.mxu0 %v12822_v35  ;;  %6249 = vmatpush1.bf16.msra.mxu1 %v12824_v42  ;;  %v13771_v35 = vld [vmem:[#allocation33_spill] sm:$0xff]  ;;  %v13772_v42 = vld [vmem:[#allocation34_spill] sm:$0xff] }
 0x48b   : > { %6197 = vmatprep.subr.bf16.mxu0 %v12828_v34  ;;  %6250 = vmatprep.subr.bf16.mxu1 %v12830_v31  ;;  %v13773_v34 = vld [vmem:[#allocation35_spill] sm:$0xff] }
 0x48c   : > { %v13012_v31 = vld [vmem:[#allocation8 + $0x804] ss:$16 sps:$4 sm:$0xff]  }
 0x48e   : > { %6198 = vmatpush1.bf16.msra.mxu0 %v12834_v41  ;;  %6251 = vmatpush1.bf16.msra.mxu1 %v12836_v32  ;;  %v13014_v41 = vld [vmem:[#allocation8 + $0x80c] ss:$16 sps:$4 sm:$0xff]   ;;  %v9288_v32 = vrot.slane %v9616_v48, 9  ;;  %v13176_v48 = vld [vmem:[#allocation8 + $0x984] ss:$16 sps:$4 sm:$0xff]  }
 0x48f   : > { %6199 = vmatprep.subr.bf16.mxu0 %v12840_v36  ;;  %6252 = vmatprep.subr.bf16.mxu1 %v12842_v58  ;;  %v5717_v36 = vrot.slane %v9617_v51, 5  ;;  %v5722_v58 = vsel %vm12936_vm7, %v9289_v11, %v5721_v39  ;;  %13778 = vst [vmem:[#allocation40_spill] sm:$0xff] %v13176_v48  ;;  %v13178_v51 = vld [vmem:[#allocation8 + $0x98c] ss:$16 sps:$4 sm:$0xff]   ;;  %v13182_v11 = vld [vmem:[#allocation8 + $0x980] ss:$16 sps:$4 sm:$0xff]  }
 0x490   : > { %13779 = vst [vmem:[#allocation41_spill] sm:$0xff] %v13178_v51  ;;  %13780 = vst [vmem:[#allocation42_spill] sm:$0xff] %v13182_v11  ;;  %v13184_v39 = vld [vmem:[#allocation8 + $0x988] ss:$16 sps:$4 sm:$0xff]  }
 0x491   : > { %13781 = vst [vmem:[#allocation43_spill] sm:$0xff] %v13184_v39 }
 0x492   : > { %6200 = vmatpush1.bf16.msra.mxu0 %v12846_v38  ;;  %6253 = vmatpush1.bf16.msra.mxu1 %v12848_v15  ;;  %v13022_v38 = vcombine.low %v12948_v44, %v12942_v12  ;;  %v13024_v15 = vld [vmem:[#allocation8 + $0x800] ss:$16 sps:$4 sm:$0xff]   ;;  %v13100_v44 = vld [vmem:[#allocation8 + $0x8a8] ss:$16 sps:$4 sm:$0xff]  }
 0x493   : > { %6201 = vmatprep.subr.bf16.mxu0 %v12852_v2  ;;  %6254 = vmatprep.subr.bf16.mxu1 %v12854_v52  ;;  %v13027_v2 = vld [vmem:[#allocation8 + $0x808] ss:$16 sps:$4 sm:$0xff]   ;;  %v5718_v52 = vsel %vm12936_vm7, %v9288_v32, %v5717_v36  ;;  %v13098_v12 = vld [vmem:[#allocation8 + $0x8a0] ss:$16 sps:$4 sm:$0xff]   ;;  %v13200_v32 = vld [vmem:[#allocation8 + $0x9c4] ss:$16 sps:$4 sm:$0xff]  }
 0x494   : > { %v13056_v0 = vcombine.low %v5718_v52, %v5722_v58  ;;  %13786 = vst [vmem:[#allocation48_spill] sm:$0xff] %v13200_v32  ;;  %v13202_v36 = vld [vmem:[#allocation8 + $0x9cc] ss:$16 sps:$4 sm:$0xff]  }
 0x495   : > { %13787 = vst [vmem:[#allocation49_spill] sm:$0xff] %v13202_v36 }
 0x496   : > { %6202 = vmatpush1.bf16.msra.mxu0 %v12858_v10  ;;  %6255 = vmatpush1.bf16.msra.mxu1 %v12860_v3  ;;  %v13032_v10 = vcombine.high %v5718_v52, %v5722_v58  ;;  %v13034_v3 = vld [vmem:[#allocation8 + $0x824] ss:$16 sps:$4 sm:$0xff]   ;;  %v13206_v58 = vld [vmem:[#allocation8 + $0x9c0] ss:$16 sps:$4 sm:$0xff]   ;;  %v13208_v52 = vld [vmem:[#allocation8 + $0x9c8] ss:$16 sps:$4 sm:$0xff]  }
 0x497   : > { %6203 = vmatprep.subr.bf16.mxu0 %v12864_v16  ;;  %6256 = vmatprep.subr.bf16.mxu1 %v13757_v19  ;;  %v13036_v16 = vld [vmem:[#allocation8 + $0x82c] ss:$16 sps:$4 sm:$0xff]   ;;  %13788 = vst [vmem:[#allocation50_spill] sm:$0xff] %v13206_v58  ;;  %13789 = vst [vmem:[#allocation24_spill] sm:$0xff] %v13208_v52 }
 0x498   : > { %v13106_v19 = vld [vmem:[#allocation8 + $0x8cc] ss:$16 sps:$4 sm:$0xff]  }
 0x49a   : > { %6204 = vmatpush1.bf16.msra.mxu0 %v13758_v40  ;;  %6257 = vmatpush1.bf16.msra.mxu1 %v13759_v62  ;;  %v13110_v40 = vld [vmem:[#allocation8 + $0x8c0] ss:$16 sps:$4 sm:$0xff]   ;;  %v13112_v62 = vld [vmem:[#allocation8 + $0x8c8] ss:$16 sps:$4 sm:$0xff]  }
 0x49b   : > { %6205 = vmatprep.subr.bf16.mxu0 %v13760_v33  ;;  %6258 = vmatprep.subr.bf16.mxu1 %v13761_v56  ;;  %v13116_v33 = vld [vmem:[#allocation8 + $0x8e4] ss:$16 sps:$4 sm:$0xff]   ;;  %v13118_v56 = vld [vmem:[#allocation8 + $0x8ec] ss:$16 sps:$4 sm:$0xff]  }
 0x49e   : > { %6206 = vmatpush1.bf16.msra.mxu0 %v13762_v26  ;;  %6259 = vmatpush1.bf16.msra.mxu1 %v13763_v53  ;;  %v13124_v26 = vld [vmem:[#allocation8 + $0x8e8] ss:$16 sps:$4 sm:$0xff]   ;;  %v13128_v53 = vld [vmem:[#allocation8 + $0x904] ss:$16 sps:$4 sm:$0xff]  }
 0x49f   : > { %6207 = vmatprep.subr.bf16.mxu0 %v13764_v45  ;;  %6260 = vmatprep.subr.bf16.mxu1 %v13765_v6  ;;  %v13140_v45 = vld [vmem:[#allocation8 + $0x924] ss:$16 sps:$4 sm:$0xff]   ;;  %v13142_v6 = vld [vmem:[#allocation8 + $0x92c] ss:$16 sps:$4 sm:$0xff]  }
 0x4a2   : > { %6208 = vmatpush1.bf16.msra.mxu0 %v13766_v8  ;;  %6261 = vmatpush1.bf16.msra.mxu1 %v13767_v23  ;;  %v13164_v8 = vld [vmem:[#allocation8 + $0x964] ss:$16 sps:$4 sm:$0xff]   ;;  %v13166_v23 = vld [vmem:[#allocation8 + $0x96c] ss:$16 sps:$4 sm:$0xff]  }
 0x4a3   : > { %6209 = vmatprep.subr.bf16.mxu0 %v13768_v55  ;;  %6262 = vmatprep.subr.bf16.mxu1 %v13769_v37  ;;  %13774 = vst [vmem:[#allocation36_spill] sm:$0xff] %v13164_v8  ;;  %13775 = vst [vmem:[#allocation37_spill] sm:$0xff] %v13166_v23  ;;  %v13170_v55 = vld [vmem:[#allocation8 + $0x960] ss:$16 sps:$4 sm:$0xff]   ;;  %v13172_v37 = vld [vmem:[#allocation8 + $0x968] ss:$16 sps:$4 sm:$0xff]  }
 0x4a4   : > { %13776 = vst [vmem:[#allocation38_spill] sm:$0xff] %v13170_v55  ;;  %13777 = vst [vmem:[#allocation39_spill] sm:$0xff] %v13172_v37 }
 0x4a6   : > { %6210 = vmatpush1.bf16.msra.mxu0 %v13770_v9  ;;  %6263 = vmatpush1.bf16.msra.mxu1 %v13771_v35  ;;  %v13188_v9 = vld [vmem:[#allocation8 + $0x9a4] ss:$16 sps:$4 sm:$0xff]   ;;  %v13190_v35 = vld [vmem:[#allocation8 + $0x9ac] ss:$16 sps:$4 sm:$0xff]  }
 0x4a7   : > { %6211 = vmatprep.subr.bf16.mxu0 %v13772_v42  ;;  %6264 = vmatprep.subr.bf16.mxu1 %v13773_v34  ;;  %13782 = vst [vmem:[#allocation44_spill] sm:$0xff] %v13188_v9  ;;  %13783 = vst [vmem:[#allocation45_spill] sm:$0xff] %v13190_v35  ;;  %v13194_v42 = vld [vmem:[#allocation8 + $0x9a0] ss:$16 sps:$4 sm:$0xff]   ;;  %v13196_v34 = vld [vmem:[#allocation8 + $0x9a8] ss:$16 sps:$4 sm:$0xff]  }
 0x4a8   : > { %13784 = vst [vmem:[#allocation46_spill] sm:$0xff] %v13194_v42  ;;  %13785 = vst [vmem:[#allocation47_spill] sm:$0xff] %v13196_v34 }
 0x4aa   : > { %6212 = vmatpush1.bf16.msra.mxu0 %v12918_v29  ;;  %6265 = vmatpush1.bf16.msra.mxu1 %v12920_v63  ;;  %v13066_v63 = vld [vmem:[#allocation8 + $0x86c] ss:$16 sps:$4 sm:$0xff]   ;;  %v13074_v29 = vld [vmem:[#allocation8 + $0x860] ss:$16 sps:$4 sm:$0xff]  }
 0x4ab   : > { %6760 = vmatprep.subr.bf16.mxu0 %v13012_v31  ;;  %6813 = vmatprep.subr.bf16.mxu1 %v13014_v41 }
 0x4ad   : > { %6214 = vmatmul.mubr.bf16.vlgmr.msra.gmra.mrb[40].mxu0 %v13022_v38  ;;  %6267 = vmatmul.mubr.bf16.vlgmr.msra.gmra.mrb[40].mxu1 %v13022_v38 }
 0x4ae   : > { %6223 = vmatprep.mubr.bf16.mxu0 %v13032_v10  ;;  %6276 = vmatprep.mubr.bf16.mxu1 %v13032_v10 }
 0x4af   : > { %6761 = vmatpush1.bf16.msra.mxu0 %v13024_v15  ;;  %6814 = vmatpush1.bf16.msra.mxu1 %v13027_v2 }
 0x4b0   : > { %6762 = vmatprep.subr.bf16.mxu0 %v13034_v3  ;;  %6815 = vmatprep.subr.bf16.mxu1 %v13036_v16 }
 0x4b3   : > { %6763 = vmatpush1.bf16.msra.mxu0 %v13044_v28  ;;  %6816 = vmatpush1.bf16.msra.mxu1 %v13046_v1 }
 0x4b4   : > { %6764 = vmatprep.subr.bf16.mxu0 %v13050_v13  ;;  %6817 = vmatprep.subr.bf16.mxu1 %v13052_v14 }
 0x4b5   : > { %6224 = vmatmul.mubr.bf16.gmra.mrb[44].mxu0 %v13056_v0  ;;  %6277 = vmatmul.mubr.bf16.gmra.mrb[44].mxu1 %v13056_v0 }
 0x4b6   : > { %6792 = vmatprep.mubr.bf16.mxu0 %v12954_v61  ;;  %6845 = vmatprep.mubr.bf16.mxu1 %v12954_v61  ;;  %v13104_v61 = vld [vmem:[#allocation8 + $0x8c4] ss:$16 sps:$4 sm:$0xff]  }
 0x4b7   : > { %6765 = vmatpush1.bf16.msra.mxu0 %v13058_v20  ;;  %6818 = vmatpush1.bf16.msra.mxu1 %v13060_v60 }
 0x4b8   : > { %6766 = vmatprep.subr.bf16.mxu0 %v13064_v54  ;;  %6819 = vmatprep.subr.bf16.mxu1 %v13066_v63 }
 0x4bb   : > { %6767 = vmatpush1.bf16.msra.mxu0 %v13074_v29  ;;  %6820 = vmatpush1.bf16.msra.mxu1 %v13076_v49 }
 0x4bc   : > { %6768 = vmatprep.subr.bf16.mxu0 %v13080_v43  ;;  %6821 = vmatprep.subr.bf16.mxu1 %v13082_v59 }
 0x4bf   : > { %6769 = vmatpush1.bf16.msra.mxu0 %v13086_v17  ;;  %6822 = vmatpush1.bf16.msra.mxu1 %v13088_v57 }
 0x4c0   : > { %6770 = vmatprep.subr.bf16.mxu0 %v13092_v24  ;;  %6823 = vmatprep.subr.bf16.mxu1 %v13094_v4 }
 0x4c3   : > { %6771 = vmatpush1.bf16.msra.mxu0 %v13098_v12  ;;  %6824 = vmatpush1.bf16.msra.mxu1 %v13100_v44 }
 0x4c4   : > { %6772 = vmatprep.subr.bf16.mxu0 %v13104_v61  ;;  %6825 = vmatprep.subr.bf16.mxu1 %v13106_v19 }
 0x4c7   : > { %6773 = vmatpush1.bf16.msra.mxu0 %v13110_v40  ;;  %6826 = vmatpush1.bf16.msra.mxu1 %v13112_v62 }
 0x4c8   : > { %6774 = vmatprep.subr.bf16.mxu0 %v13116_v33  ;;  %6827 = vmatprep.subr.bf16.mxu1 %v13118_v56 }
 0x4cb   : > { %6775 = vmatpush1.bf16.msra.mxu0 %v13122_v18  ;;  %6828 = vmatpush1.bf16.msra.mxu1 %v13124_v26 }
 0x4cc   : > { %6776 = vmatprep.subr.bf16.mxu0 %v13128_v53  ;;  %6829 = vmatprep.subr.bf16.mxu1 %v13130_v47 }
 0x4cf   : > { %6777 = vmatpush1.bf16.msra.mxu0 %v13134_v21  ;;  %6830 = vmatpush1.bf16.msra.mxu1 %v13136_v5 }
 0x4d0   : > { %6778 = vmatprep.subr.bf16.mxu0 %v13140_v45  ;;  %6831 = vmatprep.subr.bf16.mxu1 %v13142_v6 }
 0x4d3   : > { %6779 = vmatpush1.bf16.msra.mxu0 %v13146_v22  ;;  %6832 = vmatpush1.bf16.msra.mxu1 %v13148_v30 }
 0x4d4   : > { %6780 = vmatprep.subr.bf16.mxu0 %v13152_v50  ;;  %6833 = vmatprep.subr.bf16.mxu1 %v13154_v27 }
 0x4d7   : > { %6781 = vmatpush1.bf16.msra.mxu0 %v13158_v7  ;;  %6834 = vmatpush1.bf16.msra.mxu1 %v13160_v46 }
 0x4d8   : > { %6782 = vmatprep.subr.bf16.mxu0 %v13164_v8  ;;  %6835 = vmatprep.subr.bf16.mxu1 %v13166_v23 }
 0x4db   : > { %6783 = vmatpush1.bf16.msra.mxu0 %v13170_v55  ;;  %6836 = vmatpush1.bf16.msra.mxu1 %v13172_v37  ;;  %v6369_v37 = vld [vmem:[#allocation2 + $0x28] sm:$0xfc]  ;;  %v6371_v55 = vld [vmem:[#allocation2 + $0x38] sm:$0x3] }
 0x4dc   : > { %6784 = vmatprep.subr.bf16.mxu0 %v13176_v48  ;;  %6837 = vmatprep.subr.bf16.mxu1 %v13178_v51  ;;  %v6375_v51 = vld [vmem:[#allocation2 + $0x78] sm:$0x3]  ;;  %v6373_v48 = vld [vmem:[#allocation2 + $0x68] sm:$0xfc] }
 0x4df   : > { %6785 = vmatpush1.bf16.msra.mxu0 %v13182_v11  ;;  %6838 = vmatpush1.bf16.msra.mxu1 %v13184_v39  ;;  %v13212_v39 = vld [vmem:[#allocation8 + $0x9e4] ss:$16 sps:$4 sm:$0xff]   ;;  %v6374_v11 = vld [vmem:[#allocation2 + $0x70] sm:$0x3] }
 0x4e0   : > { %6786 = vmatprep.subr.bf16.mxu0 %v13188_v9  ;;  %6839 = vmatprep.subr.bf16.mxu1 %v13190_v35  ;;  %13790 = vst [vmem:[#allocation25_spill] sm:$0xff] %v13212_v39  ;;  %v13214_v9 = vld [vmem:[#allocation8 + $0x9ec] ss:$16 sps:$4 sm:$0xff]   ;;  %v9623_v8 = vpack.c.bf16 %v6375_v51, %v6374_v11  ;;  %v10845_v51 = vld [vmem:[#allocation11 + $0x10] sm:$0xff]  }
 0x4e1   : > { %13791 = vst [vmem:[#allocation26_spill] sm:$0xff] %v13214_v9  ;;  %v6372_v35 = vld [vmem:[#allocation2 + $0x60] sm:$0xfc]  ;;  %v10846_v11 = vld [vmem:[#allocation11 + $0xd0] sm:$0xff]  }
 0x4e2   : > { %v9622_v23 = vpack.c.bf16 %v6373_v48, %v6372_v35  ;;  %v10849_v35 = vld [vmem:[#allocation11 + $0x18] sm:$0xff]  }
 0x4e3   : > { %6787 = vmatpush1.bf16.msra.mxu0 %v13194_v42  ;;  %6840 = vmatpush1.bf16.msra.mxu1 %v13196_v34  ;;  %v13218_v34 = vld [vmem:[#allocation8 + $0x9e0] ss:$16 sps:$4 sm:$0xff]   ;;  %v13220_v42 = vld [vmem:[#allocation8 + $0x9e8] ss:$16 sps:$4 sm:$0xff]  }
 0x4e4   : > { %6788 = vmatprep.subr.bf16.mxu0 %v13200_v32  ;;  %6841 = vmatprep.subr.bf16.mxu1 %v13202_v36  ;;  %v6370_v36 = vld [vmem:[#allocation2 + $0x30] sm:$0x3]  ;;  %v6368_v32 = vld [vmem:[#allocation2 + $0x20] sm:$0xfc] }
 0x4e7   : > { %6789 = vmatpush1.bf16.msra.mxu0 %v13206_v58  ;;  %6842 = vmatpush1.bf16.msra.mxu1 %v13208_v52  ;;  %v9620_v52 = vpack.c.bf16 %v6369_v37, %v6368_v32  ;;  %v9621_v58 = vpack.c.bf16 %v6371_v55, %v6370_v36  ;;  %v10841_v55 = vld [vmem:[#allocation11 + $0x8] sm:$0xff]   ;;  %v10844_v37 = vld [vmem:[#allocation11 + $0x50] sm:$0xff]   ;;  %v10851_v32 = vld [vmem:[#allocation11 + $0x98] sm:$0xff]  }
 0x4e8   : > { %6790 = vmatprep.subr.bf16.mxu0 %v13212_v39  ;;  %6843 = vmatprep.subr.bf16.mxu1 %v13214_v9  ;;  %v9367_v9 = vrot.slane %v9622_v23, 9  ;;  %v6430_v39 = vrot.slane %v9623_v8, 5  ;;  %v10840_v8 = vld [vmem:[#allocation11 + $0x48] sm:$0xff]   ;;  %v10854_v36 = vld [vmem:[#allocation11 + $0xe0] sm:$0xff]  }
 0x4e9   : > { %v9366_v48 = vrot.slane %v9620_v52, 9  ;;  %v10842_v23 = vld [vmem:[#allocation11 + $0xc8] sm:$0xff]  }
 0x4ea   : > { %v10856_v52 = vld [vmem:[#allocation11 + $0x68] sm:$0xff]  }
 0x4eb   : > { %6791 = vmatpush1.bf16.msra.mxu0 %v13218_v34  ;;  %6844 = vmatpush1.bf16.msra.mxu1 %v13220_v42 }
 0x4ec   : > { %6898 = vmatprep.subr.bf16.mxu0 %v13012_v31  ;;  %6951 = vmatprep.subr.bf16.mxu1 %v13014_v41  ;;  %v6426_v31 = vrot.slane %v9621_v58, 5  ;;  %v13238_v41 = vsel %vm12936_vm7, %v9367_v9, %v6430_v39  ;;  %v10847_v39 = vld [vmem:[#allocation11 + $0x90] sm:$0xff]   ;;  %v10848_v9 = vld [vmem:[#allocation11 + $0x58] sm:$0xff]   ;;  %v10853_v58 = vld [vmem:[#allocation11 + $0x20] sm:$0xff]  }
 0x4ee   : > { %6793 = vmatmul.mubr.bf16.vlgmr.msra.gmra.mrb[32].mxu0 %v13022_v38  ;;  %6846 = vmatmul.mubr.bf16.vlgmr.msra.gmra.mrb[32].mxu1 %v13022_v38  ;;  %v13244_v38 = vsel %vm12936_vm7, %v9366_v48, %v6426_v31  ;;  %v10855_v48 = vld [vmem:[#allocation11 + $0xa0] sm:$0xff]   ;;  %v10858_v31 = vld [vmem:[#allocation11 + $0xe8] sm:$0xff]  }
 0x4ef   : > { %6802 = vmatprep.mubr.bf16.mxu0 %v13032_v10  ;;  %6855 = vmatprep.mubr.bf16.mxu1 %v13032_v10  ;;  %v13793_v10 = vld [vmem:[#allocation37_spill] sm:$0xff] }
 0x4f0   : > { %6899 = vmatpush1.bf16.msra.mxu0 %v13024_v15  ;;  %6952 = vmatpush1.bf16.msra.mxu1 %v13027_v2  ;;  %v9435_v15 = vcombine.high %v13244_v38, %v13238_v41  ;;  %v13792_v2 = vld [vmem:[#allocation36_spill] sm:$0xff] }
 0x4f1   : > { %6900 = vmatprep.subr.bf16.mxu0 %v13034_v3  ;;  %6953 = vmatprep.subr.bf16.mxu1 %v13036_v16  ;;  %v13794_v3 = vld [vmem:[#allocation38_spill] sm:$0xff]  ;;  %v13795_v16 = vld [vmem:[#allocation39_spill] sm:$0xff] }
 0x4f4   : > { %6901 = vmatpush1.bf16.msra.mxu0 %v13044_v28  ;;  %6954 = vmatpush1.bf16.msra.mxu1 %v13046_v1  ;;  %v13796_v28 = vld [vmem:[#allocation40_spill] sm:$0xff]  ;;  %v13797_v1 = vld [vmem:[#allocation41_spill] sm:$0xff] }
 0x4f5   : > { %6902 = vmatprep.subr.bf16.mxu0 %v13050_v13  ;;  %6955 = vmatprep.subr.bf16.mxu1 %v13052_v14  ;;  %v6382_v13 = vld [vmem:[#allocation2 + $0xf0] sm:$0x3] }
 0x4f6   : > { %6803 = vmatmul.mubr.bf16.gmra.mrb[36].mxu0 %v13056_v0  ;;  %6856 = vmatmul.mubr.bf16.gmra.mrb[36].mxu1 %v13056_v0  ;;  %v13798_v14 = vld [vmem:[#allocation42_spill] sm:$0xff]  ;;  %v13799_v0 = vld [vmem:[#allocation43_spill] sm:$0xff] }
 0x4f7   : > { %6930 = vmatprep.mubr.bf16.mxu0 %v9435_v15  ;;  %6983 = vmatprep.mubr.bf16.mxu1 %v9435_v15  ;;  %v10859_v15 = vld [vmem:[#allocation11 + $0xa8] sm:$0xff]  }
 0x4f8   : > { %6903 = vmatpush1.bf16.msra.mxu0 %v13058_v20  ;;  %6956 = vmatpush1.bf16.msra.mxu1 %v13060_v60  ;;  %v6380_v20 = vld [vmem:[#allocation2 + $0xe0] sm:$0xfc]  ;;  %v6381_v60 = vld [vmem:[#allocation2 + $0xe8] sm:$0xfc] }
 0x4f9   : > { %6904 = vmatprep.subr.bf16.mxu0 %v13064_v54  ;;  %6957 = vmatprep.subr.bf16.mxu1 %v13066_v63  ;;  %v6383_v54 = vld [vmem:[#allocation2 + $0xf8] sm:$0x3]  ;;  %v13800_v63 = vld [vmem:[#allocation44_spill] sm:$0xff] }
 0x4fc   : > { %6905 = vmatpush1.bf16.msra.mxu0 %v13074_v29  ;;  %6958 = vmatpush1.bf16.msra.mxu1 %v13076_v49  ;;  %v13801_v29 = vld [vmem:[#allocation45_spill] sm:$0xff]  ;;  %v6378_v49 = vld [vmem:[#allocation2 + $0xb0] sm:$0x3] }
 0x4fd   : > { %6906 = vmatprep.subr.bf16.mxu0 %v13080_v43  ;;  %6959 = vmatprep.subr.bf16.mxu1 %v13082_v59  ;;  %v6376_v43 = vld [vmem:[#allocation2 + $0xa0] sm:$0xfc]  ;;  %v6377_v59 = vld [vmem:[#allocation2 + $0xa8] sm:$0xfc] }
 0x500   : > { %6907 = vmatpush1.bf16.msra.mxu0 %v13086_v17  ;;  %6960 = vmatpush1.bf16.msra.mxu1 %v13088_v57  ;;  %v6379_v17 = vld [vmem:[#allocation2 + $0xb8] sm:$0x3]  ;;  %v9626_v57 = vpack.c.bf16 %v6381_v60, %v6380_v20 }
 0x501   : > { %6908 = vmatprep.subr.bf16.mxu0 %v13092_v24  ;;  %6961 = vmatprep.subr.bf16.mxu1 %v13094_v4  ;;  %v9627_v24 = vpack.c.bf16 %v6383_v54, %v6382_v13  ;;  %v13802_v4 = vld [vmem:[#allocation46_spill] sm:$0xff] }
 0x502   : > { %v10868_v13 = vld [vmem:[#allocation11 + $0x140] sm:$0xff]  }
 0x504   : > { %6909 = vmatpush1.bf16.msra.mxu0 %v13098_v12  ;;  %6962 = vmatpush1.bf16.msra.mxu1 %v13100_v44  ;;  %v13803_v12 = vld [vmem:[#allocation47_spill] sm:$0xff]  ;;  %v13804_v44 = vld [vmem:[#allocation48_spill] sm:$0xff] }
 0x505   : > { %6910 = vmatprep.subr.bf16.mxu0 %v13104_v61  ;;  %6963 = vmatprep.subr.bf16.mxu1 %v13106_v19  ;;  %v13805_v61 = vld [vmem:[#allocation49_spill] sm:$0xff]  ;;  %v9624_v19 = vpack.c.bf16 %v6377_v59, %v6376_v43 }
 0x508   : > { %6911 = vmatpush1.bf16.msra.mxu0 %v13110_v40  ;;  %6964 = vmatpush1.bf16.msra.mxu1 %v13112_v62  ;;  %v9625_v40 = vpack.c.bf16 %v6379_v17, %v6378_v49  ;;  %v9369_v62 = vrot.slane %v9626_v57, 9 }
 0x509   : > { %6912 = vmatprep.subr.bf16.mxu0 %v13116_v33  ;;  %6965 = vmatprep.subr.bf16.mxu1 %v13118_v56  ;;  %v6438_v33 = vrot.slane %v9627_v24, 5  ;;  %v13806_v56 = vld [vmem:[#allocation50_spill] sm:$0xff] }
 0x50c   : > { %6913 = vmatpush1.bf16.msra.mxu0 %v13122_v18  ;;  %6966 = vmatpush1.bf16.msra.mxu1 %v13124_v26  ;;  %v13807_v18 = vld [vmem:[#allocation24_spill] sm:$0xff]  ;;  %v13808_v26 = vld [vmem:[#allocation25_spill] sm:$0xff] }
 0x50d   : > { %6914 = vmatprep.subr.bf16.mxu0 %v13128_v53  ;;  %6967 = vmatprep.subr.bf16.mxu1 %v13130_v47  ;;  %v13809_v53 = vld [vmem:[#allocation26_spill] sm:$0xff]  ;;  %v9368_v47 = vrot.slane %v9624_v19, 9 }
 0x510   : > { %6915 = vmatpush1.bf16.msra.mxu0 %v13134_v21  ;;  %6968 = vmatpush1.bf16.msra.mxu1 %v13136_v5  ;;  %v6434_v21 = vrot.slane %v9625_v40, 5  ;;  %v6439_v5 = vsel %vm12936_vm7, %v9369_v62, %v6438_v33  ;;  %v7020_v40 = vld [vmem:[#allocation9] sm:$0xf]  ;;  %v11290_v62 = vmov 1935823168  }
 0x511   : > { %6916 = vmatprep.subr.bf16.mxu0 %v13140_v45  ;;  %6969 = vmatprep.subr.bf16.mxu1 %v13142_v6  ;;  %v9434_v45 = vcombine.low %v13244_v38, %v13238_v41  ;;  %v10857_v41 = vld [vmem:[#allocation11 + $0x28] sm:$0xff]   ;;  %v10860_v38 = vld [vmem:[#allocation11 + $0x70] sm:$0xff]   ;;  %v7155_v33 = vunpack.c.l.s4 %v11290_v62 }
 0x512   : > { %v6435_v6 = vsel %vm12936_vm7, %v9368_v47, %v6434_v21 }
 0x514   : > { %6917 = vmatpush1.bf16.msra.mxu0 %v13146_v22  ;;  %6970 = vmatpush1.bf16.msra.mxu1 %v13148_v30  ;;  %v9437_v22 = vcombine.high %v6435_v6, %v6439_v5  ;;  %v9436_v30 = vcombine.low %v6435_v6, %v6439_v5 }
 0x515   : > { %6918 = vmatprep.subr.bf16.mxu0 %v13152_v50  ;;  %6971 = vmatprep.subr.bf16.mxu1 %v13154_v27  ;;  %v10836_v50 = vld [vmem:[#allocation11 + $0x40] sm:$0xff]  }
 0x516   : > { %v10837_v27 = vld [vmem:[#allocation11] sm:$0xff]  }
 0x518   : > { %6919 = vmatpush1.bf16.msra.mxu0 %v13158_v7  ;;  %6972 = vmatpush1.bf16.msra.mxu1 %v13160_v46  ;;  %v10838_v7 = vld [vmem:[#allocation11 + $0xc0] sm:$0xff]  }
 0x519   : > { %6920 = vmatprep.subr.bf16.mxu0 %v13792_v2  ;;  %6973 = vmatprep.subr.bf16.mxu1 %v13793_v10  ;;  %v10839_v46 = vld [vmem:[#allocation11 + $0x80] sm:$0xff]   ;;  %v10862_v2 = vld [vmem:[#allocation11 + $0xf0] sm:$0xff]  }
 0x51a   : > { %v10861_v10 = vld [vmem:[#allocation11 + $0x30] sm:$0xff]  }
 0x51c   : > { %6921 = vmatpush1.bf16.msra.mxu0 %v13794_v3  ;;  %6974 = vmatpush1.bf16.msra.mxu1 %v13795_v16  ;;  %v10864_v3 = vld [vmem:[#allocation11 + $0x78] sm:$0xff]   ;;  %v10863_v16 = vld [vmem:[#allocation11 + $0xb0] sm:$0xff]  }
 0x51d   : > { %6922 = vmatprep.subr.bf16.mxu0 %v13796_v28  ;;  %6975 = vmatprep.subr.bf16.mxu1 %v13797_v1  ;;  %v10866_v28 = vld [vmem:[#allocation11 + $0xf8] sm:$0xff]  }
 0x51e   : > { %v10865_v1 = vld [vmem:[#allocation11 + $0x38] sm:$0xff]  }
 0x520   : > { %6923 = vmatpush1.bf16.msra.mxu0 %v13798_v14  ;;  %6976 = vmatpush1.bf16.msra.mxu1 %v13799_v0  ;;  %v10867_v14 = vld [vmem:[#allocation11 + $0xb8] sm:$0xff]   ;;  %v10870_v0 = vld [vmem:[#allocation11 + $0x1c0] sm:$0xff]  }
 0x521   : > { %6924 = vmatprep.subr.bf16.mxu0 %v13800_v63  ;;  %6977 = vmatprep.subr.bf16.mxu1 %v13801_v29 }
 0x524   : > { %6925 = vmatpush1.bf16.msra.mxu0 %v13802_v4  ;;  %6978 = vmatpush1.bf16.msra.mxu1 %v13803_v12 }
 0x525   : > { %6926 = vmatprep.subr.bf16.mxu0 %v13804_v44  ;;  %6979 = vmatprep.subr.bf16.mxu1 %v13805_v61 }
 0x528   : > { %6927 = vmatpush1.bf16.msra.mxu0 %v13806_v56  ;;  %6980 = vmatpush1.bf16.msra.mxu1 %v13807_v18  ;;  %v11291_v56 = vmov 1966171168  }
 0x529   : > { %6928 = vmatprep.subr.bf16.mxu0 %v13808_v26  ;;  %6981 = vmatprep.subr.bf16.mxu1 %v13809_v53  ;;  %v7223_v18 = vunpack.c.l.s4 %v11291_v56  ;;  %v13810_v26 = vld [vmem:[#allocation23_spill] sm:$0xff] }
 0x52a   : > { %v13811_v53 = vsub.s32 0, %v13810_v26  ;;  %v13812_v21 = vsub.s32 2, %v13810_v26 }
 0x52c   : > { %6929 = vmatpush1.bf16.msra.mxu0 %v13218_v34  ;;  %6982 = vmatpush1.bf16.msra.mxu1 %v13220_v42  ;;  %v10850_v42 = vld [vmem:[#allocation11 + $0xd8] sm:$0xff]   ;;  %v10852_v34 = vld [vmem:[#allocation11 + $0x60] sm:$0xff]   ;;  %v13314_v47 = vrot.slane %v7020_v40, %v13811_v53  ;;  %v13318_v5 = vrot.slane %v7020_v40, %v13812_v21 }
 0x52d   : > { %9628 = vmatprep.subr.bf16.mxu0 %v10836_v50  ;;  %9650 = vmatprep.subr.bf16.mxu1 %v10838_v7  ;;  %v7156_v50 = vunpack.c.0.s8 %v7155_v33 }
 0x52f   : > { %6931 = vmatmul.mubr.bf16.vlgmr.msra.gmra.mrb[40].mxu0 %v9434_v45  ;;  %6984 = vmatmul.mubr.bf16.vlgmr.msra.gmra.mrb[40].mxu1 %v9434_v45  ;;  %v13813_v45 = vsub.s32 1, %v13810_v26 }
 0x530   : > { %6940 = vmatprep.mubr.bf16.mxu0 %v9437_v22  ;;  %6993 = vmatprep.mubr.bf16.mxu1 %v9437_v22  ;;  %v13814_v22 = vsub.s32 3, %v13810_v26 }
 0x531   : > { %9629 = vmatpush3.bf16.msra.mxu0 %v10837_v27  ;;  %9651 = vmatpush3.bf16.msra.mxu1 %v10839_v46  ;;  %v13322_v6 = vrot.slane %v7020_v40, %v13813_v45  ;;  %v7224_v27 = vunpack.c.0.s8 %v7223_v18 }
 0x532   : > { %9630 = vmatprep.subr.bf16.mxu0 %v10840_v8  ;;  %9652 = vmatprep.subr.bf16.mxu1 %v10842_v23 }
 0x535   : > { %9631 = vmatpush3.bf16.msra.mxu0 %v10841_v55  ;;  %9653 = vmatpush3.bf16.msra.mxu1 %v10843_v25 }
 0x536   : > { %9632 = vmatprep.subr.bf16.mxu0 %v10844_v37  ;;  %9654 = vmatprep.subr.bf16.mxu1 %v10846_v11 }
 0x537   : > { %6941 = vmatmul.mubr.bf16.gmra.mrb[44].mxu0 %v9436_v30  ;;  %6994 = vmatmul.mubr.bf16.gmra.mrb[44].mxu1 %v9436_v30  ;;  %v13326_v30 = vrot.slane %v7020_v40, %v13814_v22 }
 0x539   : > { %9633 = vmatpush3.bf16.msra.mxu0 %v10845_v51  ;;  %9655 = vmatpush3.bf16.msra.mxu1 %v10847_v39 }
 0x53a   : > { %9634 = vmatprep.subr.bf16.mxu0 %v10848_v9  ;;  %9656 = vmatprep.subr.bf16.mxu1 %v10850_v42  ;;  %v13349_v42 = vsub.s32 %v7156_v50, %v13810_v26 }
 0x53d   : > { %9635 = vmatpush3.bf16.msra.mxu0 %v10849_v35  ;;  %9657 = vmatpush3.bf16.msra.mxu1 %v10851_v32 }
 0x53e   : > { %9636 = vmatprep.subr.bf16.mxu0 %v10852_v34  ;;  %9658 = vmatprep.subr.bf16.mxu1 %v10854_v36  ;;  %v13352_v34 = vsub.s32 %v7224_v27, %v13810_v26 }
 0x541   : > { %9637 = vmatpush3.bf16.msra.mxu0 %v10853_v58  ;;  %9659 = vmatpush3.bf16.msra.mxu1 %v10855_v48 }
 0x542   : > { %9638 = vmatprep.subr.bf16.mxu0 %v10856_v52  ;;  %9660 = vmatprep.subr.bf16.mxu1 %v10858_v31 }
 0x545   : > { %9639 = vmatpush3.bf16.msra.mxu0 %v10857_v41  ;;  %9661 = vmatpush3.bf16.msra.mxu1 %v10859_v15 }
 0x546   : > { %9640 = vmatprep.subr.bf16.mxu0 %v10860_v38  ;;  %9662 = vmatprep.subr.bf16.mxu1 %v10862_v2 }
 0x549   : > { %9641 = vmatpush3.bf16.msra.mxu0 %v10861_v10  ;;  %9663 = vmatpush3.bf16.msra.mxu1 %v10863_v16 }
 0x54a   : > { %9642 = vmatprep.subr.bf16.mxu0 %v10864_v3  ;;  %9664 = vmatprep.subr.bf16.mxu1 %v10866_v28 }
 0x54d   : > { %9643 = vmatpush3.bf16.msra.mxu0 %v10865_v1  ;;  %9665 = vmatpush3.bf16.msra.mxu1 %v10867_v14 }
 0x54e   : > { %9672 = vmatprep.subr.bf16.mxu0 %v10868_v13  ;;  %9694 = vmatprep.subr.bf16.mxu1 %v10870_v0 }
 0x5c1   : > { %v6794_v20 = vpop.f32.mrb[32].mxu0  ;;  %v6847_v60 = vpop.f32.mrb[32].mxu1 }
 0x5c2   : > { %v6796_v54 = vpop.f32.mrb[33].mxu0  ;;  %v6849_v63 = vpop.f32.mrb[33].mxu1  ;;  %v7042_v7 = vadd.f32 %v13314_v47, %v6794_v20  ;;  %v7044_v46 = vadd.f32 %v13318_v5, %v6847_v60 }
 0x5c3   : > { %v6798_v29 = vpop.f32.mrb[34].mxu0  ;;  %v6851_v49 = vpop.f32.mrb[34].mxu1  ;;  %v7043_v8 = vadd.f32 %v13322_v6, %v6796_v54  ;;  %v7045_v23 = vadd.f32 %v13326_v30, %v6849_v63 }
 0x5c4   : > { %v6800_v43 = vpop.f32.mrb[35].mxu0  ;;  %v6853_v59 = vpop.f32.mrb[35].mxu1  ;;  %v7046_v55 = vadd.f32 %v13314_v47, %v6798_v29  ;;  %v7048_v25 = vadd.f32 %v13318_v5, %v6851_v49  ;;  %v7058_v32 = vmax.f32 %v7042_v7, 0.0  ;;  %v7060_v36 = vmax.f32 %v7044_v46, 0.0 }
 0x5c5   : > { %v7047_v37 = vadd.f32 %v13322_v6, %v6800_v43  ;;  %v7049_v51 = vadd.f32 %v13326_v30, %v6853_v59  ;;  %v7059_v58 = vmax.f32 %v7043_v8, 0.0  ;;  %v7061_v52 = vmax.f32 %v7045_v23, 0.0 }
 0x5c6   : > { %v7062_v48 = vmax.f32 %v7046_v55, 0.0  ;;  %v7064_v31 = vmax.f32 %v7048_v25, 0.0 }
 0x5c7   : > { %v7063_v41 = vmax.f32 %v7047_v37, 0.0  ;;  %v7065_v38 = vmax.f32 %v7049_v51, 0.0 }
 0x5c9   : > { %v6804_v17 = vpop.f32.mrb[36].mxu0  ;;  %v6857_v57 = vpop.f32.mrb[36].mxu1 }
 0x5ca   : > { %v6806_v24 = vpop.f32.mrb[37].mxu0  ;;  %v6859_v4 = vpop.f32.mrb[37].mxu1  ;;  %v13337_v11 = vadd.f32 %v13314_v47, %v6804_v17  ;;  %v13340_v39 = vadd.f32 %v13318_v5, %v6857_v57 }
 0x5cb   : > { %v6808_v12 = vpop.f32.mrb[38].mxu0  ;;  %v6861_v44 = vpop.f32.mrb[38].mxu1  ;;  %v13343_v9 = vadd.f32 %v13322_v6, %v6806_v24  ;;  %v13346_v35 = vadd.f32 %v13326_v30, %v6859_v4 }
 0x5cc   : > { %v6810_v61 = vpop.f32.mrb[39].mxu0  ;;  %v6863_v19 = vpop.f32.mrb[39].mxu1  ;;  %v7066_v15 = vmax.f32 %v13337_v11, 0.0  ;;  %v7068_v2 = vmax.f32 %v13340_v39, 0.0  ;;  %v13357_v10 = vadd.f32 %v13314_v47, %v6808_v12  ;;  %v13360_v3 = vadd.f32 %v13318_v5, %v6861_v44 }
 0x5cd   : > { %v7067_v1 = vmax.f32 %v13343_v9, 0.0  ;;  %v7069_v13 = vmax.f32 %v13346_v35, 0.0  ;;  %v13367_v54 = vadd.f32 %v13322_v6, %v6810_v61  ;;  %v13370_v63 = vadd.f32 %v13326_v30, %v6863_v19 }
 0x5ce   : > { %v7070_v50 = vmax.f32 %v13357_v10, 0.0  ;;  %v7072_v8 = vmax.f32 %v13360_v3, 0.0 }
 0x602   : > { %v6932_v16 = vpop.f32.mrb[40].mxu0  ;;  %v6985_v28 = vpop.f32.mrb[40].mxu1 }
 0x603   : > { %v7074_v14 = vadd.f32 %v13314_v47, %v6932_v16  ;;  %v7076_v0 = vadd.f32 %v13318_v5, %v6985_v28  ;;  %v6934_v20 = vpop.f32.mrb[41].mxu0  ;;  %v6987_v60 = vpop.f32.mrb[41].mxu1 }
 0x604   : > { %v7075_v29 = vadd.f32 %v13322_v6, %v6934_v20  ;;  %v7077_v49 = vadd.f32 %v13326_v30, %v6987_v60  ;;  %v6936_v43 = vpop.f32.mrb[42].mxu0  ;;  %v6989_v59 = vpop.f32.mrb[42].mxu1 }
 0x605   : > { %v7090_v17 = vmax.f32 %v7074_v14, 0.0  ;;  %v7092_v57 = vmax.f32 %v7076_v0, 0.0  ;;  %v7078_v24 = vadd.f32 %v13314_v47, %v6936_v43  ;;  %v7080_v4 = vadd.f32 %v13318_v5, %v6989_v59  ;;  %v6938_v12 = vpop.f32.mrb[43].mxu0  ;;  %v6991_v44 = vpop.f32.mrb[43].mxu1 }
 0x606   : > { %v7091_v40 = vmax.f32 %v7075_v29, 0.0  ;;  %v7093_v61 = vmax.f32 %v7077_v49, 0.0  ;;  %v7079_v62 = vadd.f32 %v13322_v6, %v6938_v12  ;;  %v7081_v19 = vadd.f32 %v13326_v30, %v6991_v44 }
 0x607   : > { %v7106_v33 = vmax.f32 %v7058_v32, %v7090_v17  ;;  %v7108_v56 = vmax.f32 %v7060_v36, %v7092_v57  ;;  %v7094_v18 = vmax.f32 %v7078_v24, 0.0  ;;  %v7096_v26 = vmax.f32 %v7080_v4, 0.0 }
 0x608   : > { %v7107_v53 = vmax.f32 %v7059_v58, %v7091_v40  ;;  %v7109_v21 = vmax.f32 %v7061_v52, %v7093_v61  ;;  %v7095_v45 = vmax.f32 %v7079_v62, 0.0  ;;  %v7097_v22 = vmax.f32 %v7081_v19, 0.0 }
 0x609   : > { %v7122_v27 = vmax.f32 %v7106_v33, %v7108_v56  ;;  %v7110_v7 = vmax.f32 %v7062_v48, %v7094_v18  ;;  %v7112_v46 = vmax.f32 %v7064_v31, %v7096_v26  ;;  %v7071_v32 = vmax.f32 %v13367_v54, 0.0 }
 0x60a   : > { %v7123_v23 = vmax.f32 %v7107_v53, %v7109_v21  ;;  %v7111_v55 = vmax.f32 %v7063_v41, %v7095_v45  ;;  %v7113_v25 = vmax.f32 %v7065_v38, %v7097_v22  ;;  %v6942_v37 = vpop.f32.mrb[44].mxu0  ;;  %v6995_v51 = vpop.f32.mrb[44].mxu1 }
 0x60b   : > { %v7124_v36 = vmax.f32 %v7110_v7, %v7112_v46  ;;  %v7082_v58 = vadd.f32 %v13314_v47, %v6942_v37  ;;  %v7084_v52 = vadd.f32 %v13318_v5, %v6995_v51  ;;  %v6944_v16 = vpop.f32.mrb[45].mxu0  ;;  %v6997_v28 = vpop.f32.mrb[45].mxu1 }
 0x60c   : > { %v7138_v10 = vcombine.low %v7122_v27, %v7123_v23  ;;  %v7139_v14 = vcombine.high %v7122_v27, %v7123_v23  ;;  %v7125_v48 = vmax.f32 %v7111_v55, %v7113_v25  ;;  %v7083_v31 = vadd.f32 %v13322_v6, %v6944_v16  ;;  %v6946_v3 = vpop.f32.mrb[46].mxu0  ;;  %v6999_v0 = vpop.f32.mrb[46].mxu1 }
 0x60d   : > { %v7098_v41 = vmax.f32 %v7082_v58, 0.0  ;;  %v7100_v38 = vmax.f32 %v7084_v52, 0.0  ;;  %v7085_v20 = vadd.f32 %v13326_v30, %v6997_v28  ;;  %v7086_v60 = vadd.f32 %v13314_v47, %v6946_v3  ;;  %v6948_v54 = vpop.f32.mrb[47].mxu0  ;;  %v7001_v29 = vpop.f32.mrb[47].mxu1 }
 0x60e   : > { %v7160_v49 = vrot.slane %v7138_v10, %v13349_v42  ;;  %v7167_v43 = vrot.slane %v7139_v14, %v13349_v42  ;;  %v7140_v59 = vcombine.low %v7124_v36, %v7125_v48  ;;  %v7141_v17 = vcombine.high %v7124_v36, %v7125_v48 }
 0x60f   : > { %v7114_v57 = vmax.f32 %v7066_v15, %v7098_v41  ;;  %v7116_v24 = vmax.f32 %v7068_v2, %v7100_v38  ;;  %v7099_v4 = vmax.f32 %v7083_v31, 0.0  ;;  %v7101_v12 = vmax.f32 %v7085_v20, 0.0 }
 0x610   : > { %v7174_v44 = vrot.slane %v7140_v59, %v13349_v42  ;;  %v7181_v47 = vrot.slane %v7141_v17, %v13349_v42  ;;  %v7102_v40 = vmax.f32 %v7086_v60, 0.0  ;;  %v7088_v61 = vadd.f32 %v13318_v5, %v6999_v0 }
 0x611   : > { %v7126_v62 = vmax.f32 %v7114_v57, %v7116_v24  ;;  %v7115_v19 = vmax.f32 %v7067_v1, %v7099_v4  ;;  %v7117_v11 = vmax.f32 %v7069_v13, %v7101_v12  ;;  %v7087_v15 = vadd.f32 %v13322_v6, %v6948_v54  ;;  %v10869_v24 = vld [vmem:[#allocation11 + $0x100] sm:$0xff]  }
 0x612   : > { %v7218_v39 = vcombine.low %v7160_v49, %v7174_v44  ;;  %v7219_v2 = vcombine.high %v7160_v49, %v7174_v44  ;;  %v7286_v33 = vcombine.low %v7167_v43, %v7181_v47  ;;  %v7287_v56 = vcombine.high %v7167_v43, %v7181_v47 }
 0x613   : > { %v7127_v18 = vmax.f32 %v7115_v19, %v7117_v11  ;;  %v7118_v26 = vmax.f32 %v7070_v50, %v7102_v40  ;;  %v7104_v53 = vmax.f32 %v7088_v61, 0.0  ;;  %v7103_v21 = vmax.f32 %v7087_v15, 0.0  ;;  %v10871_v40 = vld [vmem:[#allocation11 + $0x180] sm:$0xff]   ;;  %v10872_v61 = vld [vmem:[#allocation11 + $0x148] sm:$0xff]  }
 0x614   : > { %v7089_v45 = vadd.f32 %v13326_v30, %v7001_v29  ;;  %v7073_v1 = vmax.f32 %v13370_v63, 0.0  ;;  %v7303_v13 = vrot.slane %v7287_v56, %v13352_v34  ;;  %v7228_v36 = vrot.slane %v7218_v39, %v13352_v34  ;;  %v10874_v11 = vld [vmem:[#allocation11 + $0x1c8] sm:$0xff]   ;;  %v10878_v56 = vld [vmem:[#allocation11 + $0x1d0] sm:$0xff]  }
 0x615   : > { %v7142_v5 = vcombine.low %v7126_v62, %v7127_v18  ;;  %v7143_v22 = vcombine.high %v7126_v62, %v7127_v18  ;;  %v7120_v27 = vmax.f32 %v7072_v8, %v7104_v53  ;;  %v7119_v9 = vmax.f32 %v7071_v32, %v7103_v21  ;;  %v10873_v15 = vld [vmem:[#allocation11 + $0x108] sm:$0xff]   ;;  %v10877_v18 = vld [vmem:[#allocation11 + $0x110] sm:$0xff]   ;;  %v10882_v21 = vld [vmem:[#allocation11 + $0x1d8] sm:$0xff]  }
 0x616   : > { %v7105_v35 = vmax.f32 %v7089_v45, 0.0  ;;  %v13409_v58 = vrot.slane %v7219_v2, %v13352_v34  ;;  %v10876_v2 = vld [vmem:[#allocation11 + $0x150] sm:$0xff]   ;;  %v10881_v45 = vld [vmem:[#allocation11 + $0x118] sm:$0xff]  }
 0x617   : > { %v7128_v6 = vmax.f32 %v7118_v26, %v7120_v27  ;;  %v7188_v50 = vrot.slane %v7142_v5, %v13349_v42  ;;  %v7195_v25 = vrot.slane %v7143_v22, %v13349_v42  ;;  %v10880_v26 = vld [vmem:[#allocation11 + $0x158] sm:$0xff]   ;;  %v10879_v53 = vld [vmem:[#allocation11 + $0x190] sm:$0xff]   ;;  %v10884_v5 = vld [vmem:[#allocation11 + $0x160] sm:$0xff]  }
 0x618   : > { %v7121_v7 = vmax.f32 %v7073_v1, %v7105_v35  ;;  %v10883_v22 = vld [vmem:[#allocation11 + $0x198] sm:$0xff]   ;;  %v10886_v27 = vld [vmem:[#allocation11 + $0x1e0] sm:$0xff]   ;;  %v10888_v1 = vld [vmem:[#allocation11 + $0x168] sm:$0xff]  }
 0x619   : > { %v10887_v35 = vld [vmem:[#allocation11 + $0x1a0] sm:$0xff]  }
 0x61a   : > { %v7129_v46 = vmax.f32 %v7119_v9, %v7121_v7  ;;  %v10885_v9 = vld [vmem:[#allocation11 + $0x120] sm:$0xff]   ;;  %v10892_v7 = vld [vmem:[#allocation11 + $0x170] sm:$0xff]  }
 0x61c   : > { %v7144_v23 = vcombine.low %v7128_v6, %v7129_v46  ;;  %v7145_v55 = vcombine.high %v7128_v6, %v7129_v46  ;;  %v10889_v6 = vld [vmem:[#allocation11 + $0x128] sm:$0xff]  }
 0x61d   : > { %v10891_v46 = vld [vmem:[#allocation11 + $0x1a8] sm:$0xff]  }
 0x61e   : > { %v7202_v30 = vrot.slane %v7144_v23, %v13349_v42  ;;  %v7209_v37 = vrot.slane %v7145_v55, %v13349_v42  ;;  %v13420_v42 = vrot.slane %v7286_v33, %v13352_v34  ;;  %v10875_v33 = vld [vmem:[#allocation11 + $0x188] sm:$0xff]   ;;  %v10894_v23 = vld [vmem:[#allocation11 + $0x1f0] sm:$0xff]  }
 0x61f   : > { %v10893_v55 = vld [vmem:[#allocation11 + $0x130] sm:$0xff]  }
 0x620   : > { %v7220_v8 = vcombine.low %v7188_v50, %v7202_v30  ;;  %v7221_v51 = vcombine.high %v7188_v50, %v7202_v30  ;;  %v7288_v32 = vcombine.low %v7195_v25, %v7209_v37  ;;  %v7289_v63 = vcombine.high %v7195_v25, %v7209_v37  ;;  %v10896_v50 = vld [vmem:[#allocation11 + $0x178] sm:$0xff]   ;;  %v10895_v25 = vld [vmem:[#allocation11 + $0x1b0] sm:$0xff]  }
 0x621   : > { %v10898_v30 = vld [vmem:[#allocation11 + $0x1f8] sm:$0xff]  }
 0x622   : > { %v7242_v52 = vrot.slane %v7220_v8, %v13352_v34  ;;  %v13413_v16 = vrot.slane %v7221_v51, %v13352_v34  ;;  %v13416_v28 = vrot.slane %v7288_v32, %v13352_v34  ;;  %v7317_v10 = vrot.slane %v7289_v63, %v13352_v34  ;;  %v10897_v8 = vld [vmem:[#allocation11 + $0x138] sm:$0xff]   ;;  %v10900_v32 = vld [vmem:[#allocation11 + $0x240] sm:$0xff]  }
 0x623   : > { %v10899_v63 = vld [vmem:[#allocation11 + $0x1b8] sm:$0xff]  }
 0x624   : > { %v7250_v14 = vcombine.low %v7228_v36, %v7242_v52  ;;  %v7251_v48 = vcombine.high %v7228_v36, %v7242_v52  ;;  %v7253_v31 = vcombine.high %v13409_v58, %v13413_v16  ;;  %v7252_v3 = vcombine.low %v13409_v58, %v13413_v16  ;;  %v10902_v52 = vld [vmem:[#allocation11 + $0x2c0] sm:$0xff]   ;;  %v10904_v58 = vld [vmem:[#allocation11 + $0x248] sm:$0xff]  }
 0x625   : > { %v7319_v0 = vcombine.high %v13420_v42, %v13416_v28  ;;  %v7318_v41 = vcombine.low %v13420_v42, %v13416_v28  ;;  %v7321_v38 = vcombine.high %v7303_v13, %v7317_v10  ;;  %v7320_v20 = vcombine.low %v7303_v13, %v7317_v10  ;;  %v10890_v13 = vld [vmem:[#allocation11 + $0x1e8] sm:$0xff]   ;;  %v10901_v10 = vld [vmem:[#allocation11 + $0x200] sm:$0xff]  }
 0x626   : > { %v7274_v60 = vrot.slane %v7251_v48, %v13352_v34  ;;  %v7260_v54 = vrot.slane %v7250_v14, %v13352_v34  ;;  %v7281_v29 = vrot.slane %v7253_v31, %v13352_v34  ;;  %v7267_v37 = vrot.slane %v7252_v3, %v13352_v34  ;;  %v10903_v31 = vld [vmem:[#allocation11 + $0x280] sm:$0xff]   ;;  %v10905_v42 = vld [vmem:[#allocation11 + $0x208] sm:$0xff]  }
 0x627   : > { %v13434_v49 = vrot.slane %v7318_v41, %v13352_v34  ;;  %v13437_v43 = vrot.slane %v7321_v38, %v13352_v34  ;;  %v13440_v59 = vrot.slane %v7320_v20, %v13352_v34  ;;  %v7342_v51 = vrot.slane %v7319_v0, %v13352_v34  ;;  %v10906_v34 = vld [vmem:[#allocation11 + $0x2c8] sm:$0xff]   ;;  %v10908_v0 = vld [vmem:[#allocation11 + $0x250] sm:$0xff]  }
 0x628   : > { %v7371_v17 = vpack.c.bf16 %v7274_v60, %v7274_v60  ;;  %v7370_v57 = vpack.c.bf16 %v7260_v54, %v7260_v54  ;;  %v7284_v4 = vcombine.high %v7274_v60, %v7274_v60  ;;  %v7282_v12 = vcombine.high %v7260_v54, %v7260_v54  ;;  %v10907_v41 = vld [vmem:[#allocation11 + $0x288] sm:$0xff]   ;;  %v10910_v38 = vld [vmem:[#allocation11 + $0x2d0] sm:$0xff]   ;;  %v10912_v60 = vld [vmem:[#allocation11 + $0x258] sm:$0xff]  }
 0x629   : > { %v7285_v44 = vcombine.high %v7281_v29, %v7281_v29  ;;  %v7375_v62 = vpack.c.bf16 %v7281_v29, %v7281_v29  ;;  %v7283_v36 = vcombine.high %v7267_v37, %v7267_v37  ;;  %v7352_v14 = vcombine.high %v7342_v51, %v7342_v51  ;;  %v10909_v20 = vld [vmem:[#allocation11 + $0x210] sm:$0xff]   ;;  %v10914_v29 = vld [vmem:[#allocation11 + $0x2d8] sm:$0xff]  }
 0x62a   : > { %8449 = vmatprep.mubr.bf16.mxu0 %v7371_v17  ;;  %v7373_v47 = vpack.c.bf16 %v7284_v4, %v7284_v4  ;;  %v7372_v19 = vpack.c.bf16 %v7282_v12, %v7282_v12  ;;  %v7374_v48 = vpack.c.bf16 %v7267_v37, %v7267_v37  ;;  %v7379_v16 = vpack.c.bf16 %v7342_v51, %v7342_v51  ;;  %v10911_v54 = vld [vmem:[#allocation11 + $0x290] sm:$0xff]   ;;  %v10913_v17 = vld [vmem:[#allocation11 + $0x218] sm:$0xff]   ;;  %v10918_v4 = vld [vmem:[#allocation11 + $0x2e0] sm:$0xff]  }
 0x62b   : > { %8450 = vmatmul.mubr.bf16.vlgmr.msra.gmra.mrb[48].mxu0 %v7370_v57  ;;  %v7377_v39 = vpack.c.bf16 %v7285_v44, %v7285_v44  ;;  %v7376_v3 = vpack.c.bf16 %v7283_v36, %v7283_v36  ;;  %v7381_v28 = vpack.c.bf16 %v7352_v14, %v7352_v14  ;;  %v10916_v57 = vld [vmem:[#allocation11 + $0x260] sm:$0xff]   ;;  %v10920_v44 = vld [vmem:[#allocation11 + $0x268] sm:$0xff]   ;;  %v10956_v14 = vld [vmem:[#allocation11 + $0x370] sm:$0xff]  }
 0x62c   : > { %9673 = vmatpush3.bf16.msra.mxu0 %v10869_v24  ;;  %8489 = vmatprep.mubr.bf16.mxu1 %v7373_v47  ;;  %v10915_v24 = vld [vmem:[#allocation11 + $0x298] sm:$0xff]   ;;  %v10917_v12 = vld [vmem:[#allocation11 + $0x220] sm:$0xff]  }
 0x62d   : > { %8529 = vmatprep.mubr.bf16.mxu0 %v7375_v62  ;;  %8490 = vmatmul.mubr.bf16.vlgmr.msra.gmra.mrb[48].mxu1 %v7372_v19  ;;  %v10919_v47 = vld [vmem:[#allocation11 + $0x2a0] sm:$0xff]   ;;  %v10924_v62 = vld [vmem:[#allocation11 + $0x270] sm:$0xff]   ;;  %v10923_v19 = vld [vmem:[#allocation11 + $0x2a8] sm:$0xff]  }
 0x62e   : > { %9695 = vmatpush3.bf16.msra.mxu1 %v10871_v40  ;;  %9674 = vmatprep.subr.bf16.mxu0 %v10872_v61  ;;  %v10922_v40 = vld [vmem:[#allocation11 + $0x2e8] sm:$0xff]   ;;  %v10948_v37 = vld [vmem:[#allocation11 + $0x360] sm:$0xff]  }
 0x62f   : > { %8569 = vmatprep.mubr.bf16.mxu1 %v7377_v39  ;;  %9696 = vmatprep.subr.bf16.mxu1 %v10874_v11  ;;  %v10921_v61 = vld [vmem:[#allocation11 + $0x228] sm:$0xff]   ;;  %v10926_v11 = vld [vmem:[#allocation11 + $0x2f0] sm:$0xff]   ;;  %v10928_v39 = vld [vmem:[#allocation11 + $0x278] sm:$0xff]  }
 0x630   : > { %9675 = vmatpush3.bf16.msra.mxu0 %v10873_v15  ;;  %v10925_v15 = vld [vmem:[#allocation11 + $0x230] sm:$0xff]   ;;  %v10950_v51 = vld [vmem:[#allocation11 + $0x3e0] sm:$0xff]  }
 0x631   : > { %9676 = vmatprep.subr.bf16.mxu0 %v10876_v2  ;;  %v10927_v2 = vld [vmem:[#allocation11 + $0x2b0] sm:$0xff]   ;;  %v10951_v36 = vld [vmem:[#allocation11 + $0x3a0] sm:$0xff]  }
 0x632   : > { %9697 = vmatpush3.bf16.msra.mxu1 %v10875_v33  ;;  %v10930_v33 = vld [vmem:[#allocation11 + $0x2f8] sm:$0xff]  }
 0x633   : > { %9698 = vmatprep.subr.bf16.mxu1 %v10878_v56  ;;  %v10929_v56 = vld [vmem:[#allocation11 + $0x238] sm:$0xff]  }
 0x634   : > { %9677 = vmatpush3.bf16.msra.mxu0 %v10877_v18  ;;  %v10932_v18 = vld [vmem:[#allocation11 + $0x340] sm:$0xff]  }
 0x635   : > { %9678 = vmatprep.subr.bf16.mxu0 %v10880_v26  ;;  %v10931_v26 = vld [vmem:[#allocation11 + $0x2b8] sm:$0xff]  }
 0x636   : > { %9699 = vmatpush3.bf16.msra.mxu1 %v10879_v53  ;;  %v7350_v53 = vcombine.high %v13434_v49, %v13434_v49 }
 0x637   : > { %9700 = vmatprep.subr.bf16.mxu1 %v10882_v21  ;;  %v10934_v21 = vld [vmem:[#allocation11 + $0x3c0] sm:$0xff]  }
 0x638   : > { %9679 = vmatpush3.bf16.msra.mxu0 %v10881_v45  ;;  %v10933_v45 = vld [vmem:[#allocation11 + $0x300] sm:$0xff]  }
 0x639   : > { %9680 = vmatprep.subr.bf16.mxu0 %v10884_v5  ;;  %v7353_v5 = vcombine.high %v13437_v43, %v13437_v43 }
 0x63a   : > { %9701 = vmatpush3.bf16.msra.mxu1 %v10883_v22  ;;  %v7378_v22 = vpack.c.bf16 %v13434_v49, %v13434_v49  ;;  %v10939_v49 = vld [vmem:[#allocation11 + $0x388] sm:$0xff]  }
 0x63b   : > { %9702 = vmatprep.subr.bf16.mxu1 %v10886_v27  ;;  %v10936_v27 = vld [vmem:[#allocation11 + $0x348] sm:$0xff]  }
 0x63c   : > { %9681 = vmatpush3.bf16.msra.mxu0 %v10885_v9  ;;  %v7383_v9 = vpack.c.bf16 %v13437_v43, %v13437_v43  ;;  %v10944_v43 = vld [vmem:[#allocation11 + $0x358] sm:$0xff]  }
 0x63d   : > { %9682 = vmatprep.subr.bf16.mxu0 %v10888_v1  ;;  %v10935_v1 = vld [vmem:[#allocation11 + $0x380] sm:$0xff]  }
 0x63e   : > { %9703 = vmatpush3.bf16.msra.mxu1 %v10887_v35  ;;  %v7380_v35 = vpack.c.bf16 %v7350_v53, %v7350_v53 }
 0x63f   : > { %9704 = vmatprep.subr.bf16.mxu1 %v10890_v13  ;;  %v10938_v13 = vld [vmem:[#allocation11 + $0x3c8] sm:$0xff]  }
 0x640   : > { %9683 = vmatpush3.bf16.msra.mxu0 %v10889_v6  ;;  %v7385_v6 = vpack.c.bf16 %v7353_v5, %v7353_v5 }
 0x641   : > { %9684 = vmatprep.subr.bf16.mxu0 %v10892_v7  ;;  %v10937_v7 = vld [vmem:[#allocation11 + $0x308] sm:$0xff]  }
 0x642   : > { %9705 = vmatpush3.bf16.msra.mxu1 %v10891_v46  ;;  %v10940_v46 = vld [vmem:[#allocation11 + $0x350] sm:$0xff]  }
 0x643   : > { %9706 = vmatprep.subr.bf16.mxu1 %v10894_v23  ;;  %v10942_v23 = vld [vmem:[#allocation11 + $0x3d0] sm:$0xff]  }
 0x644   : > { %9685 = vmatpush3.bf16.msra.mxu0 %v10893_v55  ;;  %v10941_v55 = vld [vmem:[#allocation11 + $0x310] sm:$0xff]  }
 0x645   : > { %9686 = vmatprep.subr.bf16.mxu0 %v10896_v50  ;;  %v10943_v50 = vld [vmem:[#allocation11 + $0x390] sm:$0xff]  }
 0x646   : > { %9707 = vmatpush3.bf16.msra.mxu1 %v10895_v25  ;;  %v10946_v25 = vld [vmem:[#allocation11 + $0x3d8] sm:$0xff]  }
 0x647   : > { %9708 = vmatprep.subr.bf16.mxu1 %v10898_v30  ;;  %v10945_v30 = vld [vmem:[#allocation11 + $0x318] sm:$0xff]  }
 0x648   : > { %9687 = vmatpush3.bf16.msra.mxu0 %v10897_v8  ;;  %v10947_v8 = vld [vmem:[#allocation11 + $0x398] sm:$0xff]  }
 0x649   : > { %9716 = vmatprep.subr.bf16.mxu0 %v10900_v32  ;;  %v10949_v32 = vld [vmem:[#allocation11 + $0x320] sm:$0xff]  }
 0x64a   : > { %9709 = vmatpush3.bf16.msra.mxu1 %v10899_v63  ;;  %v10952_v63 = vld [vmem:[#allocation11 + $0x368] sm:$0xff]  }
 0x64b   : > { %8530 = vmatmul.mubr.bf16.vlgmr.msra.gmra.mrb[52].mxu0 %v7374_v48  ;;  %9738 = vmatprep.subr.bf16.mxu1 %v10902_v52  ;;  %v10954_v52 = vld [vmem:[#allocation11 + $0x3e8] sm:$0xff]  }
 0x64c   : > { %9717 = vmatpush3.bf16.msra.mxu0 %v10901_v10  ;;  %8609 = vmatprep.mubr.bf16.mxu0 %v7379_v16  ;;  %v10953_v10 = vld [vmem:[#allocation11 + $0x328] sm:$0xff]   ;;  %v10957_v16 = vld [vmem:[#allocation11 + $0x330] sm:$0xff]  }
 0x64d   : > { %8570 = vmatmul.mubr.bf16.vlgmr.msra.gmra.mrb[52].mxu1 %v7376_v3  ;;  %9718 = vmatprep.subr.bf16.mxu0 %v10904_v58  ;;  %v10955_v48 = vld [vmem:[#allocation11 + $0x3a8] sm:$0xff]   ;;  %v10958_v58 = vld [vmem:[#allocation11 + $0x3f0] sm:$0xff]  }
 0x64e   : > { %9739 = vmatpush3.bf16.msra.mxu1 %v10903_v31  ;;  %8649 = vmatprep.mubr.bf16.mxu1 %v7381_v28  ;;  %v10960_v31 = vld [vmem:[#allocation11 + $0x378] sm:$0xff]   ;;  %v10959_v3 = vld [vmem:[#allocation11 + $0x3b0] sm:$0xff]  }
 0x64f   : > { %9740 = vmatprep.subr.bf16.mxu1 %v10906_v34  ;;  %v10962_v34 = vld [vmem:[#allocation11 + $0x3f8] sm:$0xff]  }
 0x650   : > { %9719 = vmatpush3.bf16.msra.mxu0 %v10905_v42  ;;  %v10961_v28 = vld [vmem:[#allocation11 + $0x338] sm:$0xff]  }
 0x651   : > { %9720 = vmatprep.subr.bf16.mxu0 %v10908_v0  ;;  %v10963_v42 = vld [vmem:[#allocation11 + $0x3b8] sm:$0xff]   ;;  %v7351_v0 = vcombine.high %v13440_v59, %v13440_v59 }
 0x652   : > { %9741 = vmatpush3.bf16.msra.mxu1 %v10907_v41  ;;  %v7382_v41 = vpack.c.bf16 %v13440_v59, %v13440_v59 }
 0x653   : > { %9742 = vmatprep.subr.bf16.mxu1 %v10910_v38  ;;  %v7384_v38 = vpack.c.bf16 %v7351_v0, %v7351_v0 }
 0x654   : > { %9721 = vmatpush3.bf16.msra.mxu0 %v10909_v20 }
 0x655   : > { %9722 = vmatprep.subr.bf16.mxu0 %v10912_v60  ;;  %v9438_v60 = vld [vmem:[#allocation12] ss:$0 sm:$0xff] }
 0x656   : > { %9743 = vmatpush3.bf16.msra.mxu1 %v10911_v54 }
 0x657   : > { %9744 = vmatprep.subr.bf16.mxu1 %v10914_v29 }
 0x658   : > { %9723 = vmatpush3.bf16.msra.mxu0 %v10913_v17 }
 0x659   : > { %9724 = vmatprep.subr.bf16.mxu0 %v10916_v57 }
 0x65a   : > { %9745 = vmatpush3.bf16.msra.mxu1 %v10915_v24 }
 0x65b   : > { %9746 = vmatprep.subr.bf16.mxu1 %v10918_v4 }
 0x65c   : > { %9725 = vmatpush3.bf16.msra.mxu0 %v10917_v12 }
 0x65d   : > { %9726 = vmatprep.subr.bf16.mxu0 %v10920_v44 }
 0x65e   : > { %9747 = vmatpush3.bf16.msra.mxu1 %v10919_v47 }
 0x65f   : > { %9748 = vmatprep.subr.bf16.mxu1 %v10922_v40 }
 0x660   : > { %9727 = vmatpush3.bf16.msra.mxu0 %v10921_v61 }
 0x661   : > { %9728 = vmatprep.subr.bf16.mxu0 %v10924_v62 }
 0x662   : > { %9749 = vmatpush3.bf16.msra.mxu1 %v10923_v19 }
 0x663   : > { %9750 = vmatprep.subr.bf16.mxu1 %v10926_v11 }
 0x664   : > { %9729 = vmatpush3.bf16.msra.mxu0 %v10925_v15 }
 0x665   : > { %9730 = vmatprep.subr.bf16.mxu0 %v10928_v39 }
 0x666   : > { %9751 = vmatpush3.bf16.msra.mxu1 %v10927_v2 }
 0x667   : > { %9752 = vmatprep.subr.bf16.mxu1 %v10930_v33 }
 0x668   : > { %9731 = vmatpush3.bf16.msra.mxu0 %v10929_v56 }
 0x669   : > { %9760 = vmatprep.subr.bf16.mxu0 %v10932_v18 }
 0x66a   : > { %9753 = vmatpush3.bf16.msra.mxu1 %v10931_v26 }
 0x66b   : > { %8610 = vmatmul.mubr.bf16.vlgmr.msra.gmra.mrb[56].mxu0 %v7378_v22  ;;  %9782 = vmatprep.subr.bf16.mxu1 %v10934_v21 }
 0x66c   : > { %9761 = vmatpush3.bf16.msra.mxu0 %v10933_v45  ;;  %8689 = vmatprep.mubr.bf16.mxu0 %v7383_v9 }
 0x66d   : > { %8650 = vmatmul.mubr.bf16.vlgmr.msra.gmra.mrb[56].mxu1 %v7380_v35  ;;  %9762 = vmatprep.subr.bf16.mxu0 %v10936_v27 }
 0x66e   : > { %9783 = vmatpush3.bf16.msra.mxu1 %v10935_v1  ;;  %8729 = vmatprep.mubr.bf16.mxu1 %v7385_v6 }
 0x66f   : > { %9784 = vmatprep.subr.bf16.mxu1 %v10938_v13 }
 0x670   : > { %9763 = vmatpush3.bf16.msra.mxu0 %v10937_v7 }
 0x671   : > { %9764 = vmatprep.subr.bf16.mxu0 %v10940_v46 }
 0x672   : > { %9785 = vmatpush3.bf16.msra.mxu1 %v10939_v49 }
 0x673   : > { %9786 = vmatprep.subr.bf16.mxu1 %v10942_v23 }
 0x674   : > { %9765 = vmatpush3.bf16.msra.mxu0 %v10941_v55 }
 0x675   : > { %9766 = vmatprep.subr.bf16.mxu0 %v10944_v43 }
 0x676   : > { %9787 = vmatpush3.bf16.msra.mxu1 %v10943_v50 }
 0x677   : > { %9788 = vmatprep.subr.bf16.mxu1 %v10946_v25 }
 0x678   : > { %9767 = vmatpush3.bf16.msra.mxu0 %v10945_v30 }
 0x679   : > { %9768 = vmatprep.subr.bf16.mxu0 %v10948_v37 }
 0x67a   : > { %9789 = vmatpush3.bf16.msra.mxu1 %v10947_v8 }
 0x67b   : > { %9790 = vmatprep.subr.bf16.mxu1 %v10950_v51 }
 0x67c   : > { %9769 = vmatpush3.bf16.msra.mxu0 %v10949_v32 }
 0x67d   : > { %9770 = vmatprep.subr.bf16.mxu0 %v10952_v63 }
 0x67e   : > { %9791 = vmatpush3.bf16.msra.mxu1 %v10951_v36 }
 0x67f   : > { %9792 = vmatprep.subr.bf16.mxu1 %v10954_v52 }
 0x680   : > { %9771 = vmatpush3.bf16.msra.mxu0 %v10953_v10 }
 0x681   : > { %9772 = vmatprep.subr.bf16.mxu0 %v10956_v14 }
 0x682   : > { %9793 = vmatpush3.bf16.msra.mxu1 %v10955_v48 }
 0x683   : > { %9794 = vmatprep.subr.bf16.mxu1 %v10958_v58 }
 0x684   : > { %9773 = vmatpush3.bf16.msra.mxu0 %v10957_v16 }
 0x685   : > { %9774 = vmatprep.subr.bf16.mxu0 %v10960_v31 }
 0x686   : > { %9795 = vmatpush3.bf16.msra.mxu1 %v10959_v3 }
 0x687   : > { %9796 = vmatprep.subr.bf16.mxu1 %v10962_v34 }
 0x688   : > { %9775 = vmatpush3.bf16.msra.mxu0 %v10961_v28 }
 0x68a   : > { %9797 = vmatpush3.bf16.msra.mxu1 %v10963_v42 }
 0x68b   : > { %8690 = vmatmul.mubr.bf16.vlgmr.msra.gmra.mrb[60].mxu0 %v7382_v41 }
 0x68d   : > { %8730 = vmatmul.mubr.bf16.vlgmr.msra.gmra.mrb[60].mxu1 %v7384_v38 }
 0x6fe   : > { %v9644_v20 = vpop.f32.mrb[48].mxu0 }
 0x6ff   : > { %v9645_v54 = vpop.f32.mrb[49].mxu0 }
 0x700   : > { %v9646_v29 = vadd.f32 %v9645_v54, %v9644_v20  ;;  %v9647_v17 = vpop.f32.mrb[50].mxu0  ;;  %v9666_v57 = vpop.f32.mrb[48].mxu1 }
 0x701   : > { %v9648_v24 = vpop.f32.mrb[51].mxu0  ;;  %v9667_v4 = vpop.f32.mrb[49].mxu1 }
 0x702   : > { %v8452_v12 = vadd.f32 %v9646_v29, %v9438_v60  ;;  %v9668_v44 = vadd.f32 %v9667_v4, %v9666_v57  ;;  %v9669_v47 = vpop.f32.mrb[50].mxu1 }
 0x703   : > { %v9670_v40 = vpop.f32.mrb[51].mxu1 }
 0x704   : > { %v8492_v61 = vadd.f32 %v9668_v44, %v8452_v12 }
 0x71e   : > { %v9688_v62 = vpop.f32.mrb[52].mxu0 }
 0x71f   : > { %v9689_v19 = vpop.f32.mrb[53].mxu0 }
 0x720   : > { %v9690_v59 = vadd.f32 %v9689_v19, %v9688_v62  ;;  %v9691_v11 = vpop.f32.mrb[54].mxu0  ;;  %v9710_v15 = vpop.f32.mrb[52].mxu1 }
 0x721   : > { %v9692_v39 = vpop.f32.mrb[55].mxu0  ;;  %v9711_v2 = vpop.f32.mrb[53].mxu1 }
 0x722   : > { %v8532_v33 = vadd.f32 %v9690_v59, %v8492_v61  ;;  %v9712_v56 = vadd.f32 %v9711_v2, %v9710_v15  ;;  %v9713_v18 = vpop.f32.mrb[54].mxu1 }
 0x723   : > { %v9714_v26 = vpop.f32.mrb[55].mxu1 }
 0x724   : > { %v8572_v53 = vadd.f32 %v9712_v56, %v8532_v33 }
 0x73e   : > { %v9732_v21 = vpop.f32.mrb[56].mxu0 }
 0x73f   : > { %v9733_v45 = vpop.f32.mrb[57].mxu0 }
 0x740   : > { %v9734_v5 = vadd.f32 %v9733_v45, %v9732_v21  ;;  %v9735_v22 = vpop.f32.mrb[58].mxu0  ;;  %v9754_v27 = vpop.f32.mrb[56].mxu1 }
 0x741   : > { %v9736_v9 = vpop.f32.mrb[59].mxu0  ;;  %v9755_v1 = vpop.f32.mrb[57].mxu1 }
 0x742   : > { %v8612_v35 = vadd.f32 %v9734_v5, %v8572_v53  ;;  %v9756_v13 = vadd.f32 %v9755_v1, %v9754_v27  ;;  %v9757_v6 = vpop.f32.mrb[58].mxu1 }
 0x743   : > { %v9758_v7 = vpop.f32.mrb[59].mxu1 }
 0x744   : > { %v8652_v46 = vadd.f32 %v9756_v13, %v8612_v35 }
 0x75e   : > { %v9776_v49 = vpop.f32.mrb[60].mxu0 }
 0x75f   : > { %v9777_v23 = vpop.f32.mrb[61].mxu0 }
 0x760   : > { %v9778_v55 = vadd.f32 %v9777_v23, %v9776_v49  ;;  %v9779_v43 = vpop.f32.mrb[62].mxu0  ;;  %v9798_v50 = vpop.f32.mrb[60].mxu1 }
 0x761   : > { %v9780_v25 = vpop.f32.mrb[63].mxu0  ;;  %v9799_v30 = vpop.f32.mrb[61].mxu1 }
 0x762   : > { %v8692_v37 = vadd.f32 %v9778_v55, %v8652_v46  ;;  %v9800_v8 = vadd.f32 %v9799_v30, %v9798_v50  ;;  %v9801_v51 = vpop.f32.mrb[62].mxu1 }
 0x763   : > { %v9802_v32 = vpop.f32.mrb[63].mxu1 }
 0x764   : > { %v8732_v63 = vadd.f32 %v9800_v8, %v8692_v37 }
 0x766   : > { %8737 = vst [vmem:[%s356_s4] sm:$0xf] %v8732_v63 }
 0x767   : > { %11211 = shalt.err (!%p11208_p6)
}
 0x768   : > { %s11212_s19 = scalar_lea.hbm %s13467_s22, 64  ;;  %s11216_s18 = scalar_lea.hbm %s13516_s7, 128 }
 0x769   : > { %p11213_p5 = scmp.ne.s32.totalorder %s13467_s22, %s11212_s19  ;;  %p11217_p10 = scmp.lt.u32.totalorder %s13467_s22, %s13516_s7 }
 0x76a   : > { %p11218_p2 = scmp.lt.u32.totalorder %s11216_s18, %s11212_s19  ;;  %p11220_p4 = scmp.lt.u32.totalorder %s11212_s19, %s13467_s22 }
 0x76b   : > { %p11214_p9 = pnand %p11213_p5, %p13815_p7 }
 0x76c   : > { %p11219_p3 = por %p11218_p2, %p11217_p10 }
 0x76d   : > { %p11215_p12 = pneg %p11214_p9 }
 0x76e   : > { %p11221_p8 = por %p11220_p4, %p11219_p3 }
 0x770   : > { %p11222_p11 = pnand %p11221_p8, %p11215_p12 }
 0x772   : > { %11225 = shalt.err (!%p11222_p11)
}
 0x773   : > { %10212 = dma.vmem_to_hbm [thread:$0]  (%p13815_p7), %s13469_s26, 64, %s13467_s22, %s8739_s23  }
 0x774 PF: > { %p10249_p13 = scmp.ge.s32.totalorder %s11276_s27, 2  ;;  %s8764_s29 = sand.u32 1, %s11264_s24  }
 0x775   : > { %p13816_p1 = scmp.ne.s32.totalorder %s13622_s12, 0  ;;  %s8765_s17 = scalar_lea.sflag [#allocation5], %s8764_s29 }
 0x777   : > { %p10234_p0 = pnand %p10249_p13, %p13816_p1 }
 0x779   : > { %11259 = dma.done.wait (!%p10234_p0), %s8765_s17, 64  }
 0x77a   : > { %11261 = vsyncadd (!%p10234_p0), %s8765_s17, 4294967232  ;;  %s13817_s27 = sld [smem:[#allocation21_spill]]  ;;  %s13818_s20 = sld [smem:[#allocation20_spill]] }
 0x77b   : > { %s13819_s26 = sld [smem:[#allocation22_spill]]  ;;  %s13820_s24 = smov %s11268_s25 }
 0x780   : > { %p21_p6 = scmp.ge.s32.totalorder %s13817_s27, 4   ;;  %s13821_s25 = smov %s13818_s20 }
 0x782   :  { %23 = sbr.rel (!%p21_p6) target bundleno = 10 (0xa), region = 126 }
 0x789   :  { %8770 = vsyncpa [#allocation4], 1 }
 0x78a   :  { %8772 = vsyncpa [#allocation4 + $0x1], 1 }
 0x78b   :  { %8773 = vsyncpa [#allocation7], 1 }
 0x78c   :  { %8774 = vsyncpa [#allocation10], 1 }
 0x78d   :  { %8775 = vsyncpa [#allocation13], 1 }
 0x78e   :  { %8776 = vsyncpa [#allocation5], 1 }
 0x78f   :  { %8778 = vsyncpa [#allocation5 + $0x1], 1 }

</bundles_post_ra>
